<compile_context>
chip_gen: v6e
topology: v6e:2x2x1
jax: 0.10.0
libtpu: 0.0.40
codegen_flags: <defaults>
</compile_context>

<pallas_src>
import functools

import jax
import jax.numpy as jnp
import numpy as np
from jax.experimental import pallas as pl
from jax.experimental.pallas import tpu as pltpu

PART = 6           # PCB parts
ININPUTS = 1280    # mobilenet_v2 feature channels
BOTTLENECK = 256   # ClassBlock num_bottleneck in PCB
LANE = 128
SUBLANE = 16       # bf16 sublane packing (also a multiple of the f32 8)


def _round_up(x, m):
    return (x + m - 1) // m * m


# --------------------------------------------------------------------------
# Kernel
# --------------------------------------------------------------------------
def _pcb_head_kernel(pooled_ref, wc_ref, bc_ref, wl_ref, bl_ref, out_ref):
    # pooled_ref: (PART, tn, C)        bf16  part-wise avg-pooled features (N tile)
    # wc_ref:     (PART, C, B)         bf16  1x1 conv weight with BN scale folded in
    # bc_ref:     (PART, 1, B)         f32   folded BN shift (conv has no bias)
    # wl_ref:     (PART, B, cls_pad)   bf16  Linear weight (zero-padded columns)
    # bl_ref:     (PART, 1, cls_pad)   f32   Linear bias   (zero-padded columns)
    # out_ref:    (PART, tn, cls_pad)  bf16  logits
    for p in range(PART):   # static unroll; all 6 parts' weights are VMEM-resident
        # 1x1 Conv (no bias) with folded BatchNorm2d(eval), then ReLU.
        h = jnp.dot(pooled_ref[p], wc_ref[p], preferred_element_type=jnp.float32)
        h = jnp.maximum(h + bc_ref[p], 0.0)
        # Classifier Linear.
        logits = jnp.dot(h.astype(wl_ref.dtype), wl_ref[p],
                         preferred_element_type=jnp.float32) + bl_ref[p]
        out_ref[p] = logits.astype(out_ref.dtype)


# --------------------------------------------------------------------------
# One-time weight preparation (hoisted out of the per-call path)
# --------------------------------------------------------------------------
def prepare_params(params):
    """Fold BN into the conv, cast weights to bf16, pad class dim to 128.

    Run ONCE at model-load time; pcb_forward takes the returned tuple.
    """
    wc, scale, shift, wl, bl = params
    cls = wl.shape[-1]
    cls_pad = _round_up(cls, LANE)
    B = wc.shape[-1]

    wc_f = (wc * scale).astype(jnp.bfloat16)                          # (PART, C, B)
    bc = shift.astype(jnp.float32)                                    # (PART, 1, B)
    wl_p = jnp.zeros((PART, B, cls_pad), jnp.bfloat16).at[:, :, :cls].set(
        wl.astype(jnp.bfloat16))                                      # (PART, B, cls_pad)
    bl_p = jnp.zeros((PART, 1, cls_pad), jnp.float32).at[:, :, :cls].set(
        bl.astype(jnp.float32))                                       # (PART, 1, cls_pad)
    prepared = (wc_f, bc, wl_p, bl_p)
    return jax.tree_util.tree_map(jax.block_until_ready, prepared), cls


def _pick_tile_and_vmem(n_pad, C, B, cls_pad, tile_n):
    """Pick an N tile that fits comfortably in VMEM and a matching scoped limit."""
    tn = min(tile_n, n_pad)
    tn = max(SUBLANE, (tn // SUBLANE) * SUBLANE)
    weight_bytes = 2 * (PART * C * B * 2          # wc bf16 (x2 buffers, conservative)
                        + PART * B * cls_pad * 2  # wl bf16
                        + PART * (B + cls_pad) * 4)
    while True:
        act_bytes = 2 * PART * tn * (C + cls_pad) * 2   # double-buffered in/out bf16
        need = act_bytes + weight_bytes
        if need <= (44 << 20) or tn <= SUBLANE:
            break
        tn = max(SUBLANE, ((tn // 2) // SUBLANE) * SUBLANE)
    vmem_limit = int(min(need + (16 << 20), 56 << 20))   # stay under v7x's 64 MiB
    return tn, vmem_limit


# --------------------------------------------------------------------------
# Forward
# --------------------------------------------------------------------------
@functools.partial(jax.jit, static_argnames=("class_num", "tile_n"))
def pcb_forward(x_nchw, prepared, class_num, tile_n=256):
    """PCB head: AdaptiveAvgPool2d((6,1)) + 6 x [1x1 conv -> BN(eval) -> ReLU -> Linear].

    x_nchw:   backbone feature map (N, C=1280, H, W), H divisible by PART.
    prepared: output of prepare_params() (pre-folded / pre-cast / pre-padded).
    Returns a list of PART arrays, each (N, class_num), matching the PyTorch forward.
    """
    wc_f, bc, wl_p, bl_p = prepared
    N, C, H, W = x_nchw.shape
    assert H % PART == 0, "adaptive pool here assumes H divisible by 6"
    hs = H // PART
    B = wc_f.shape[-1]
    cls_pad = wl_p.shape[-1]

    # AdaptiveAvgPool2d((PART, 1)) in XLA on the native NCHW layout (trivial
    # mem-bound reduction); only the tiny pooled tensor is transposed/cast.
    pooled = x_nchw.reshape(N, C, PART, hs, W).mean(axis=(3, 4))      # (N, C, PART) f32
    pooled = jnp.transpose(pooled, (2, 0, 1)).astype(jnp.bfloat16)    # (PART, N, C) bf16

    # Pad batch to a sublane multiple so every store is full / unmasked.
    n_pad = _round_up(N, SUBLANE)
    if n_pad != N:
        pooled = jnp.pad(pooled, ((0, 0), (0, n_pad - N), (0, 0)))

    tn, vmem_limit = _pick_tile_and_vmem(n_pad, C, B, cls_pad, tile_n)
    grid = (pl.cdiv(n_pad, tn),)

    out = pl.pallas_call(
        _pcb_head_kernel,
        out_shape=jax.ShapeDtypeStruct((PART, n_pad, cls_pad), jnp.bfloat16),
        grid_spec=pltpu.PrefetchScalarGridSpec(
            num_scalar_prefetch=0,
            grid=grid,
            in_specs=[
                # Activations: tiled over the batch axis (pipelined).
                pl.BlockSpec((PART, tn, C), lambda i: (0, i, 0)),
                # Weights/biases: constant block index -> DMA'd once, VMEM-resident.
                pl.BlockSpec((PART, C, B), lambda i: (0, 0, 0)),
                pl.BlockSpec((PART, 1, B), lambda i: (0, 0, 0)),
                pl.BlockSpec((PART, B, cls_pad), lambda i: (0, 0, 0)),
                pl.BlockSpec((PART, 1, cls_pad), lambda i: (0, 0, 0)),
            ],
            out_specs=pl.BlockSpec((PART, tn, cls_pad), lambda i: (0, i, 0)),
        ),
        compiler_params=pltpu.CompilerParams(
            dimension_semantics=("parallel",),
            vmem_limit_bytes=vmem_limit,
        ),
    )(pooled, wc_f, bc, wl_p, bl_p)

    out = out[:, :N, :class_num].astype(jnp.float32)                  # (PART, N, cls)
    # PyTorch forward returns a list of `part` tensors, each (N, class_num).
    return [out[i] for i in range(PART)]


# --------------------------------------------------------------------------
# Parameter init (matches the PyTorch init schemes) and f32 reference
# --------------------------------------------------------------------------
def init_params(key, C=ININPUTS, B=BOTTLENECK, class_num=128):
    keys = jax.random.split(key, 2 * PART)
    # Conv2d(C, B, k=1, bias=False), kaiming_normal_(mode='fan_out', relu):
    # std = sqrt(2 / fan_out), fan_out = B * 1 * 1
    conv_std = float(np.sqrt(2.0 / B))
    wc = jnp.stack([conv_std * jax.random.normal(keys[2 * i], (C, B), jnp.float32)
                    for i in range(PART)])
    # BatchNorm2d(B): weight=1, bias=0, running_mean=0, running_var=1, eps=1e-5 (eval)
    eps = 1e-5
    gamma = jnp.ones((PART, 1, B), jnp.float32)
    beta = jnp.zeros((PART, 1, B), jnp.float32)
    running_mean = jnp.zeros((PART, 1, B), jnp.float32)
    running_var = jnp.ones((PART, 1, B), jnp.float32)
    scale = gamma / jnp.sqrt(running_var + eps)
    shift = beta - running_mean * scale
    # Linear(B, class_num): init.normal_(std=0.001), bias=0
    wl = jnp.stack([0.001 * jax.random.normal(keys[2 * i + 1], (B, class_num), jnp.float32)
                    for i in range(PART)])
    bl = jnp.zeros((PART, 1, class_num), jnp.float32)
    return wc, scale, shift, wl, bl


def pcb_reference(x_nchw, params):
    """Pure-JAX f32 reference of the same head (for correctness check)."""
    wc, scale, shift, wl, bl = params
    N, C, H, W = x_nchw.shape
    hs = H // PART
    pooled = x_nchw.reshape(N, C, PART, hs, W).mean(axis=(3, 4))   # (N, C, PART)
    outs = []
    for i in range(PART):
        f = pooled[:, :, i]                                        # (N, C)
        h = jnp.maximum(f @ wc[i] * scale[i] + shift[i], 0.0)
        outs.append(h @ wl[i] + bl[i])
    return outs


if __name__ == "__main__":
    key = jax.random.PRNGKey(0)
    kx, kp = jax.random.split(key)

    # Backbone output feature map (small shapes): N=2, C=1280, H=12, W=4
    N, C, H, W = 2, ININPUTS, 12, 4
    class_num = 128
    x = jax.random.normal(kx, (N, C, H, W), jnp.float32)
    params = init_params(kp, C=C, B=BOTTLENECK, class_num=class_num)

    # Weight prep runs ONCE, outside the per-call path.
    prepared, cls = prepare_params(params)

    out = jax.block_until_ready(pcb_forward(x, prepared, class_num=cls))

    ref = pcb_reference(x, params)
    # bf16 weights/activations/logits with f32 accumulation -> loosened tolerance.
    for o, r in zip(out, ref):
        np.testing.assert_allclose(np.asarray(o), np.asarray(r), rtol=2e-2, atol=1e-3)

    print("KERNEL_OK")
</pallas_src>

<mosaic_0001>
module attributes {stable_mosaic.version = 11 : i64} {
  func.func @_pcb_head_kernel(%arg0: i32, %arg1: memref<6x16x1280xbf16, #tpu.memory_space<vmem>>, %arg2: memref<6x1280x256xbf16, #tpu.memory_space<vmem>>, %arg3: memref<6x1x256xf32, #tpu.memory_space<vmem>>, %arg4: memref<6x256x128xbf16, #tpu.memory_space<vmem>>, %arg5: memref<6x1x128xf32, #tpu.memory_space<vmem>>, %arg6: memref<6x16x128xbf16, #tpu.memory_space<vmem>>) attributes {dimension_semantics = [#tpu.dimension_semantics<parallel>], iteration_bounds = array<i64: 1>, scalar_prefetch = 0 : i64, scratch_operands = 0 : i64, tpu.core_type = #tpu.core_type<tc>, window_params = [{transform_indices = @transform_0, window_bounds = array<i64: 6, 16, 1280>}, {pipeline_mode = #tpu.pipeline_mode<synchronous>, transform_indices = @transform_1, window_bounds = array<i64: 6, 1280, 256>}, {pipeline_mode = #tpu.pipeline_mode<synchronous>, transform_indices = @transform_2, window_bounds = array<i64: 6, 1, 256>}, {pipeline_mode = #tpu.pipeline_mode<synchronous>, transform_indices = @transform_3, window_bounds = array<i64: 6, 256, 128>}, {pipeline_mode = #tpu.pipeline_mode<synchronous>, transform_indices = @transform_4, window_bounds = array<i64: 6, 1, 128>}, {transform_indices = @transform_5, window_bounds = array<i64: 6, 16, 128>}]} {
    %c0 = arith.constant 0 : index
    %c0_0 = arith.constant 0 : index
    %c0_1 = arith.constant 0 : index
    %0 = vector.load %arg1[%c0, %c0_0, %c0_1] : memref<6x16x1280xbf16, #tpu.memory_space<vmem>>, vector<1x16x1280xbf16>
    %1 = vector.shape_cast %0 : vector<1x16x1280xbf16> to vector<16x1280xbf16>
    %c0_2 = arith.constant 0 : index
    %c0_3 = arith.constant 0 : index
    %c0_4 = arith.constant 0 : index
    %2 = vector.load %arg2[%c0_2, %c0_3, %c0_4] : memref<6x1280x256xbf16, #tpu.memory_space<vmem>>, vector<1x1280x256xbf16>
    %3 = vector.shape_cast %2 : vector<1x1280x256xbf16> to vector<1280x256xbf16>
    %cst = arith.constant dense<0.000000e+00> : vector<16x256xf32>
    %4 = tpu.matmul %1, %3, %cst {dimension_numbers = #tpu.dot_dimension_numbers<[1], [0], [0], [1], [0, 0, 1, 1], [], []>} : vector<16x1280xbf16>, vector<1280x256xbf16>, vector<16x256xf32> -> vector<16x256xf32>
    %c0_5 = arith.constant 0 : index
    %c0_6 = arith.constant 0 : index
    %c0_7 = arith.constant 0 : index
    %5 = vector.load %arg3[%c0_5, %c0_6, %c0_7] : memref<6x1x256xf32, #tpu.memory_space<vmem>>, vector<1x1x256xf32>
    %6 = vector.shape_cast %5 : vector<1x1x256xf32> to vector<1x256xf32>
    %7 = vector.broadcast %6 : vector<1x256xf32> to vector<16x256xf32>
    %8 = arith.addf %4, %7 : vector<16x256xf32>
    %cst_8 = arith.constant 0.000000e+00 : f32
    %9 = vector.broadcast %cst_8 : f32 to vector<16x256xf32>
    %10 = arith.maximumf %8, %9 : vector<16x256xf32>
    %11 = arith.truncf %10 : vector<16x256xf32> to vector<16x256xbf16>
    %c0_9 = arith.constant 0 : index
    %c0_10 = arith.constant 0 : index
    %c0_11 = arith.constant 0 : index
    %12 = vector.load %arg4[%c0_9, %c0_10, %c0_11] : memref<6x256x128xbf16, #tpu.memory_space<vmem>>, vector<1x256x128xbf16>
    %13 = vector.shape_cast %12 : vector<1x256x128xbf16> to vector<256x128xbf16>
    %cst_12 = arith.constant dense<0.000000e+00> : vector<16x128xf32>
    %14 = tpu.matmul %11, %13, %cst_12 {dimension_numbers = #tpu.dot_dimension_numbers<[1], [0], [0], [1], [0, 0, 1, 1], [], []>} : vector<16x256xbf16>, vector<256x128xbf16>, vector<16x128xf32> -> vector<16x128xf32>
    %c0_13 = arith.constant 0 : index
    %c0_14 = arith.constant 0 : index
    %c0_15 = arith.constant 0 : index
    %15 = vector.load %arg5[%c0_13, %c0_14, %c0_15] : memref<6x1x128xf32, #tpu.memory_space<vmem>>, vector<1x1x128xf32>
    %16 = vector.shape_cast %15 : vector<1x1x128xf32> to vector<1x128xf32>
    %17 = vector.broadcast %16 : vector<1x128xf32> to vector<16x128xf32>
    %18 = arith.addf %14, %17 : vector<16x128xf32>
    %19 = arith.truncf %18 : vector<16x128xf32> to vector<16x128xbf16>
    %c0_16 = arith.constant 0 : index
    %c0_17 = arith.constant 0 : index
    %c0_18 = arith.constant 0 : index
    %20 = vector.load %arg6[%c0_16, %c0_17, %c0_18] : memref<6x16x128xbf16, #tpu.memory_space<vmem>>, vector<1x16x128xbf16>
    %21 = vector.shape_cast %20 : vector<1x16x128xbf16> to vector<16x128xbf16>
    %22 = vector.shape_cast %19 : vector<16x128xbf16> to vector<1x16x128xbf16>
    tpu.vector_store %arg6[%c0_16, %c0_17, %c0_18], %22 {strides = array<i32>} : memref<6x16x128xbf16, #tpu.memory_space<vmem>>, vector<1x16x128xbf16>,
    %c1 = arith.constant 1 : index
    %c0_19 = arith.constant 0 : index
    %c0_20 = arith.constant 0 : index
    %23 = vector.load %arg1[%c1, %c0_19, %c0_20] : memref<6x16x1280xbf16, #tpu.memory_space<vmem>>, vector<1x16x1280xbf16>
    %24 = vector.shape_cast %23 : vector<1x16x1280xbf16> to vector<16x1280xbf16>
    %c1_21 = arith.constant 1 : index
    %c0_22 = arith.constant 0 : index
    %c0_23 = arith.constant 0 : index
    %25 = vector.load %arg2[%c1_21, %c0_22, %c0_23] : memref<6x1280x256xbf16, #tpu.memory_space<vmem>>, vector<1x1280x256xbf16>
    %26 = vector.shape_cast %25 : vector<1x1280x256xbf16> to vector<1280x256xbf16>
    %cst_24 = arith.constant dense<0.000000e+00> : vector<16x256xf32>
    %27 = tpu.matmul %24, %26, %cst_24 {dimension_numbers = #tpu.dot_dimension_numbers<[1], [0], [0], [1], [0, 0, 1, 1], [], []>} : vector<16x1280xbf16>, vector<1280x256xbf16>, vector<16x256xf32> -> vector<16x256xf32>
    %c1_25 = arith.constant 1 : index
    %c0_26 = arith.constant 0 : index
    %c0_27 = arith.constant 0 : index
    %28 = vector.load %arg3[%c1_25, %c0_26, %c0_27] : memref<6x1x256xf32, #tpu.memory_space<vmem>>, vector<1x1x256xf32>
    %29 = vector.shape_cast %28 : vector<1x1x256xf32> to vector<1x256xf32>
    %30 = vector.broadcast %29 : vector<1x256xf32> to vector<16x256xf32>
    %31 = arith.addf %27, %30 : vector<16x256xf32>
    %cst_28 = arith.constant 0.000000e+00 : f32
    %32 = vector.broadcast %cst_28 : f32 to vector<16x256xf32>
    %33 = arith.maximumf %31, %32 : vector<16x256xf32>
    %34 = arith.truncf %33 : vector<16x256xf32> to vector<16x256xbf16>
    %c1_29 = arith.constant 1 : index
    %c0_30 = arith.constant 0 : index
    %c0_31 = arith.constant 0 : index
    %35 = vector.load %arg4[%c1_29, %c0_30, %c0_31] : memref<6x256x128xbf16, #tpu.memory_space<vmem>>, vector<1x256x128xbf16>
    %36 = vector.shape_cast %35 : vector<1x256x128xbf16> to vector<256x128xbf16>
    %cst_32 = arith.constant dense<0.000000e+00> : vector<16x128xf32>
    %37 = tpu.matmul %34, %36, %cst_32 {dimension_numbers = #tpu.dot_dimension_numbers<[1], [0], [0], [1], [0, 0, 1, 1], [], []>} : vector<16x256xbf16>, vector<256x128xbf16>, vector<16x128xf32> -> vector<16x128xf32>
    %c1_33 = arith.constant 1 : index
    %c0_34 = arith.constant 0 : index
    %c0_35 = arith.constant 0 : index
    %38 = vector.load %arg5[%c1_33, %c0_34, %c0_35] : memref<6x1x128xf32, #tpu.memory_space<vmem>>, vector<1x1x128xf32>
    %39 = vector.shape_cast %38 : vector<1x1x128xf32> to vector<1x128xf32>
    %40 = vector.broadcast %39 : vector<1x128xf32> to vector<16x128xf32>
    %41 = arith.addf %37, %40 : vector<16x128xf32>
    %42 = arith.truncf %41 : vector<16x128xf32> to vector<16x128xbf16>
    %c1_36 = arith.constant 1 : index
    %c0_37 = arith.constant 0 : index
    %c0_38 = arith.constant 0 : index
    %43 = vector.load %arg6[%c1_36, %c0_37, %c0_38] : memref<6x16x128xbf16, #tpu.memory_space<vmem>>, vector<1x16x128xbf16>
    %44 = vector.shape_cast %43 : vector<1x16x128xbf16> to vector<16x128xbf16>
    %45 = vector.shape_cast %42 : vector<16x128xbf16> to vector<1x16x128xbf16>
    tpu.vector_store %arg6[%c1_36, %c0_37, %c0_38], %45 {strides = array<i32>} : memref<6x16x128xbf16, #tpu.memory_space<vmem>>, vector<1x16x128xbf16>,
    %c2 = arith.constant 2 : index
    %c0_39 = arith.constant 0 : index
    %c0_40 = arith.constant 0 : index
    %46 = vector.load %arg1[%c2, %c0_39, %c0_40] : memref<6x16x1280xbf16, #tpu.memory_space<vmem>>, vector<1x16x1280xbf16>
    %47 = vector.shape_cast %46 : vector<1x16x1280xbf16> to vector<16x1280xbf16>
    %c2_41 = arith.constant 2 : index
    %c0_42 = arith.constant 0 : index
    %c0_43 = arith.constant 0 : index
    %48 = vector.load %arg2[%c2_41, %c0_42, %c0_43] : memref<6x1280x256xbf16, #tpu.memory_space<vmem>>, vector<1x1280x256xbf16>
    %49 = vector.shape_cast %48 : vector<1x1280x256xbf16> to vector<1280x256xbf16>
    %cst_44 = arith.constant dense<0.000000e+00> : vector<16x256xf32>
    %50 = tpu.matmul %47, %49, %cst_44 {dimension_numbers = #tpu.dot_dimension_numbers<[1], [0], [0], [1], [0, 0, 1, 1], [], []>} : vector<16x1280xbf16>, vector<1280x256xbf16>, vector<16x256xf32> -> vector<16x256xf32>
    %c2_45 = arith.constant 2 : index
    %c0_46 = arith.constant 0 : index
    %c0_47 = arith.constant 0 : index
    %51 = vector.load %arg3[%c2_45, %c0_46, %c0_47] : memref<6x1x256xf32, #tpu.memory_space<vmem>>, vector<1x1x256xf32>
    %52 = vector.shape_cast %51 : vector<1x1x256xf32> to vector<1x256xf32>
    %53 = vector.broadcast %52 : vector<1x256xf32> to vector<16x256xf32>
    %54 = arith.addf %50, %53 : vector<16x256xf32>
    %cst_48 = arith.constant 0.000000e+00 : f32
    %55 = vector.broadcast %cst_48 : f32 to vector<16x256xf32>
    %56 = arith.maximumf %54, %55 : vector<16x256xf32>
    %57 = arith.truncf %56 : vector<16x256xf32> to vector<16x256xbf16>
    %c2_49 = arith.constant 2 : index
    %c0_50 = arith.constant 0 : index
    %c0_51 = arith.constant 0 : index
    %58 = vector.load %arg4[%c2_49, %c0_50, %c0_51] : memref<6x256x128xbf16, #tpu.memory_space<vmem>>, vector<1x256x128xbf16>
    %59 = vector.shape_cast %58 : vector<1x256x128xbf16> to vector<256x128xbf16>
    %cst_52 = arith.constant dense<0.000000e+00> : vector<16x128xf32>
    %60 = tpu.matmul %57, %59, %cst_52 {dimension_numbers = #tpu.dot_dimension_numbers<[1], [0], [0], [1], [0, 0, 1, 1], [], []>} : vector<16x256xbf16>, vector<256x128xbf16>, vector<16x128xf32> -> vector<16x128xf32>
    %c2_53 = arith.constant 2 : index
    %c0_54 = arith.constant 0 : index
    %c0_55 = arith.constant 0 : index
    %61 = vector.load %arg5[%c2_53, %c0_54, %c0_55] : memref<6x1x128xf32, #tpu.memory_space<vmem>>, vector<1x1x128xf32>
    %62 = vector.shape_cast %61 : vector<1x1x128xf32> to vector<1x128xf32>
    %63 = vector.broadcast %62 : vector<1x128xf32> to vector<16x128xf32>
    %64 = arith.addf %60, %63 : vector<16x128xf32>
    %65 = arith.truncf %64 : vector<16x128xf32> to vector<16x128xbf16>
    %c2_56 = arith.constant 2 : index
    %c0_57 = arith.constant 0 : index
    %c0_58 = arith.constant 0 : index
    %66 = vector.load %arg6[%c2_56, %c0_57, %c0_58] : memref<6x16x128xbf16, #tpu.memory_space<vmem>>, vector<1x16x128xbf16>
    %67 = vector.shape_cast %66 : vector<1x16x128xbf16> to vector<16x128xbf16>
    %68 = vector.shape_cast %65 : vector<16x128xbf16> to vector<1x16x128xbf16>
    tpu.vector_store %arg6[%c2_56, %c0_57, %c0_58], %68 {strides = array<i32>} : memref<6x16x128xbf16, #tpu.memory_space<vmem>>, vector<1x16x128xbf16>,
    %c3 = arith.constant 3 : index
    %c0_59 = arith.constant 0 : index
    %c0_60 = arith.constant 0 : index
    %69 = vector.load %arg1[%c3, %c0_59, %c0_60] : memref<6x16x1280xbf16, #tpu.memory_space<vmem>>, vector<1x16x1280xbf16>
    %70 = vector.shape_cast %69 : vector<1x16x1280xbf16> to vector<16x1280xbf16>
    %c3_61 = arith.constant 3 : index
    %c0_62 = arith.constant 0 : index
    %c0_63 = arith.constant 0 : index
    %71 = vector.load %arg2[%c3_61, %c0_62, %c0_63] : memref<6x1280x256xbf16, #tpu.memory_space<vmem>>, vector<1x1280x256xbf16>
    %72 = vector.shape_cast %71 : vector<1x1280x256xbf16> to vector<1280x256xbf16>
    %cst_64 = arith.constant dense<0.000000e+00> : vector<16x256xf32>
    %73 = tpu.matmul %70, %72, %cst_64 {dimension_numbers = #tpu.dot_dimension_numbers<[1], [0], [0], [1], [0, 0, 1, 1], [], []>} : vector<16x1280xbf16>, vector<1280x256xbf16>, vector<16x256xf32> -> vector<16x256xf32>
    %c3_65 = arith.constant 3 : index
    %c0_66 = arith.constant 0 : index
    %c0_67 = arith.constant 0 : index
    %74 = vector.load %arg3[%c3_65, %c0_66, %c0_67] : memref<6x1x256xf32, #tpu.memory_space<vmem>>, vector<1x1x256xf32>
    %75 = vector.shape_cast %74 : vector<1x1x256xf32> to vector<1x256xf32>
    %76 = vector.broadcast %75 : vector<1x256xf32> to vector<16x256xf32>
    %77 = arith.addf %73, %76 : vector<16x256xf32>
    %cst_68 = arith.constant 0.000000e+00 : f32
    %78 = vector.broadcast %cst_68 : f32 to vector<16x256xf32>
    %79 = arith.maximumf %77, %78 : vector<16x256xf32>
    %80 = arith.truncf %79 : vector<16x256xf32> to vector<16x256xbf16>
    %c3_69 = arith.constant 3 : index
    %c0_70 = arith.constant 0 : index
    %c0_71 = arith.constant 0 : index
    %81 = vector.load %arg4[%c3_69, %c0_70, %c0_71] : memref<6x256x128xbf16, #tpu.memory_space<vmem>>, vector<1x256x128xbf16>
    %82 = vector.shape_cast %81 : vector<1x256x128xbf16> to vector<256x128xbf16>
    %cst_72 = arith.constant dense<0.000000e+00> : vector<16x128xf32>
    %83 = tpu.matmul %80, %82, %cst_72 {dimension_numbers = #tpu.dot_dimension_numbers<[1], [0], [0], [1], [0, 0, 1, 1], [], []>} : vector<16x256xbf16>, vector<256x128xbf16>, vector<16x128xf32> -> vector<16x128xf32>
    %c3_73 = arith.constant 3 : index
    %c0_74 = arith.constant 0 : index
    %c0_75 = arith.constant 0 : index
    %84 = vector.load %arg5[%c3_73, %c0_74, %c0_75] : memref<6x1x128xf32, #tpu.memory_space<vmem>>, vector<1x1x128xf32>
    %85 = vector.shape_cast %84 : vector<1x1x128xf32> to vector<1x128xf32>
    %86 = vector.broadcast %85 : vector<1x128xf32> to vector<16x128xf32>
    %87 = arith.addf %83, %86 : vector<16x128xf32>
    %88 = arith.truncf %87 : vector<16x128xf32> to vector<16x128xbf16>
    %c3_76 = arith.constant 3 : index
    %c0_77 = arith.constant 0 : index
    %c0_78 = arith.constant 0 : index
    %89 = vector.load %arg6[%c3_76, %c0_77, %c0_78] : memref<6x16x128xbf16, #tpu.memory_space<vmem>>, vector<1x16x128xbf16>
    %90 = vector.shape_cast %89 : vector<1x16x128xbf16> to vector<16x128xbf16>
    %91 = vector.shape_cast %88 : vector<16x128xbf16> to vector<1x16x128xbf16>
    tpu.vector_store %arg6[%c3_76, %c0_77, %c0_78], %91 {strides = array<i32>} : memref<6x16x128xbf16, #tpu.memory_space<vmem>>, vector<1x16x128xbf16>,
    %c4 = arith.constant 4 : index
    %c0_79 = arith.constant 0 : index
    %c0_80 = arith.constant 0 : index
    %92 = vector.load %arg1[%c4, %c0_79, %c0_80] : memref<6x16x1280xbf16, #tpu.memory_space<vmem>>, vector<1x16x1280xbf16>
    %93 = vector.shape_cast %92 : vector<1x16x1280xbf16> to vector<16x1280xbf16>
    %c4_81 = arith.constant 4 : index
    %c0_82 = arith.constant 0 : index
    %c0_83 = arith.constant 0 : index
    %94 = vector.load %arg2[%c4_81, %c0_82, %c0_83] : memref<6x1280x256xbf16, #tpu.memory_space<vmem>>, vector<1x1280x256xbf16>
    %95 = vector.shape_cast %94 : vector<1x1280x256xbf16> to vector<1280x256xbf16>
    %cst_84 = arith.constant dense<0.000000e+00> : vector<16x256xf32>
    %96 = tpu.matmul %93, %95, %cst_84 {dimension_numbers = #tpu.dot_dimension_numbers<[1], [0], [0], [1], [0, 0, 1, 1], [], []>} : vector<16x1280xbf16>, vector<1280x256xbf16>, vector<16x256xf32> -> vector<16x256xf32>
    %c4_85 = arith.constant 4 : index
    %c0_86 = arith.constant 0 : index
    %c0_87 = arith.constant 0 : index
    %97 = vector.load %arg3[%c4_85, %c0_86, %c0_87] : memref<6x1x256xf32, #tpu.memory_space<vmem>>, vector<1x1x256xf32>
    %98 = vector.shape_cast %97 : vector<1x1x256xf32> to vector<1x256xf32>
    %99 = vector.broadcast %98 : vector<1x256xf32> to vector<16x256xf32>
    %100 = arith.addf %96, %99 : vector<16x256xf32>
    %cst_88 = arith.constant 0.000000e+00 : f32
    %101 = vector.broadcast %cst_88 : f32 to vector<16x256xf32>
    %102 = arith.maximumf %100, %101 : vector<16x256xf32>
    %103 = arith.truncf %102 : vector<16x256xf32> to vector<16x256xbf16>
    %c4_89 = arith.constant 4 : index
    %c0_90 = arith.constant 0 : index
    %c0_91 = arith.constant 0 : index
    %104 = vector.load %arg4[%c4_89, %c0_90, %c0_91] : memref<6x256x128xbf16, #tpu.memory_space<vmem>>, vector<1x256x128xbf16>
    %105 = vector.shape_cast %104 : vector<1x256x128xbf16> to vector<256x128xbf16>
    %cst_92 = arith.constant dense<0.000000e+00> : vector<16x128xf32>
    %106 = tpu.matmul %103, %105, %cst_92 {dimension_numbers = #tpu.dot_dimension_numbers<[1], [0], [0], [1], [0, 0, 1, 1], [], []>} : vector<16x256xbf16>, vector<256x128xbf16>, vector<16x128xf32> -> vector<16x128xf32>
    %c4_93 = arith.constant 4 : index
    %c0_94 = arith.constant 0 : index
    %c0_95 = arith.constant 0 : index
    %107 = vector.load %arg5[%c4_93, %c0_94, %c0_95] : memref<6x1x128xf32, #tpu.memory_space<vmem>>, vector<1x1x128xf32>
    %108 = vector.shape_cast %107 : vector<1x1x128xf32> to vector<1x128xf32>
    %109 = vector.broadcast %108 : vector<1x128xf32> to vector<16x128xf32>
    %110 = arith.addf %106, %109 : vector<16x128xf32>
    %111 = arith.truncf %110 : vector<16x128xf32> to vector<16x128xbf16>
    %c4_96 = arith.constant 4 : index
    %c0_97 = arith.constant 0 : index
    %c0_98 = arith.constant 0 : index
    %112 = vector.load %arg6[%c4_96, %c0_97, %c0_98] : memref<6x16x128xbf16, #tpu.memory_space<vmem>>, vector<1x16x128xbf16>
    %113 = vector.shape_cast %112 : vector<1x16x128xbf16> to vector<16x128xbf16>
    %114 = vector.shape_cast %111 : vector<16x128xbf16> to vector<1x16x128xbf16>
    tpu.vector_store %arg6[%c4_96, %c0_97, %c0_98], %114 {strides = array<i32>} : memref<6x16x128xbf16, #tpu.memory_space<vmem>>, vector<1x16x128xbf16>,
    %c5 = arith.constant 5 : index
    %c0_99 = arith.constant 0 : index
    %c0_100 = arith.constant 0 : index
    %115 = vector.load %arg1[%c5, %c0_99, %c0_100] : memref<6x16x1280xbf16, #tpu.memory_space<vmem>>, vector<1x16x1280xbf16>
    %116 = vector.shape_cast %115 : vector<1x16x1280xbf16> to vector<16x1280xbf16>
    %c5_101 = arith.constant 5 : index
    %c0_102 = arith.constant 0 : index
    %c0_103 = arith.constant 0 : index
    %117 = vector.load %arg2[%c5_101, %c0_102, %c0_103] : memref<6x1280x256xbf16, #tpu.memory_space<vmem>>, vector<1x1280x256xbf16>
    %118 = vector.shape_cast %117 : vector<1x1280x256xbf16> to vector<1280x256xbf16>
    %cst_104 = arith.constant dense<0.000000e+00> : vector<16x256xf32>
    %119 = tpu.matmul %116, %118, %cst_104 {dimension_numbers = #tpu.dot_dimension_numbers<[1], [0], [0], [1], [0, 0, 1, 1], [], []>} : vector<16x1280xbf16>, vector<1280x256xbf16>, vector<16x256xf32> -> vector<16x256xf32>
    %c5_105 = arith.constant 5 : index
    %c0_106 = arith.constant 0 : index
    %c0_107 = arith.constant 0 : index
    %120 = vector.load %arg3[%c5_105, %c0_106, %c0_107] : memref<6x1x256xf32, #tpu.memory_space<vmem>>, vector<1x1x256xf32>
    %121 = vector.shape_cast %120 : vector<1x1x256xf32> to vector<1x256xf32>
    %122 = vector.broadcast %121 : vector<1x256xf32> to vector<16x256xf32>
    %123 = arith.addf %119, %122 : vector<16x256xf32>
    %cst_108 = arith.constant 0.000000e+00 : f32
    %124 = vector.broadcast %cst_108 : f32 to vector<16x256xf32>
    %125 = arith.maximumf %123, %124 : vector<16x256xf32>
    %126 = arith.truncf %125 : vector<16x256xf32> to vector<16x256xbf16>
    %c5_109 = arith.constant 5 : index
    %c0_110 = arith.constant 0 : index
    %c0_111 = arith.constant 0 : index
    %127 = vector.load %arg4[%c5_109, %c0_110, %c0_111] : memref<6x256x128xbf16, #tpu.memory_space<vmem>>, vector<1x256x128xbf16>
    %128 = vector.shape_cast %127 : vector<1x256x128xbf16> to vector<256x128xbf16>
    %cst_112 = arith.constant dense<0.000000e+00> : vector<16x128xf32>
    %129 = tpu.matmul %126, %128, %cst_112 {dimension_numbers = #tpu.dot_dimension_numbers<[1], [0], [0], [1], [0, 0, 1, 1], [], []>} : vector<16x256xbf16>, vector<256x128xbf16>, vector<16x128xf32> -> vector<16x128xf32>
    %c5_113 = arith.constant 5 : index
    %c0_114 = arith.constant 0 : index
    %c0_115 = arith.constant 0 : index
    %130 = vector.load %arg5[%c5_113, %c0_114, %c0_115] : memref<6x1x128xf32, #tpu.memory_space<vmem>>, vector<1x1x128xf32>
    %131 = vector.shape_cast %130 : vector<1x1x128xf32> to vector<1x128xf32>
    %132 = vector.broadcast %131 : vector<1x128xf32> to vector<16x128xf32>
    %133 = arith.addf %129, %132 : vector<16x128xf32>
    %134 = arith.truncf %133 : vector<16x128xf32> to vector<16x128xbf16>
    %c5_116 = arith.constant 5 : index
    %c0_117 = arith.constant 0 : index
    %c0_118 = arith.constant 0 : index
    %135 = vector.load %arg6[%c5_116, %c0_117, %c0_118] : memref<6x16x128xbf16, #tpu.memory_space<vmem>>, vector<1x16x128xbf16>
    %136 = vector.shape_cast %135 : vector<1x16x128xbf16> to vector<16x128xbf16>
    %137 = vector.shape_cast %134 : vector<16x128xbf16> to vector<1x16x128xbf16>
    tpu.vector_store %arg6[%c5_116, %c0_117, %c0_118], %137 {strides = array<i32>} : memref<6x16x128xbf16, #tpu.memory_space<vmem>>, vector<1x16x128xbf16>,
    return
  }
  func.func @transform_0(%arg0: i32) -> (i32, i32, i32) {
    %c0_i32 = arith.constant 0 : i32
    %c0_i32_0 = arith.constant 0 : i32
    %c0_i32_1 = arith.constant 0 : i32
    return %c0_i32, %arg0, %c0_i32_0 : i32, i32, i32
  }
  func.func @transform_1(%arg0: i32) -> (i32, i32, i32) {
    %c0_i32 = arith.constant 0 : i32
    %c0_i32_0 = arith.constant 0 : i32
    %c0_i32_1 = arith.constant 0 : i32
    %c0_i32_2 = arith.constant 0 : i32
    return %c0_i32, %c0_i32_0, %c0_i32_1 : i32, i32, i32
  }
  func.func @transform_2(%arg0: i32) -> (i32, i32, i32) {
    %c0_i32 = arith.constant 0 : i32
    %c0_i32_0 = arith.constant 0 : i32
    %c0_i32_1 = arith.constant 0 : i32
    %c0_i32_2 = arith.constant 0 : i32
    return %c0_i32, %c0_i32_0, %c0_i32_1 : i32, i32, i32
  }
  func.func @transform_3(%arg0: i32) -> (i32, i32, i32) {
    %c0_i32 = arith.constant 0 : i32
    %c0_i32_0 = arith.constant 0 : i32
    %c0_i32_1 = arith.constant 0 : i32
    %c0_i32_2 = arith.constant 0 : i32
    return %c0_i32, %c0_i32_0, %c0_i32_1 : i32, i32, i32
  }
  func.func @transform_4(%arg0: i32) -> (i32, i32, i32) {
    %c0_i32 = arith.constant 0 : i32
    %c0_i32_0 = arith.constant 0 : i32
    %c0_i32_1 = arith.constant 0 : i32
    %c0_i32_2 = arith.constant 0 : i32
    return %c0_i32, %c0_i32_0, %c0_i32_1 : i32, i32, i32
  }
  func.func @transform_5(%arg0: i32) -> (i32, i32, i32) {
    %c0_i32 = arith.constant 0 : i32
    %c0_i32_0 = arith.constant 0 : i32
    %c0_i32_1 = arith.constant 0 : i32
    return %c0_i32, %arg0, %c0_i32_0 : i32, i32, i32
  }
}

</mosaic_0001>

<bundles_post_ra>
// kernel: pcb_forward.1
= control target key start
LH: loop header
LB: loop body
LE: loop exit
PB: predicated region body
PF: predicated region fallthrough
CT: control target
= control target key end

     0   :  { %10 = vsyncpa [#allocation3], 0  ;;  %s12112_s0 = inlined_call_operand.vmem [shape: bf16[6,16,1280], index: 0, kind: input, shape index: {}]   ;;  %s12113_s1 = inlined_call_operand.hbm [shape: bf16[6,1280,256], index: 1, kind: input, shape index: {}]   ;;  %s12114_s2 = inlined_call_operand.hbm [shape: f32[6,1,256], index: 2, kind: input, shape index: {}]   ;;  %s12115_s3 = inlined_call_operand.hbm [shape: bf16[6,256,128], index: 3, kind: input, shape index: {}]   ;;  %s12116_s4 = inlined_call_operand.hbm [shape: f32[6,1,128], index: 4, kind: input, shape index: {}]   ;;  %s12117_s5 = inlined_call_operand.vmem [shape: bf16[6,16,128], index: 5, kind: output, shape index: {}]  }
   0x1   :  { %11 = vsyncpa [#allocation5], 0 }
   0x2   :  { %12 = vsyncpa [#allocation8], 0  ;;  %s11844_s18 = smov [#allocation4]  }
   0x3   :  { %s32_s19 = sshll.u32 %s11844_s18, 4  ;;  %s33_s19 = int_to_ptr.vmem [resolvable:$true] %s32_s19 }
   0x4   :  { %s11766_s20 = scalar_lea.vmem %s33_s19, 192  ;;  %p11771_p1 = scmp.lt.s32.totalorder %s33_s19, %s33_s19 }
   0x5   :  { %p11767_p0 = scmp.ne.s32.totalorder %s33_s19, %s11766_s20  ;;  %p11772_p2 = scmp.lt.s32.totalorder %s11766_s20, %s11766_s20 }
   0x7   :  { %p11773_p3 = por %p11772_p2, %p11771_p1 }
   0x9   :  { %p11774_p4 = pnand %p11773_p3, %p11767_p0 }
   0xb   :  { %11777 = shalt.err (!%p11774_p4)
}
   0xc   :  { %s11845_s21 = smov 32   ;;  %s11846_s22 = smov 2  }
   0xd   :  { %38 = dma.hbm_to_vmem [thread:$0]  %s12114_s2, 192, %s33_s19, [#allocation5], %s11845_s21, %s11845_s21, %s11846_s22  }
   0xe   :  { %s11847_s25 = smov [#allocation2]  }
   0xf   :  { %s20_s26 = sshll.u32 %s11847_s25, 4  ;;  %s21_s26 = int_to_ptr.vmem [resolvable:$true] %s20_s26 }
  0x10   :  { %s11786_s27 = scalar_lea.vmem %s21_s26, 122880  ;;  %p11791_p6 = scmp.lt.s32.totalorder %s21_s26, %s21_s26 }
  0x11   :  { %p11787_p5 = scmp.ne.s32.totalorder %s21_s26, %s11786_s27  ;;  %p11792_p7 = scmp.lt.s32.totalorder %s11786_s27, %s11786_s27 }
  0x13   :  { %p11793_p8 = por %p11792_p7, %p11791_p6 }
  0x15   :  { %p11794_p9 = pnand %p11793_p8, %p11787_p5 }
  0x17   :  { %11797 = shalt.err (!%p11794_p9)
}
  0x18   :  { %s11848_s28 = smov 128   ;;  %s11849_s29 = smov 8  }
  0x19   :  { %26 = dma.hbm_to_vmem [thread:$0]  %s12113_s1, 122880, %s21_s26, [#allocation3], %s11848_s28, %s11848_s28, %s11849_s29  }
  0x1a   :  { %s11850_s7 = smov [#allocation6]  }
  0x1b   :  { %s44_s8 = sshll.u32 %s11850_s7, 4  ;;  %s45_s8 = int_to_ptr.vmem [resolvable:$true] %s44_s8 }
  0x1c   :  { %s11806_s2 = scalar_lea.vmem %s45_s8, 12288  ;;  %p11811_p11 = scmp.lt.s32.totalorder %s45_s8, %s45_s8 }
  0x1d   :  { %p11807_p10 = scmp.ne.s32.totalorder %s45_s8, %s11806_s2  ;;  %p11812_p12 = scmp.lt.s32.totalorder %s11806_s2, %s11806_s2 }
  0x1f   :  { %p11813_p13 = por %p11812_p12, %p11811_p11 }
  0x21   :  { %p11814_p0 = pnand %p11813_p13, %p11807_p10 }
  0x23   :  { %11817 = shalt.err (!%p11814_p0)
}
  0x24   :  { %s11851_s9 = smov 64   ;;  %s11852_s10 = smov 4  }
  0x25   :  { %50 = dma.hbm_to_vmem [thread:$0]  %s12115_s3, 12288, %s45_s8, [#allocation5], %s11851_s9, %s11851_s9, %s11852_s10  }
  0x26   :  { %s11853_s13 = smov [#allocation7]  }
  0x27   :  { %s56_s14 = sshll.u32 %s11853_s13, 4  ;;  %s57_s14 = int_to_ptr.vmem [resolvable:$true] %s56_s14 }
  0x28   :  { %s11826_s1 = scalar_lea.vmem %s57_s14, 96  ;;  %p11831_p2 = scmp.lt.s32.totalorder %s57_s14, %s57_s14 }
  0x29   :  { %p11827_p1 = scmp.ne.s32.totalorder %s57_s14, %s11826_s1  ;;  %p11832_p3 = scmp.lt.s32.totalorder %s11826_s1, %s11826_s1 }
  0x2b   :  { %p11833_p4 = por %p11832_p3, %p11831_p2 }
  0x2d   :  { %p11834_p5 = pnand %p11833_p4, %p11827_p1 }
  0x2f   :  { %11837 = shalt.err (!%p11834_p5)
}
  0x30   :  { %s11854_s15 = smov 16   ;;  %s11855_s16 = smov 1  }
  0x31   :  { %62 = dma.hbm_to_vmem [thread:$0]  %s12116_s4, 96, %s57_s14, [#allocation8], %s11854_s15, %s11854_s15, %s11855_s16  }
  0x32   :  { %11838 = dma.done.wait [#allocation3], 122880  }
  0x33   :  { %11839 = vsyncadd [#allocation3], 4294844416 }
  0x34   :  { %11840 = dma.done.wait [#allocation5], 12480  }
  0x35   :  { %11841 = vsyncadd [#allocation5], 4294954816 }
  0x36   :  { %11842 = dma.done.wait [#allocation8], 96  }
  0x37   :  { %11843 = vsyncadd [#allocation8], 4294967200  ;;  %v10132_v0 = vld [vmem:[#allocation2 + $0x74] ss:$8 sps:$4 sm:$0xff]   ;;  %v10134_v1 = vld [vmem:[#allocation2 + $0x70] ss:$8 sps:$4 sm:$0xff]  }
  0x38   :  { %1108 = vmatprep.subr.bf16.mxu0 %v10132_v0  ;;  %v10135_v2 = vld [vmem:[#allocation2 + $0x174] ss:$8 sps:$4 sm:$0xff]   ;;  %v10137_v3 = vld [vmem:[#allocation2 + $0x170] ss:$8 sps:$4 sm:$0xff]   ;;  %v10138_v4 = vld [vmem:[#allocation2 + $0x64] ss:$8 sps:$4 sm:$0xff]  }
  0x39   :  { %1109 = vmatpush1.bf16.msra.mxu0 %v10134_v1  ;;  %v10140_v5 = vld [vmem:[#allocation2 + $0x60] ss:$8 sps:$4 sm:$0xff]   ;;  %1151 = vmatprep.subr.bf16.mxu1 %v10135_v2  ;;  %v10141_v6 = vld [vmem:[#allocation2 + $0x164] ss:$8 sps:$4 sm:$0xff]   ;;  %v10144_v8 = vld [vmem:[#allocation2 + $0x54] ss:$8 sps:$4 sm:$0xff]  }
  0x3a   :  { %1152 = vmatpush1.bf16.msra.mxu1 %v10137_v3  ;;  %1110 = vmatprep.subr.bf16.mxu0 %v10138_v4  ;;  %v10143_v7 = vld [vmem:[#allocation2 + $0x160] ss:$8 sps:$4 sm:$0xff]   ;;  %v10146_v9 = vld [vmem:[#allocation2 + $0x50] ss:$8 sps:$4 sm:$0xff]   ;;  %v10147_v10 = vld [vmem:[#allocation2 + $0x154] ss:$8 sps:$4 sm:$0xff]  }
  0x3b   :  { %1153 = vmatprep.subr.bf16.mxu1 %v10141_v6  ;;  %v10150_v11 = vld [vmem:[#allocation2 + $0x44] ss:$8 sps:$4 sm:$0xff]   ;;  %v10149_v12 = vld [vmem:[#allocation2 + $0x150] ss:$8 sps:$4 sm:$0xff]   ;;  %v10152_v14 = vld [vmem:[#allocation2 + $0x40] ss:$8 sps:$4 sm:$0xff]  }
  0x3c   :  { %v10153_v13 = vld [vmem:[#allocation2 + $0x144] ss:$8 sps:$4 sm:$0xff]   ;;  %v10156_v15 = vld [vmem:[#allocation2 + $0x34] ss:$8 sps:$4 sm:$0xff]   ;;  %v10155_v16 = vld [vmem:[#allocation2 + $0x140] ss:$8 sps:$4 sm:$0xff]  }
  0x3d   :  { %1111 = vmatpush1.bf16.msra.mxu0 %v10140_v5  ;;  %v10159_v17 = vld [vmem:[#allocation2 + $0x134] ss:$8 sps:$4 sm:$0xff]   ;;  %v10158_v18 = vld [vmem:[#allocation2 + $0x30] ss:$8 sps:$4 sm:$0xff]   ;;  %v10162_v19 = vld [vmem:[#allocation2 + $0x24] ss:$8 sps:$4 sm:$0xff]  }
  0x3e   :  { %1112 = vmatprep.subr.bf16.mxu0 %v10144_v8  ;;  %1154 = vmatpush1.bf16.msra.mxu1 %v10143_v7  ;;  %v10161_v20 = vld [vmem:[#allocation2 + $0x130] ss:$8 sps:$4 sm:$0xff]   ;;  %v10165_v21 = vld [vmem:[#allocation2 + $0x124] ss:$8 sps:$4 sm:$0xff]   ;;  %v10164_v22 = vld [vmem:[#allocation2 + $0x20] ss:$8 sps:$4 sm:$0xff]  }
  0x3f   :  { %1155 = vmatprep.subr.bf16.mxu1 %v10147_v10  ;;  %v10168_v23 = vld [vmem:[#allocation2 + $0x14] ss:$8 sps:$4 sm:$0xff]   ;;  %v10167_v24 = vld [vmem:[#allocation2 + $0x120] ss:$8 sps:$4 sm:$0xff]   ;;  %v10170_v26 = vld [vmem:[#allocation2 + $0x10] ss:$8 sps:$4 sm:$0xff]  }
  0x40   :  { %v10171_v25 = vld [vmem:[#allocation2 + $0x114] ss:$8 sps:$4 sm:$0xff]   ;;  %v10174_v27 = vld [vmem:[#allocation2 + $0x4] ss:$8 sps:$4 sm:$0xff]   ;;  %v10173_v28 = vld [vmem:[#allocation2 + $0x110] ss:$8 sps:$4 sm:$0xff]  }
  0x41   :  { %1113 = vmatpush1.bf16.msra.mxu0 %v10146_v9  ;;  %v10177_v29 = vld [vmem:[#allocation2 + $0x104] ss:$8 sps:$4 sm:$0xff]   ;;  %v10176_v30 = vld [vmem:[#allocation2] ss:$8 sps:$4 sm:$0xff]   ;;  %v10180_v31 = vld [vmem:[#allocation2 + $0xf4] ss:$8 sps:$4 sm:$0xff]  }
  0x42   :  { %1114 = vmatprep.subr.bf16.mxu0 %v10150_v11  ;;  %1156 = vmatpush1.bf16.msra.mxu1 %v10149_v12  ;;  %v10179_v32 = vld [vmem:[#allocation2 + $0x100] ss:$8 sps:$4 sm:$0xff]   ;;  %v10183_v33 = vld [vmem:[#allocation2 + $0x1f4] ss:$8 sps:$4 sm:$0xff]   ;;  %v10182_v34 = vld [vmem:[#allocation2 + $0xf0] ss:$8 sps:$4 sm:$0xff]  }
  0x43   :  { %1157 = vmatprep.subr.bf16.mxu1 %v10153_v13  ;;  %v10186_v35 = vld [vmem:[#allocation2 + $0xe4] ss:$8 sps:$4 sm:$0xff]   ;;  %v10185_v36 = vld [vmem:[#allocation2 + $0x1f0] ss:$8 sps:$4 sm:$0xff]   ;;  %v10188_v38 = vld [vmem:[#allocation2 + $0xe0] ss:$8 sps:$4 sm:$0xff]  }
  0x44   :  { %v10189_v37 = vld [vmem:[#allocation2 + $0x1e4] ss:$8 sps:$4 sm:$0xff]   ;;  %v10192_v39 = vld [vmem:[#allocation2 + $0xd4] ss:$8 sps:$4 sm:$0xff]   ;;  %v10191_v40 = vld [vmem:[#allocation2 + $0x1e0] ss:$8 sps:$4 sm:$0xff]  }
  0x45   :  { %1115 = vmatpush1.bf16.msra.mxu0 %v10152_v14  ;;  %v10195_v41 = vld [vmem:[#allocation2 + $0x1d4] ss:$8 sps:$4 sm:$0xff]   ;;  %v10194_v42 = vld [vmem:[#allocation2 + $0xd0] ss:$8 sps:$4 sm:$0xff]   ;;  %v10198_v43 = vld [vmem:[#allocation2 + $0xc4] ss:$8 sps:$4 sm:$0xff]  }
  0x46   :  { %1116 = vmatprep.subr.bf16.mxu0 %v10156_v15  ;;  %1158 = vmatpush1.bf16.msra.mxu1 %v10155_v16  ;;  %v10197_v44 = vld [vmem:[#allocation2 + $0x1d0] ss:$8 sps:$4 sm:$0xff]   ;;  %v10201_v45 = vld [vmem:[#allocation2 + $0x1c4] ss:$8 sps:$4 sm:$0xff]   ;;  %v10200_v46 = vld [vmem:[#allocation2 + $0xc0] ss:$8 sps:$4 sm:$0xff]  }
  0x47   :  { %1159 = vmatprep.subr.bf16.mxu1 %v10159_v17  ;;  %v10229_v47 = vld [vmem:[%s12112_s0 + $0x4] ss:$40 sps:$4 sm:$0xff]   ;;  %v10204_v48 = vld [vmem:[#allocation2 + $0xb4] ss:$8 sps:$4 sm:$0xff]   ;;  %v10203_v49 = vld [vmem:[#allocation2 + $0x1c0] ss:$8 sps:$4 sm:$0xff]  }
  0x48   :  { %1140 = vmatprep.mubr.bf16.mxu0 %v10229_v47  ;;  %v10207_v50 = vld [vmem:[#allocation2 + $0x1b4] ss:$8 sps:$4 sm:$0xff]   ;;  %v10206_v52 = vld [vmem:[#allocation2 + $0xb0] ss:$8 sps:$4 sm:$0xff]   ;;  %v10210_v53 = vld [vmem:[#allocation2 + $0xa4] ss:$8 sps:$4 sm:$0xff]  }
  0x49   :  { %1117 = vmatpush1.bf16.msra.mxu0 %v10158_v18  ;;  %v10236_v51 = vld [vmem:[%s12112_s0 + $0xc] ss:$40 sps:$4 sm:$0xff]   ;;  %v10209_v54 = vld [vmem:[#allocation2 + $0x1b0] ss:$8 sps:$4 sm:$0xff]   ;;  %v10212_v56 = vld [vmem:[#allocation2 + $0xa0] ss:$8 sps:$4 sm:$0xff]  }
  0x4a   :  { %1118 = vmatprep.subr.bf16.mxu0 %v10162_v19  ;;  %1160 = vmatpush1.bf16.msra.mxu1 %v10161_v20  ;;  %v10213_v55 = vld [vmem:[#allocation2 + $0x1a4] ss:$8 sps:$4 sm:$0xff]   ;;  %v10216_v57 = vld [vmem:[#allocation2 + $0x94] ss:$8 sps:$4 sm:$0xff]   ;;  %v10215_v58 = vld [vmem:[#allocation2 + $0x1a0] ss:$8 sps:$4 sm:$0xff]  }
  0x4b   :  { %1161 = vmatprep.subr.bf16.mxu1 %v10165_v21  ;;  %1183 = vmatprep.mubr.bf16.mxu1 %v10236_v51  ;;  %v10219_v59 = vld [vmem:[#allocation2 + $0x194] ss:$8 sps:$4 sm:$0xff]   ;;  %v10218_v60 = vld [vmem:[#allocation2 + $0x90] ss:$8 sps:$4 sm:$0xff]   ;;  %v10222_v61 = vld [vmem:[#allocation2 + $0x84] ss:$8 sps:$4 sm:$0xff]  }
  0x4c   :  { %v10221_v62 = vld [vmem:[#allocation2 + $0x190] ss:$8 sps:$4 sm:$0xff]   ;;  %v10225_v63 = vld [vmem:[#allocation2 + $0x184] ss:$8 sps:$4 sm:$0xff]   ;;  %v10224_v0 = vld [vmem:[#allocation2 + $0x80] ss:$8 sps:$4 sm:$0xff]  }
  0x4d   :  { %1119 = vmatpush1.bf16.msra.mxu0 %v10164_v22  ;;  %v10233_v1 = vld [vmem:[#allocation2 + $0x274] ss:$8 sps:$4 sm:$0xff]   ;;  %v10230_v2 = vld [vmem:[#allocation2 + $0x180] ss:$8 sps:$4 sm:$0xff]   ;;  %v10231_v5 = vld [vmem:[#allocation2 + $0x270] ss:$8 sps:$4 sm:$0xff]  }
  0x4e   :  { %1120 = vmatprep.subr.bf16.mxu0 %v10168_v23  ;;  %1162 = vmatpush1.bf16.msra.mxu1 %v10167_v24  ;;  %v10227_v3 = vld [vmem:[%s12112_s0] ss:$40 sps:$4 sm:$0xff]   ;;  %v10239_v4 = vld [vmem:[#allocation2 + $0x374] ss:$8 sps:$4 sm:$0xff]   ;;  %v10242_v7 = vld [vmem:[#allocation2 + $0x264] ss:$8 sps:$4 sm:$0xff]  }
  0x4f   :  { %1163 = vmatprep.subr.bf16.mxu1 %v10171_v25  ;;  %v10234_v6 = vld [vmem:[%s12112_s0 + $0x8] ss:$40 sps:$4 sm:$0xff]   ;;  %v10245_v9 = vld [vmem:[#allocation2 + $0x364] ss:$8 sps:$4 sm:$0xff]   ;;  %v10248_v11 = vld [vmem:[#allocation2 + $0x254] ss:$8 sps:$4 sm:$0xff]  }
  0x50   :  { %v10237_v8 = vld [vmem:[#allocation2 + $0x370] ss:$8 sps:$4 sm:$0xff]   ;;  %v10240_v10 = vld [vmem:[#allocation2 + $0x260] ss:$8 sps:$4 sm:$0xff]   ;;  %v10251_v13 = vld [vmem:[#allocation2 + $0x354] ss:$8 sps:$4 sm:$0xff]  }
  0x51   :  { %1121 = vmatpush1.bf16.msra.mxu0 %v10170_v26  ;;  %v10243_v12 = vld [vmem:[#allocation2 + $0x360] ss:$8 sps:$4 sm:$0xff]   ;;  %v10246_v14 = vld [vmem:[#allocation2 + $0x250] ss:$8 sps:$4 sm:$0xff]   ;;  %v10254_v15 = vld [vmem:[#allocation2 + $0x244] ss:$8 sps:$4 sm:$0xff]  }
  0x52   :  { %1122 = vmatprep.subr.bf16.mxu0 %v10174_v27  ;;  %1164 = vmatpush1.bf16.msra.mxu1 %v10173_v28  ;;  %v10249_v16 = vld [vmem:[#allocation2 + $0x350] ss:$8 sps:$4 sm:$0xff]   ;;  %v10257_v17 = vld [vmem:[#allocation2 + $0x344] ss:$8 sps:$4 sm:$0xff]   ;;  %v10252_v18 = vld [vmem:[#allocation2 + $0x240] ss:$8 sps:$4 sm:$0xff]  }
  0x53   :  { %1165 = vmatprep.subr.bf16.mxu1 %v10177_v29  ;;  %v10260_v19 = vld [vmem:[#allocation2 + $0x234] ss:$8 sps:$4 sm:$0xff]   ;;  %v10255_v20 = vld [vmem:[#allocation2 + $0x340] ss:$8 sps:$4 sm:$0xff]   ;;  %v10258_v22 = vld [vmem:[#allocation2 + $0x230] ss:$8 sps:$4 sm:$0xff]  }
  0x54   :  { %v10263_v21 = vld [vmem:[#allocation2 + $0x334] ss:$8 sps:$4 sm:$0xff]   ;;  %v10266_v23 = vld [vmem:[#allocation2 + $0x224] ss:$8 sps:$4 sm:$0xff]   ;;  %v10261_v24 = vld [vmem:[#allocation2 + $0x330] ss:$8 sps:$4 sm:$0xff]  }
  0x55   :  { %1123 = vmatpush1.bf16.msra.mxu0 %v10176_v30  ;;  %v10269_v25 = vld [vmem:[#allocation2 + $0x324] ss:$8 sps:$4 sm:$0xff]   ;;  %v10264_v26 = vld [vmem:[#allocation2 + $0x220] ss:$8 sps:$4 sm:$0xff]   ;;  %v10272_v27 = vld [vmem:[#allocation2 + $0x214] ss:$8 sps:$4 sm:$0xff]  }
  0x56   :  { %1124 = vmatprep.subr.bf16.mxu0 %v10180_v31  ;;  %1166 = vmatpush1.bf16.msra.mxu1 %v10179_v32  ;;  %v10267_v28 = vld [vmem:[#allocation2 + $0x320] ss:$8 sps:$4 sm:$0xff]   ;;  %v10275_v29 = vld [vmem:[#allocation2 + $0x314] ss:$8 sps:$4 sm:$0xff]   ;;  %v10270_v30 = vld [vmem:[#allocation2 + $0x210] ss:$8 sps:$4 sm:$0xff]  }
  0x57   :  { %1167 = vmatprep.subr.bf16.mxu1 %v10183_v33  ;;  %v10273_v31 = vld [vmem:[#allocation2 + $0x310] ss:$8 sps:$4 sm:$0xff]   ;;  %v10278_v32 = vld [vmem:[#allocation2 + $0x204] ss:$8 sps:$4 sm:$0xff]   ;;  %v10332_v33 = vld [vmem:[%s12112_s0 + $0x14] ss:$40 sps:$4 sm:$0xff]  }
  0x58   :  { %v10299_v47 = vld [vmem:[#allocation2 + $0x3d4] ss:$8 sps:$4 sm:$0xff]   ;;  %v10305_v51 = vld [vmem:[#allocation2 + $0x3c4] ss:$8 sps:$4 sm:$0xff]  }
  0x59   :  { %1125 = vmatpush2.bf16.msra.mxu0 %v10182_v34  ;;  %v10281_v34 = vld [vmem:[#allocation2 + $0x304] ss:$8 sps:$4 sm:$0xff]  }
  0x5a   :  { %1126 = vmatprep.subr.bf16.mxu0 %v10186_v35  ;;  %1168 = vmatpush2.bf16.msra.mxu1 %v10185_v36  ;;  %v10276_v35 = vld [vmem:[#allocation2 + $0x200] ss:$8 sps:$4 sm:$0xff]   ;;  %v10338_v36 = vld [vmem:[%s12112_s0 + $0x1c] ss:$40 sps:$4 sm:$0xff]  }
  0x5b   :  { %1169 = vmatprep.subr.bf16.mxu1 %v10189_v37  ;;  %v10284_v37 = vld [vmem:[#allocation2 + $0x2f4] ss:$8 sps:$4 sm:$0xff]  }
  0x5d   :  { %1127 = vmatpush2.bf16.msra.mxu0 %v10188_v38  ;;  %v10279_v38 = vld [vmem:[#allocation2 + $0x300] ss:$8 sps:$4 sm:$0xff]  }
  0x5e   :  { %1128 = vmatprep.subr.bf16.mxu0 %v10192_v39  ;;  %1170 = vmatpush2.bf16.msra.mxu1 %v10191_v40  ;;  %v10287_v39 = vld [vmem:[#allocation2 + $0x3f4] ss:$8 sps:$4 sm:$0xff]   ;;  %v10282_v40 = vld [vmem:[#allocation2 + $0x2f0] ss:$8 sps:$4 sm:$0xff]  }
  0x5f   :  { %1171 = vmatprep.subr.bf16.mxu1 %v10195_v41  ;;  %v10290_v41 = vld [vmem:[#allocation2 + $0x2e4] ss:$8 sps:$4 sm:$0xff]  }
  0x61   :  { %1129 = vmatpush2.bf16.msra.mxu0 %v10194_v42  ;;  %v10285_v42 = vld [vmem:[#allocation2 + $0x3f0] ss:$8 sps:$4 sm:$0xff]  }
  0x62   :  { %1130 = vmatprep.subr.bf16.mxu0 %v10198_v43  ;;  %1172 = vmatpush2.bf16.msra.mxu1 %v10197_v44  ;;  %v10293_v43 = vld [vmem:[#allocation2 + $0x3e4] ss:$8 sps:$4 sm:$0xff]   ;;  %v10288_v44 = vld [vmem:[#allocation2 + $0x2e0] ss:$8 sps:$4 sm:$0xff]  }
  0x63   :  { %1173 = vmatprep.subr.bf16.mxu1 %v10201_v45  ;;  %v10296_v45 = vld [vmem:[#allocation2 + $0x2d4] ss:$8 sps:$4 sm:$0xff]  }
  0x65   :  { %1131 = vmatpush2.bf16.msra.mxu0 %v10200_v46  ;;  %v10291_v46 = vld [vmem:[#allocation2 + $0x3e0] ss:$8 sps:$4 sm:$0xff]  }
  0x66   :  { %1132 = vmatprep.subr.bf16.mxu0 %v10204_v48  ;;  %1174 = vmatpush2.bf16.msra.mxu1 %v10203_v49  ;;  %v10294_v48 = vld [vmem:[#allocation2 + $0x2d0] ss:$8 sps:$4 sm:$0xff]   ;;  %v10302_v49 = vld [vmem:[#allocation2 + $0x2c4] ss:$8 sps:$4 sm:$0xff]  }
  0x67   :  { %1175 = vmatprep.subr.bf16.mxu1 %v10207_v50  ;;  %v10297_v50 = vld [vmem:[#allocation2 + $0x3d0] ss:$8 sps:$4 sm:$0xff]  }
  0x69   :  { %1133 = vmatpush2.bf16.msra.mxu0 %v10206_v52  ;;  %v10300_v52 = vld [vmem:[#allocation2 + $0x2c0] ss:$8 sps:$4 sm:$0xff]  }
  0x6a   :  { %1134 = vmatprep.subr.bf16.mxu0 %v10210_v53  ;;  %1176 = vmatpush2.bf16.msra.mxu1 %v10209_v54  ;;  %v10308_v53 = vld [vmem:[#allocation2 + $0x2b4] ss:$8 sps:$4 sm:$0xff]   ;;  %v10303_v54 = vld [vmem:[#allocation2 + $0x3c0] ss:$8 sps:$4 sm:$0xff]  }
  0x6b   :  { %1177 = vmatprep.subr.bf16.mxu1 %v10213_v55  ;;  %v10311_v55 = vld [vmem:[#allocation2 + $0x3b4] ss:$8 sps:$4 sm:$0xff]  }
  0x6d   :  { %1135 = vmatpush2.bf16.msra.mxu0 %v10212_v56  ;;  %v10306_v56 = vld [vmem:[#allocation2 + $0x2b0] ss:$8 sps:$4 sm:$0xff]  }
  0x6e   :  { %1136 = vmatprep.subr.bf16.mxu0 %v10216_v57  ;;  %1178 = vmatpush2.bf16.msra.mxu1 %v10215_v58  ;;  %v10309_v57 = vld [vmem:[#allocation2 + $0x3b0] ss:$8 sps:$4 sm:$0xff]   ;;  %v10314_v58 = vld [vmem:[#allocation2 + $0x2a4] ss:$8 sps:$4 sm:$0xff]  }
  0x6f   :  { %1179 = vmatprep.subr.bf16.mxu1 %v10219_v59  ;;  %v10312_v59 = vld [vmem:[#allocation2 + $0x2a0] ss:$8 sps:$4 sm:$0xff]  }
  0x71   :  { %1137 = vmatpush2.bf16.msra.mxu0 %v10218_v60  ;;  %v10317_v60 = vld [vmem:[#allocation2 + $0x3a4] ss:$8 sps:$4 sm:$0xff]  }
  0x72   :  { %1138 = vmatprep.subr.bf16.mxu0 %v10222_v61  ;;  %1180 = vmatpush2.bf16.msra.mxu1 %v10221_v62  ;;  %v10320_v61 = vld [vmem:[#allocation2 + $0x294] ss:$8 sps:$4 sm:$0xff]   ;;  %v10315_v62 = vld [vmem:[#allocation2 + $0x3a0] ss:$8 sps:$4 sm:$0xff]  }
  0x73   :  { %1181 = vmatprep.subr.bf16.mxu1 %v10225_v63  ;;  %v10323_v63 = vld [vmem:[#allocation2 + $0x394] ss:$8 sps:$4 sm:$0xff]  }
  0x75   :  { %1139 = vmatpush2.bf16.msra.mxu0 %v10224_v0  ;;  %v10318_v0 = vld [vmem:[#allocation2 + $0x290] ss:$8 sps:$4 sm:$0xff]  }
  0x76   :  { %1194 = vmatprep.subr.bf16.mxu0 %v10233_v1  ;;  %1182 = vmatpush2.bf16.msra.mxu1 %v10230_v2  ;;  %v10326_v1 = vld [vmem:[#allocation2 + $0x284] ss:$8 sps:$4 sm:$0xff]   ;;  %v10321_v2 = vld [vmem:[#allocation2 + $0x390] ss:$8 sps:$4 sm:$0xff]  }
  0x77   :  { %1237 = vmatprep.subr.bf16.mxu1 %v10239_v4  ;;  %v10324_v4 = vld [vmem:[#allocation2 + $0x280] ss:$8 sps:$4 sm:$0xff]  }
  0x78   :  { %1141 = vmatmul.mubr.bf16.vlgmr.msra.gmra.mxu0 %v10227_v3  ;;  %v10329_v3 = vld [vmem:[#allocation2 + $0x384] ss:$8 sps:$4 sm:$0xff]  }
  0x79   :  { %1195 = vmatpush1.bf16.msra.mxu0 %v10231_v5  ;;  %1184 = vmatmul.mubr.bf16.vlgmr.msra.gmra.mxu1 %v10234_v6  ;;  %v10335_v5 = vld [vmem:[#allocation2 + $0x474] ss:$8 sps:$4 sm:$0xff]   ;;  %v10327_v6 = vld [vmem:[#allocation2 + $0x380] ss:$8 sps:$4 sm:$0xff]  }
  0x7a   :  { %1196 = vmatprep.subr.bf16.mxu0 %v10242_v7  ;;  %1238 = vmatpush1.bf16.msra.mxu1 %v10237_v8  ;;  %v10330_v7 = vld [vmem:[%s12112_s0 + $0x10] ss:$40 sps:$4 sm:$0xff]  }
  0x7b   :  { %1239 = vmatprep.subr.bf16.mxu1 %v10245_v9  ;;  %1226 = vmatprep.mubr.bf16.mxu0 %v10332_v33  ;;  %v10333_v8 = vld [vmem:[#allocation2 + $0x470] ss:$8 sps:$4 sm:$0xff]   ;;  %v10386_v9 = vld [vmem:[%s12112_s0 + $0x24] ss:$40 sps:$4 sm:$0xff]   ;;  %v10374_v33 = vld [vmem:[#allocation2 + $0x4b4] ss:$8 sps:$4 sm:$0xff]  }
  0x7c   :  { %1269 = vmatprep.mubr.bf16.mxu1 %v10338_v36  ;;  %v10375_v36 = vld [vmem:[#allocation2 + $0x4a0] ss:$8 sps:$4 sm:$0xff]  }
  0x7d   :  { %1197 = vmatpush1.bf16.msra.mxu0 %v10240_v10  ;;  %v10336_v10 = vld [vmem:[%s12112_s0 + $0x18] ss:$40 sps:$4 sm:$0xff]  }
  0x7e   :  { %1198 = vmatprep.subr.bf16.mxu0 %v10248_v11  ;;  %1240 = vmatpush1.bf16.msra.mxu1 %v10243_v12  ;;  %v10341_v11 = vld [vmem:[#allocation2 + $0x464] ss:$8 sps:$4 sm:$0xff]   ;;  %v10339_v12 = vld [vmem:[#allocation2 + $0x460] ss:$8 sps:$4 sm:$0xff]  }
  0x7f   :  { %1241 = vmatprep.subr.bf16.mxu1 %v10251_v13  ;;  %v10344_v13 = vld [vmem:[#allocation2 + $0x454] ss:$8 sps:$4 sm:$0xff]  }
  0x81   :  { %1199 = vmatpush1.bf16.msra.mxu0 %v10246_v14  ;;  %v10342_v14 = vld [vmem:[#allocation2 + $0x450] ss:$8 sps:$4 sm:$0xff]  }
  0x82   :  { %1200 = vmatprep.subr.bf16.mxu0 %v10254_v15  ;;  %1242 = vmatpush1.bf16.msra.mxu1 %v10249_v16  ;;  %v10347_v15 = vld [vmem:[#allocation2 + $0x444] ss:$8 sps:$4 sm:$0xff]   ;;  %v10345_v16 = vld [vmem:[#allocation2 + $0x440] ss:$8 sps:$4 sm:$0xff]  }
  0x83   :  { %1243 = vmatprep.subr.bf16.mxu1 %v10257_v17  ;;  %v10350_v17 = vld [vmem:[#allocation2 + $0x434] ss:$8 sps:$4 sm:$0xff]  }
  0x85   :  { %1201 = vmatpush1.bf16.msra.mxu0 %v10252_v18  ;;  %v10348_v18 = vld [vmem:[#allocation2 + $0x430] ss:$8 sps:$4 sm:$0xff]  }
  0x86   :  { %1202 = vmatprep.subr.bf16.mxu0 %v10260_v19  ;;  %1244 = vmatpush1.bf16.msra.mxu1 %v10255_v20  ;;  %v10353_v19 = vld [vmem:[#allocation2 + $0x424] ss:$8 sps:$4 sm:$0xff]   ;;  %v10351_v20 = vld [vmem:[#allocation2 + $0x420] ss:$8 sps:$4 sm:$0xff]  }
  0x87   :  { %1245 = vmatprep.subr.bf16.mxu1 %v10263_v21  ;;  %v10356_v21 = vld [vmem:[#allocation2 + $0x414] ss:$8 sps:$4 sm:$0xff]  }
  0x89   :  { %1203 = vmatpush1.bf16.msra.mxu0 %v10258_v22  ;;  %v10354_v22 = vld [vmem:[#allocation2 + $0x410] ss:$8 sps:$4 sm:$0xff]  }
  0x8a   :  { %1204 = vmatprep.subr.bf16.mxu0 %v10266_v23  ;;  %1246 = vmatpush1.bf16.msra.mxu1 %v10261_v24  ;;  %v10359_v23 = vld [vmem:[#allocation2 + $0x404] ss:$8 sps:$4 sm:$0xff]   ;;  %v10357_v24 = vld [vmem:[#allocation2 + $0x400] ss:$8 sps:$4 sm:$0xff]  }
  0x8b   :  { %1247 = vmatprep.subr.bf16.mxu1 %v10269_v25  ;;  %v10362_v25 = vld [vmem:[#allocation2 + $0x4f4] ss:$8 sps:$4 sm:$0xff]  }
  0x8d   :  { %1205 = vmatpush1.bf16.msra.mxu0 %v10264_v26  ;;  %v10360_v26 = vld [vmem:[#allocation2 + $0x4f0] ss:$8 sps:$4 sm:$0xff]  }
  0x8e   :  { %1206 = vmatprep.subr.bf16.mxu0 %v10272_v27  ;;  %1248 = vmatpush1.bf16.msra.mxu1 %v10267_v28  ;;  %v10365_v27 = vld [vmem:[#allocation2 + $0x4e4] ss:$8 sps:$4 sm:$0xff]   ;;  %v10363_v28 = vld [vmem:[#allocation2 + $0x4e0] ss:$8 sps:$4 sm:$0xff]  }
  0x8f   :  { %1249 = vmatprep.subr.bf16.mxu1 %v10275_v29  ;;  %v10368_v29 = vld [vmem:[#allocation2 + $0x4d4] ss:$8 sps:$4 sm:$0xff]  }
  0x91   :  { %1207 = vmatpush1.bf16.msra.mxu0 %v10270_v30  ;;  %v10366_v30 = vld [vmem:[#allocation2 + $0x4d0] ss:$8 sps:$4 sm:$0xff]  }
  0x92   :  { %1208 = vmatprep.subr.bf16.mxu0 %v10278_v32  ;;  %1250 = vmatpush1.bf16.msra.mxu1 %v10273_v31  ;;  %v10371_v31 = vld [vmem:[#allocation2 + $0x4c4] ss:$8 sps:$4 sm:$0xff]   ;;  %v10369_v32 = vld [vmem:[#allocation2 + $0x4c0] ss:$8 sps:$4 sm:$0xff]  }
  0x93   :  { %1251 = vmatprep.subr.bf16.mxu1 %v10281_v34  ;;  %v10372_v34 = vld [vmem:[#allocation2 + $0x4b0] ss:$8 sps:$4 sm:$0xff]  }
  0x95   :  { %1209 = vmatpush1.bf16.msra.mxu0 %v10276_v35  ;;  %v10377_v35 = vld [vmem:[#allocation2 + $0x4a4] ss:$8 sps:$4 sm:$0xff]  }
  0x96   :  { %1210 = vmatprep.subr.bf16.mxu0 %v10284_v37  ;;  %1252 = vmatpush1.bf16.msra.mxu1 %v10279_v38  ;;  %v10380_v37 = vld [vmem:[#allocation2 + $0x494] ss:$8 sps:$4 sm:$0xff]   ;;  %v10378_v38 = vld [vmem:[#allocation2 + $0x490] ss:$8 sps:$4 sm:$0xff]  }
  0x97   :  { %1253 = vmatprep.subr.bf16.mxu1 %v10287_v39  ;;  %v10383_v39 = vld [vmem:[#allocation2 + $0x484] ss:$8 sps:$4 sm:$0xff]  }
  0x99   :  { %1211 = vmatpush2.bf16.msra.mxu0 %v10282_v40  ;;  %v10381_v40 = vld [vmem:[#allocation2 + $0x480] ss:$8 sps:$4 sm:$0xff]  }
  0x9a   :  { %1212 = vmatprep.subr.bf16.mxu0 %v10290_v41  ;;  %1254 = vmatpush2.bf16.msra.mxu1 %v10285_v42  ;;  %v10384_v41 = vld [vmem:[%s12112_s0 + $0x20] ss:$40 sps:$4 sm:$0xff]  }
  0x9b   :  { %1255 = vmatprep.subr.bf16.mxu1 %v10293_v43  ;;  %v10387_v42 = vld [vmem:[#allocation6 + $0x78] sm:$0xff]  }
  0x9c   :  { %v10388_v43 = vld [vmem:[#allocation6 + $0x38] sm:$0xff]  }
  0x9d   :  { %1213 = vmatpush2.bf16.msra.mxu0 %v10288_v44  ;;  %v10389_v44 = vld [vmem:[#allocation6 + $0x70] sm:$0xff]  }
  0x9e   :  { %1214 = vmatprep.subr.bf16.mxu0 %v10296_v45  ;;  %1256 = vmatpush2.bf16.msra.mxu1 %v10291_v46  ;;  %v10390_v45 = vld [vmem:[#allocation6 + $0x30] sm:$0xff]   ;;  %v10391_v46 = vld [vmem:[#allocation6 + $0x68] sm:$0xff]  }
  0x9f   :  { %1257 = vmatprep.subr.bf16.mxu1 %v10299_v47  ;;  %v10392_v47 = vld [vmem:[#allocation6 + $0x28] sm:$0xff]  }
  0xa1   :  { %1215 = vmatpush2.bf16.msra.mxu0 %v10294_v48  ;;  %v10393_v48 = vld [vmem:[#allocation6 + $0x60] sm:$0xff]  }
  0xa2   :  { %1216 = vmatprep.subr.bf16.mxu0 %v10302_v49  ;;  %1258 = vmatpush2.bf16.msra.mxu1 %v10297_v50  ;;  %v10394_v49 = vld [vmem:[#allocation6 + $0x20] sm:$0xff]   ;;  %v10395_v50 = vld [vmem:[#allocation6 + $0x58] sm:$0xff]  }
  0xa3   :  { %1259 = vmatprep.subr.bf16.mxu1 %v10305_v51  ;;  %v10396_v51 = vld [vmem:[#allocation6 + $0x18] sm:$0xff]  }
  0xa5   :  { %1217 = vmatpush2.bf16.msra.mxu0 %v10300_v52  ;;  %v10397_v52 = vld [vmem:[#allocation6 + $0x50] sm:$0xff]  }
  0xa6   :  { %1218 = vmatprep.subr.bf16.mxu0 %v10308_v53  ;;  %1260 = vmatpush2.bf16.msra.mxu1 %v10303_v54  ;;  %v10398_v53 = vld [vmem:[#allocation6 + $0x10] sm:$0xff]   ;;  %v10399_v54 = vld [vmem:[#allocation6 + $0x48] sm:$0xff]  }
  0xa7   :  { %1261 = vmatprep.subr.bf16.mxu1 %v10311_v55  ;;  %v10400_v55 = vld [vmem:[#allocation6 + $0x8] sm:$0xff]  }
  0xa9   :  { %1219 = vmatpush2.bf16.msra.mxu0 %v10306_v56  ;;  %v10401_v56 = vld [vmem:[#allocation6 + $0x40] sm:$0xff]  }
  0xaa   :  { %1220 = vmatprep.subr.bf16.mxu0 %v10314_v58  ;;  %1262 = vmatpush2.bf16.msra.mxu1 %v10309_v57  ;;  %v10402_v57 = vld [vmem:[#allocation6] sm:$0xff]   ;;  %v10405_v58 = vld [vmem:[#allocation2 + $0x574] ss:$8 sps:$4 sm:$0xff]  }
  0xab   :  { %1263 = vmatprep.subr.bf16.mxu1 %v10317_v60  ;;  %v10406_v60 = vld [vmem:[#allocation2 + $0x670] ss:$8 sps:$4 sm:$0xff]  }
  0xad   :  { %1221 = vmatpush2.bf16.msra.mxu0 %v10312_v59  ;;  %v10408_v59 = vld [vmem:[#allocation2 + $0x674] ss:$8 sps:$4 sm:$0xff]  }
  0xae   :  { %1222 = vmatprep.subr.bf16.mxu0 %v10320_v61  ;;  %1264 = vmatpush2.bf16.msra.mxu1 %v10315_v62  ;;  %v10414_v61 = vld [vmem:[#allocation2 + $0x664] ss:$8 sps:$4 sm:$0xff]   ;;  %v10412_v62 = vld [vmem:[#allocation2 + $0x660] ss:$8 sps:$4 sm:$0xff]  }
  0xaf   :  { %1265 = vmatprep.subr.bf16.mxu1 %v10323_v63  ;;  %v10420_v63 = vld [vmem:[#allocation2 + $0x654] ss:$8 sps:$4 sm:$0xff]  }
  0xb1   :  { %1223 = vmatpush2.bf16.msra.mxu0 %v10318_v0  ;;  %v10418_v0 = vld [vmem:[#allocation2 + $0x650] ss:$8 sps:$4 sm:$0xff]  }
  0xb2   :  { %1224 = vmatprep.subr.bf16.mxu0 %v10326_v1  ;;  %1266 = vmatpush2.bf16.msra.mxu1 %v10321_v2  ;;  %v10426_v1 = vld [vmem:[#allocation2 + $0x644] ss:$8 sps:$4 sm:$0xff]   ;;  %v10424_v2 = vld [vmem:[#allocation2 + $0x640] ss:$8 sps:$4 sm:$0xff]  }
  0xb3   :  { %1267 = vmatprep.subr.bf16.mxu1 %v10329_v3  ;;  %v10432_v3 = vld [vmem:[#allocation2 + $0x634] ss:$8 sps:$4 sm:$0xff]  }
  0xb5   :  { %1225 = vmatpush2.bf16.msra.mxu0 %v10324_v4  ;;  %v10430_v4 = vld [vmem:[#allocation2 + $0x630] ss:$8 sps:$4 sm:$0xff]  }
  0xb6   :  { %1280 = vmatprep.subr.bf16.mxu0 %v10335_v5  ;;  %1268 = vmatpush2.bf16.msra.mxu1 %v10327_v6  ;;  %v10438_v5 = vld [vmem:[#allocation2 + $0x624] ss:$8 sps:$4 sm:$0xff]   ;;  %v10436_v6 = vld [vmem:[#allocation2 + $0x620] ss:$8 sps:$4 sm:$0xff]  }
  0xb7   :  { %9988 = vmatprep.subr.bf16.mxu1 %v10387_v42  ;;  %v10546_v42 = vld [vmem:[#allocation2 + $0x814] ss:$8 sps:$4 sm:$0xff]  }
  0xb8   :  { %1227 = vmatmul.mubr.bf16.vlgmr.msra.gmra.mxu0 %v10330_v7  ;;  %v10444_v7 = vld [vmem:[#allocation2 + $0x614] ss:$8 sps:$4 sm:$0xff]  }
  0xb9   :  { %1281 = vmatpush1.bf16.msra.mxu0 %v10333_v8  ;;  %1312 = vmatprep.mubr.bf16.mxu0 %v10386_v9  ;;  %v10442_v8 = vld [vmem:[#allocation2 + $0x610] ss:$8 sps:$4 sm:$0xff]   ;;  %v10450_v9 = vld [vmem:[#allocation2 + $0x604] ss:$8 sps:$4 sm:$0xff]  }
  0xba   :  { %1270 = vmatmul.mubr.bf16.vlgmr.msra.gmra.mxu1 %v10336_v10  ;;  %1282 = vmatprep.subr.bf16.mxu0 %v10341_v11  ;;  %v10448_v10 = vld [vmem:[#allocation2 + $0x600] ss:$8 sps:$4 sm:$0xff]   ;;  %v10456_v11 = vld [vmem:[#allocation2 + $0x6f4] ss:$8 sps:$4 sm:$0xff]  }
  0xbb   :  { %9989 = vmatpush3.bf16.msra.mxu1 %v10388_v43  ;;  %v10544_v43 = vld [vmem:[#allocation2 + $0x810] ss:$8 sps:$4 sm:$0xff]  }
  0xbc   :  { %9990 = vmatprep.subr.bf16.mxu1 %v10389_v44 }
  0xbd   :  { %1283 = vmatpush1.bf16.msra.mxu0 %v10339_v12  ;;  %v10454_v12 = vld [vmem:[#allocation2 + $0x6f0] ss:$8 sps:$4 sm:$0xff]  }
  0xbe   :  { %1284 = vmatprep.subr.bf16.mxu0 %v10344_v13  ;;  %v10462_v13 = vld [vmem:[#allocation2 + $0x6e4] ss:$8 sps:$4 sm:$0xff]  }
  0xbf   :  { %9991 = vmatpush3.bf16.msra.mxu1 %v10390_v45 }
  0xc0   :  { %9992 = vmatprep.subr.bf16.mxu1 %v10391_v46  ;;  %v248_v46 = vlaneseq }
  0xc1   :  { %1285 = vmatpush1.bf16.msra.mxu0 %v10342_v14  ;;  %v10460_v14 = vld [vmem:[#allocation2 + $0x6e0] ss:$8 sps:$4 sm:$0xff]  }
  0xc2   :  { %1286 = vmatprep.subr.bf16.mxu0 %v10347_v15  ;;  %v10468_v15 = vld [vmem:[#allocation2 + $0x6d4] ss:$8 sps:$4 sm:$0xff]  }
  0xc3   :  { %9993 = vmatpush3.bf16.msra.mxu1 %v10392_v47  ;;  %v10552_v47 = vld [vmem:[#allocation2 + $0x804] ss:$8 sps:$4 sm:$0xff]  }
  0xc4   :  { %9994 = vmatprep.subr.bf16.mxu1 %v10393_v48  ;;  %v10550_v48 = vld [vmem:[#allocation2 + $0x800] ss:$8 sps:$4 sm:$0xff]  }
  0xc5   :  { %1287 = vmatpush1.bf16.msra.mxu0 %v10345_v16  ;;  %v10466_v16 = vld [vmem:[#allocation2 + $0x6d0] ss:$8 sps:$4 sm:$0xff]  }
  0xc6   :  { %1288 = vmatprep.subr.bf16.mxu0 %v10350_v17  ;;  %v10474_v17 = vld [vmem:[#allocation2 + $0x6c4] ss:$8 sps:$4 sm:$0xff]  }
  0xc7   :  { %9995 = vmatpush3.bf16.msra.mxu1 %v10394_v49 }
  0xc8   :  { %9996 = vmatprep.subr.bf16.mxu1 %v10395_v50 }
  0xc9   :  { %1289 = vmatpush1.bf16.msra.mxu0 %v10348_v18  ;;  %v10472_v18 = vld [vmem:[#allocation2 + $0x6c0] ss:$8 sps:$4 sm:$0xff]  }
  0xca   :  { %1290 = vmatprep.subr.bf16.mxu0 %v10353_v19  ;;  %v10480_v19 = vld [vmem:[#allocation2 + $0x6b4] ss:$8 sps:$4 sm:$0xff]  }
  0xcb   :  { %9997 = vmatpush3.bf16.msra.mxu1 %v10396_v51  ;;  %v249_v51 = vshrl.u32 %v248_v46, 7  ;;  %v10600_v46 = vld [vmem:[#allocation2 + $0x884] ss:$8 sps:$4 sm:$0xff]  }
  0xcc   :  { %9998 = vmatprep.subr.bf16.mxu1 %v10397_v52  ;;  %v10558_v52 = vld [vmem:[#allocation2 + $0x8f4] ss:$8 sps:$4 sm:$0xff]  }
  0xcd   :  { %1291 = vmatpush1.bf16.msra.mxu0 %v10351_v20  ;;  %v10478_v20 = vld [vmem:[#allocation2 + $0x6b0] ss:$8 sps:$4 sm:$0xff]  }
  0xce   :  { %1292 = vmatprep.subr.bf16.mxu0 %v10356_v21  ;;  %v10486_v21 = vld [vmem:[#allocation2 + $0x6a4] ss:$8 sps:$4 sm:$0xff]  }
  0xcf   :  { %9999 = vmatpush3.bf16.msra.mxu1 %v10398_v53  ;;  %v10556_v53 = vld [vmem:[#allocation2 + $0x8f0] ss:$8 sps:$4 sm:$0xff]  }
  0xd0   :  { %10000 = vmatprep.subr.bf16.mxu1 %v10399_v54  ;;  %v246_v54 = vld [vmem:[#allocation4] sm:$0x3] }
  0xd1   :  { %1293 = vmatpush1.bf16.msra.mxu0 %v10354_v22  ;;  %v10484_v22 = vld [vmem:[#allocation2 + $0x6a0] ss:$8 sps:$4 sm:$0xff]  }
  0xd2   :  { %1294 = vmatprep.subr.bf16.mxu0 %v10359_v23  ;;  %v10492_v23 = vld [vmem:[#allocation2 + $0x694] ss:$8 sps:$4 sm:$0xff]  }
  0xd3   :  { %10001 = vmatpush3.bf16.msra.mxu1 %v10400_v55 }
  0xd4   :  { %10002 = vmatprep.subr.bf16.mxu1 %v10401_v56 }
  0xd5   :  { %1295 = vmatpush1.bf16.msra.mxu0 %v10357_v24  ;;  %v10490_v24 = vld [vmem:[#allocation2 + $0x690] ss:$8 sps:$4 sm:$0xff]  }
  0xd6   :  { %1296 = vmatprep.subr.bf16.mxu0 %v10362_v25  ;;  %v10498_v25 = vld [vmem:[#allocation2 + $0x684] ss:$8 sps:$4 sm:$0xff]  }
  0xd7   :  { %10003 = vmatpush3.bf16.msra.mxu1 %v10402_v57  ;;  %v11934_v57 = vsub.s32 1, %v249_v51 }
  0xd8   :  { %2550 = vmatprep.subr.bf16.mxu1 %v10405_v58  ;;  %v11936_v58 = vsub.s32 0, %v249_v51 }
  0xd9   :  { %1297 = vmatpush2.bf16.msra.mxu0 %v10360_v26  ;;  %v10496_v26 = vld [vmem:[#allocation2 + $0x680] ss:$8 sps:$4 sm:$0xff]  }
  0xda   :  { %1298 = vmatprep.subr.bf16.mxu0 %v10365_v27  ;;  %v10507_v27 = vld [vmem:[%s12112_s0 + $0x5c] ss:$40 sps:$4 sm:$0xff]  }
  0xdd   :  { %1299 = vmatpush2.bf16.msra.mxu0 %v10363_v28  ;;  %v10505_v28 = vld [vmem:[%s12112_s0 + $0x58] ss:$40 sps:$4 sm:$0xff]  }
  0xde   :  { %1300 = vmatprep.subr.bf16.mxu0 %v10368_v29  ;;  %v10510_v29 = vld [vmem:[#allocation2 + $0x874] ss:$8 sps:$4 sm:$0xff]  }
  0xe1   :  { %1301 = vmatpush2.bf16.msra.mxu0 %v10366_v30  ;;  %v10508_v30 = vld [vmem:[#allocation2 + $0x870] ss:$8 sps:$4 sm:$0xff]  }
  0xe2   :  { %1302 = vmatprep.subr.bf16.mxu0 %v10371_v31  ;;  %v10516_v31 = vld [vmem:[#allocation2 + $0x864] ss:$8 sps:$4 sm:$0xff]  }
  0xe5   :  { %1303 = vmatpush2.bf16.msra.mxu0 %v10369_v32  ;;  %v10514_v32 = vld [vmem:[#allocation2 + $0x860] ss:$8 sps:$4 sm:$0xff]  }
  0xe6   :  { %1304 = vmatprep.subr.bf16.mxu0 %v10374_v33  ;;  %v10522_v33 = vld [vmem:[#allocation2 + $0x854] ss:$8 sps:$4 sm:$0xff]  }
  0xe9   :  { %1305 = vmatpush2.bf16.msra.mxu0 %v10372_v34  ;;  %v10520_v34 = vld [vmem:[#allocation2 + $0x850] ss:$8 sps:$4 sm:$0xff]  }
  0xea   :  { %1306 = vmatprep.subr.bf16.mxu0 %v10377_v35  ;;  %v10528_v35 = vld [vmem:[#allocation2 + $0x844] ss:$8 sps:$4 sm:$0xff]  }
  0xed   :  { %1307 = vmatpush2.bf16.msra.mxu0 %v10375_v36  ;;  %v10526_v36 = vld [vmem:[#allocation2 + $0x840] ss:$8 sps:$4 sm:$0xff]  }
  0xee   :  { %1308 = vmatprep.subr.bf16.mxu0 %v10380_v37  ;;  %v10534_v37 = vld [vmem:[#allocation2 + $0x834] ss:$8 sps:$4 sm:$0xff]  }
  0xf1   :  { %1309 = vmatpush2.bf16.msra.mxu0 %v10378_v38  ;;  %v10532_v38 = vld [vmem:[#allocation2 + $0x830] ss:$8 sps:$4 sm:$0xff]  }
  0xf2   :  { %1310 = vmatprep.subr.bf16.mxu0 %v10383_v39  ;;  %v10540_v39 = vld [vmem:[#allocation2 + $0x824] ss:$8 sps:$4 sm:$0xff]  }
  0xf5   :  { %1311 = vmatpush2.bf16.msra.mxu0 %v10381_v40  ;;  %v10538_v40 = vld [vmem:[#allocation2 + $0x820] ss:$8 sps:$4 sm:$0xff]  }
  0xf6   :  { %2593 = vmatprep.subr.bf16.mxu0 %v10408_v59 }
  0xf8   :  { %1313 = vmatmul.mubr.bf16.vlgmr.msra.gmra.mxu0 %v10384_v41 }
  0xf9   :  { %2594 = vmatpush1.bf16.msra.mxu0 %v10406_v60  ;;  %2625 = vmatprep.mubr.bf16.mxu0 %v10507_v27  ;;  %v10564_v60 = vld [vmem:[#allocation2 + $0x8e4] ss:$8 sps:$4 sm:$0xff]  }
  0xfa   :  { %2595 = vmatprep.subr.bf16.mxu0 %v10414_v61  ;;  %v10562_v61 = vld [vmem:[#allocation2 + $0x8e0] ss:$8 sps:$4 sm:$0xff]  }
  0xfd   :  { %2596 = vmatpush1.bf16.msra.mxu0 %v10412_v62 }
  0xfe   :  { %2597 = vmatprep.subr.bf16.mxu0 %v10420_v63  ;;  %v255_v63 = vrot.slane %v246_v54, %v11934_v57 }
 0x101   :  { %2598 = vmatpush1.bf16.msra.mxu0 %v10418_v0  ;;  %v251_v0 = vrot.slane %v246_v54, %v11936_v58  ;;  %v10607_v54 = vld [vmem:[%s12112_s0 + $0x68] ss:$40 sps:$4 sm:$0xff]  }
 0x102   :  { %2599 = vmatprep.subr.bf16.mxu0 %v10426_v1 }
 0x105   :  { %2600 = vmatpush1.bf16.msra.mxu0 %v10424_v2 }
 0x106   :  { %2601 = vmatprep.subr.bf16.mxu0 %v10432_v3  ;;  %v10570_v3 = vld [vmem:[#allocation2 + $0x8d4] ss:$8 sps:$4 sm:$0xff]  }
 0x109   :  { %2602 = vmatpush1.bf16.msra.mxu0 %v10430_v4  ;;  %v10568_v4 = vld [vmem:[#allocation2 + $0x8d0] ss:$8 sps:$4 sm:$0xff]  }
 0x10a   :  { %2603 = vmatprep.subr.bf16.mxu0 %v10438_v5 }
 0x10d   :  { %2604 = vmatpush1.bf16.msra.mxu0 %v10436_v6 }
 0x10e   :  { %2605 = vmatprep.subr.bf16.mxu0 %v10444_v7 }
 0x111   :  { %2606 = vmatpush1.bf16.msra.mxu0 %v10442_v8 }
 0x112   :  { %2607 = vmatprep.subr.bf16.mxu0 %v10450_v9 }
 0x115   :  { %2608 = vmatpush1.bf16.msra.mxu0 %v10448_v10  ;;  %v10576_v10 = vld [vmem:[#allocation2 + $0x8c4] ss:$8 sps:$4 sm:$0xff]  }
 0x116   :  { %2609 = vmatprep.subr.bf16.mxu0 %v10456_v11 }
 0x119   :  { %2610 = vmatpush2.bf16.msra.mxu0 %v10454_v12  ;;  %v10574_v12 = vld [vmem:[#allocation2 + $0x8c0] ss:$8 sps:$4 sm:$0xff]  }
 0x11a   :  { %2611 = vmatprep.subr.bf16.mxu0 %v10462_v13 }
 0x11d   :  { %2612 = vmatpush2.bf16.msra.mxu0 %v10460_v14 }
 0x11e   :  { %2613 = vmatprep.subr.bf16.mxu0 %v10468_v15 }
 0x121   :  { %2614 = vmatpush2.bf16.msra.mxu0 %v10466_v16 }
 0x122   :  { %2615 = vmatprep.subr.bf16.mxu0 %v10474_v17 }
 0x125   :  { %2616 = vmatpush2.bf16.msra.mxu0 %v10472_v18  ;;  %v10582_v18 = vld [vmem:[#allocation2 + $0x8b4] ss:$8 sps:$4 sm:$0xff]  }
 0x126   :  { %2617 = vmatprep.subr.bf16.mxu0 %v10480_v19 }
 0x129   :  { %2618 = vmatpush2.bf16.msra.mxu0 %v10478_v20 }
 0x12a   :  { %2619 = vmatprep.subr.bf16.mxu0 %v10486_v21 }
 0x12d   :  { %2620 = vmatpush2.bf16.msra.mxu0 %v10484_v22  ;;  %v10580_v22 = vld [vmem:[#allocation2 + $0x8b0] ss:$8 sps:$4 sm:$0xff]  }
 0x12e   :  { %2621 = vmatprep.subr.bf16.mxu0 %v10492_v23 }
 0x131   :  { %2622 = vmatpush2.bf16.msra.mxu0 %v10490_v24 }
 0x132   :  { %2623 = vmatprep.subr.bf16.mxu0 %v10498_v25 }
 0x135   :  { %2624 = vmatpush2.bf16.msra.mxu0 %v10496_v26 }
 0x136   :  { %2679 = vmatprep.subr.bf16.mxu0 %v10510_v29 }
 0x138   :  { %2626 = vmatmul.mubr.bf16.vlgmr.msra.gmra.mxu0 %v10505_v28  ;;  %v1142_v41 = vpop.f32.mrf.mxu0  ;;  %v10588_v28 = vld [vmem:[#allocation2 + $0x8a4] ss:$8 sps:$4 sm:$0xff]  }
 0x139   :  { %2680 = vmatpush1.bf16.msra.mxu0 %v10508_v30  ;;  %v1185_v45 = vpop.f32.mrf.mxu1  ;;  %v1143_v7 = vadd.f32 %v1142_v41, %v251_v0  ;;  %v10592_v41 = vld [vmem:[#allocation2 + $0x890] ss:$8 sps:$4 sm:$0xff]  }
 0x13a   :  { %2681 = vmatprep.subr.bf16.mxu0 %v10516_v31  ;;  %v1144_v44 = vpop.f32.mrf.mxu0  ;;  %v10586_v31 = vld [vmem:[#allocation2 + $0x8a0] ss:$8 sps:$4 sm:$0xff]  }
 0x13b   :  { %v1187_v50 = vpop.f32.mrf.mxu1  ;;  %v1145_v5 = vadd.f32 %v1144_v44, %v255_v63  ;;  %v1186_v15 = vadd.f32 %v1185_v45, %v1143_v7  ;;  %v10451_v7 = vld [vmem:[#allocation2 + $0x5f0] ss:$8 sps:$4 sm:$0xff]  }
 0x13c   :  { %v1146_v49 = vpop.f32.mrf.mxu0 }
 0x13d   :  { %2682 = vmatpush1.bf16.msra.mxu0 %v10514_v32  ;;  %v1189_v56 = vpop.f32.mrf.mxu1  ;;  %v1147_v6 = vadd.f32 %v1146_v49, %v251_v0  ;;  %v1188_v13 = vadd.f32 %v1187_v50, %v1145_v5  ;;  %v10501_v49 = vld [vmem:[%s12112_s0 + $0x54] ss:$40 sps:$4 sm:$0xff]   ;;  %v10598_v50 = vld [vmem:[#allocation2 + $0x880] ss:$8 sps:$4 sm:$0xff]   ;;  %v10435_v0 = vld [vmem:[#allocation2 + $0x524] ss:$8 sps:$4 sm:$0xff]  }
 0x13e   :  { %2683 = vmatprep.subr.bf16.mxu0 %v10522_v33  ;;  %v1148_v55 = vpop.f32.mrf.mxu0  ;;  %v10445_v5 = vld [vmem:[#allocation2 + $0x500] ss:$8 sps:$4 sm:$0xff]  }
 0x13f   :  { %v1191_v62 = vpop.f32.mrf.mxu1  ;;  %v1149_v11 = vadd.f32 %v1148_v55, %v255_v63  ;;  %v1190_v14 = vadd.f32 %v1189_v56, %v1147_v6  ;;  %v10409_v55 = vld [vmem:[#allocation2 + $0x560] ss:$8 sps:$4 sm:$0xff]   ;;  %v10417_v56 = vld [vmem:[#allocation2 + $0x554] ss:$8 sps:$4 sm:$0xff]   ;;  %v10427_v63 = vld [vmem:[#allocation2 + $0x530] ss:$8 sps:$4 sm:$0xff]  }
 0x140   :  { %v10453_v6 = vld [vmem:[#allocation2 + $0x5f4] ss:$8 sps:$4 sm:$0xff]  }
 0x141   :  { %2684 = vmatpush1.bf16.msra.mxu0 %v10520_v34  ;;  %v1192_v19 = vadd.f32 %v1191_v62, %v1149_v11  ;;  %v10429_v62 = vld [vmem:[#allocation2 + $0x534] ss:$8 sps:$4 sm:$0xff]   ;;  %v10463_v11 = vld [vmem:[#allocation2 + $0x5d0] ss:$8 sps:$4 sm:$0xff]  }
 0x142   :  { %2685 = vmatprep.subr.bf16.mxu0 %v10528_v35 }
 0x145   :  { %2686 = vmatpush1.bf16.msra.mxu0 %v10526_v36 }
 0x146   :  { %2687 = vmatprep.subr.bf16.mxu0 %v10534_v37 }
 0x149   :  { %2688 = vmatpush1.bf16.msra.mxu0 %v10532_v38 }
 0x14a   :  { %2689 = vmatprep.subr.bf16.mxu0 %v10540_v39  ;;  %v10594_v39 = vld [vmem:[#allocation2 + $0x894] ss:$8 sps:$4 sm:$0xff]  }
 0x14d   :  { %2690 = vmatpush1.bf16.msra.mxu0 %v10538_v40 }
 0x14e   :  { %2691 = vmatprep.subr.bf16.mxu0 %v10546_v42 }
 0x151   :  { %2692 = vmatpush1.bf16.msra.mxu0 %v10544_v43 }
 0x152   :  { %2693 = vmatprep.subr.bf16.mxu0 %v10552_v47 }
 0x155   :  { %2694 = vmatpush1.bf16.msra.mxu0 %v10550_v48  ;;  %v10403_v48 = vld [vmem:[#allocation2 + $0x570] ss:$8 sps:$4 sm:$0xff]  }
 0x156   :  { %2695 = vmatprep.subr.bf16.mxu0 %v10558_v52  ;;  %v10411_v52 = vld [vmem:[#allocation2 + $0x564] ss:$8 sps:$4 sm:$0xff]  }
 0x159   :  { %2696 = vmatpush2.bf16.msra.mxu0 %v10556_v53  ;;  %v10609_v53 = vld [vmem:[%s12112_s0 + $0x6c] ss:$40 sps:$4 sm:$0xff]  }
 0x15a   :  { %2697 = vmatprep.subr.bf16.mxu0 %v10564_v60  ;;  %2711 = vmatprep.mubr.bf16.mxu0 %v10609_v53  ;;  %v10423_v60 = vld [vmem:[#allocation2 + $0x544] ss:$8 sps:$4 sm:$0xff]   ;;  %v10589_v53 = vld [vmem:[#allocation2 + $0x790] ss:$8 sps:$4 sm:$0xff]  }
 0x15d   :  { %2698 = vmatpush2.bf16.msra.mxu0 %v10562_v61  ;;  %v10421_v61 = vld [vmem:[#allocation2 + $0x540] ss:$8 sps:$4 sm:$0xff]  }
 0x15e   :  { %2699 = vmatprep.subr.bf16.mxu0 %v10570_v3  ;;  %v10439_v3 = vld [vmem:[#allocation2 + $0x510] ss:$8 sps:$4 sm:$0xff]  }
 0x161   :  { %2700 = vmatpush2.bf16.msra.mxu0 %v10568_v4  ;;  %v10447_v4 = vld [vmem:[#allocation2 + $0x504] ss:$8 sps:$4 sm:$0xff]  }
 0x162   :  { %2701 = vmatprep.subr.bf16.mxu0 %v10576_v10  ;;  %v10465_v10 = vld [vmem:[#allocation2 + $0x5d4] ss:$8 sps:$4 sm:$0xff]  }
 0x165   :  { %2702 = vmatpush2.bf16.msra.mxu0 %v10574_v12  ;;  %v10471_v12 = vld [vmem:[#allocation2 + $0x5c4] ss:$8 sps:$4 sm:$0xff]  }
 0x166   :  { %2703 = vmatprep.subr.bf16.mxu0 %v10582_v18  ;;  %v10489_v18 = vld [vmem:[#allocation2 + $0x594] ss:$8 sps:$4 sm:$0xff]  }
 0x169   :  { %2704 = vmatpush2.bf16.msra.mxu0 %v10580_v22  ;;  %v10504_v22 = vld [vmem:[#allocation2 + $0x774] ss:$8 sps:$4 sm:$0xff]  }
 0x16a   :  { %2705 = vmatprep.subr.bf16.mxu0 %v10588_v28  ;;  %v10519_v28 = vld [vmem:[#allocation2 + $0x754] ss:$8 sps:$4 sm:$0xff]  }
 0x16d   :  { %2706 = vmatpush2.bf16.msra.mxu0 %v10586_v31  ;;  %v10523_v31 = vld [vmem:[#allocation2 + $0x740] ss:$8 sps:$4 sm:$0xff]  }
 0x16e   :  { %2707 = vmatprep.subr.bf16.mxu0 %v10594_v39  ;;  %v10547_v39 = vld [vmem:[#allocation2 + $0x700] ss:$8 sps:$4 sm:$0xff]  }
 0x171   :  { %2708 = vmatpush2.bf16.msra.mxu0 %v10592_v41  ;;  %v10553_v41 = vld [vmem:[#allocation2 + $0x7f0] ss:$8 sps:$4 sm:$0xff]  }
 0x172   :  { %2709 = vmatprep.subr.bf16.mxu0 %v10600_v46  ;;  %v10573_v46 = vld [vmem:[#allocation2 + $0x7c4] ss:$8 sps:$4 sm:$0xff]  }
 0x175   :  { %2710 = vmatpush2.bf16.msra.mxu0 %v10598_v50  ;;  %v10585_v50 = vld [vmem:[#allocation2 + $0x7a4] ss:$8 sps:$4 sm:$0xff]  }
 0x178   :  { %v1228_v59 = vpop.f32.mrf.mxu0  ;;  %2712 = vmatmul.mubr.bf16.vlgmr.msra.gmra.mxu0 %v10607_v54  ;;  %v10597_v54 = vld [vmem:[#allocation2 + $0x784] ss:$8 sps:$4 sm:$0xff]  }
 0x179   :  { %v1229_v23 = vadd.f32 %v1228_v59, %v1186_v15  ;;  %v10415_v59 = vld [vmem:[#allocation2 + $0x550] ss:$8 sps:$4 sm:$0xff]  }
 0x17a   :  { %v1230_v1 = vpop.f32.mrf.mxu0  ;;  %v1271_v2 = vpop.f32.mrf.mxu1  ;;  %v10475_v15 = vld [vmem:[#allocation2 + $0x5b0] ss:$8 sps:$4 sm:$0xff]  }
 0x17b   :  { %v1231_v20 = vadd.f32 %v1230_v1, %v1188_v13  ;;  %v1272_v32 = vadd.f32 %v1271_v2, %v1229_v23  ;;  %v10433_v1 = vld [vmem:[#allocation2 + $0x520] ss:$8 sps:$4 sm:$0xff]   ;;  %v10441_v2 = vld [vmem:[#allocation2 + $0x514] ss:$8 sps:$4 sm:$0xff]   ;;  %v10499_v23 = vld [vmem:[%s12112_s0 + $0x50] ss:$40 sps:$4 sm:$0xff]  }
 0x17c   :  { %v1232_v8 = vpop.f32.mrf.mxu0  ;;  %v1273_v9 = vpop.f32.mrf.mxu1  ;;  %v10469_v13 = vld [vmem:[#allocation2 + $0x5c0] ss:$8 sps:$4 sm:$0xff]  }
 0x17d   :  { %v1233_v21 = vadd.f32 %v1232_v8, %v1190_v14  ;;  %v1274_v29 = vadd.f32 %v1273_v9, %v1231_v20  ;;  %v10459_v8 = vld [vmem:[#allocation2 + $0x5e4] ss:$8 sps:$4 sm:$0xff]   ;;  %v10457_v9 = vld [vmem:[#allocation2 + $0x5e0] ss:$8 sps:$4 sm:$0xff]   ;;  %v10477_v14 = vld [vmem:[#allocation2 + $0x5b4] ss:$8 sps:$4 sm:$0xff]  }
 0x17e   :  { %v1234_v16 = vpop.f32.mrf.mxu0  ;;  %v1275_v17 = vpop.f32.mrf.mxu1  ;;  %v10495_v20 = vld [vmem:[#allocation2 + $0x584] ss:$8 sps:$4 sm:$0xff]  }
 0x17f   :  { %v1235_v25 = vadd.f32 %v1234_v16, %v1192_v19  ;;  %v1276_v30 = vadd.f32 %v1275_v17, %v1233_v21  ;;  %v10483_v16 = vld [vmem:[#allocation2 + $0x5a4] ss:$8 sps:$4 sm:$0xff]   ;;  %v10481_v17 = vld [vmem:[#allocation2 + $0x5a0] ss:$8 sps:$4 sm:$0xff]   ;;  %v10487_v19 = vld [vmem:[#allocation2 + $0x590] ss:$8 sps:$4 sm:$0xff]  }
 0x180   :  { %v1277_v26 = vpop.f32.mrf.mxu1  ;;  %v10493_v21 = vld [vmem:[#allocation2 + $0x580] ss:$8 sps:$4 sm:$0xff]  }
 0x181   :  { %v1278_v34 = vadd.f32 %v1277_v26, %v1235_v25  ;;  %v10513_v25 = vld [vmem:[#allocation2 + $0x764] ss:$8 sps:$4 sm:$0xff]  }
 0x182   :  { %v10603_v26 = vld [vmem:[%s12112_s0 + $0x64] ss:$40 sps:$4 sm:$0xff]  }
 0x1b8   :  { %v1314_v24 = vpop.f32.mrf.mxu0 }
 0x1b9   :  { %v1315_v37 = vadd.f32 %v1314_v24, %v1272_v32  ;;  %v10502_v24 = vld [vmem:[#allocation2 + $0x770] ss:$8 sps:$4 sm:$0xff]   ;;  %v10531_v32 = vld [vmem:[#allocation2 + $0x734] ss:$8 sps:$4 sm:$0xff]  }
 0x1ba   :  { %v1316_v27 = vpop.f32.mrf.mxu0 }
 0x1bb   :  { %v1317_v35 = vadd.f32 %v1316_v27, %v1274_v29  ;;  %v1323_v45 = vmax.f32 %v1315_v37, 0.0  ;;  %v10511_v27 = vld [vmem:[#allocation2 + $0x760] ss:$8 sps:$4 sm:$0xff]   ;;  %v10517_v29 = vld [vmem:[#allocation2 + $0x750] ss:$8 sps:$4 sm:$0xff]  }
 0x1bc   :  { %v1318_v33 = vpop.f32.mrf.mxu0  ;;  %v10541_v37 = vld [vmem:[#allocation2 + $0x710] ss:$8 sps:$4 sm:$0xff]  }
 0x1bd   :  { %v1319_v36 = vadd.f32 %v1318_v33, %v1276_v30  ;;  %v1324_v43 = vmax.f32 %v1317_v35, 0.0  ;;  %v10525_v30 = vld [vmem:[#allocation2 + $0x744] ss:$8 sps:$4 sm:$0xff]   ;;  %v10529_v33 = vld [vmem:[#allocation2 + $0x730] ss:$8 sps:$4 sm:$0xff]  }
 0x1be   :  { %v1320_v38 = vpop.f32.mrf.mxu0  ;;  %v10535_v35 = vld [vmem:[#allocation2 + $0x720] ss:$8 sps:$4 sm:$0xff]  }
 0x1bf   :  { %v1321_v40 = vadd.f32 %v1320_v38, %v1278_v34  ;;  %v1325_v42 = vmax.f32 %v1319_v36, 0.0  ;;  %v10537_v34 = vld [vmem:[#allocation2 + $0x724] ss:$8 sps:$4 sm:$0xff]   ;;  %v10543_v36 = vld [vmem:[#allocation2 + $0x714] ss:$8 sps:$4 sm:$0xff]  }
 0x1c0   :  { %v10549_v38 = vld [vmem:[#allocation2 + $0x704] ss:$8 sps:$4 sm:$0xff]  }
 0x1c1   :  { %v1326_v44 = vmax.f32 %v1321_v40, 0.0  ;;  %v1327_v51 = vpack.c.bf16 %v1325_v42, %v1323_v45  ;;  %v10555_v40 = vld [vmem:[#allocation2 + $0x7f4] ss:$8 sps:$4 sm:$0xff]   ;;  %v10561_v42 = vld [vmem:[#allocation2 + $0x7e4] ss:$8 sps:$4 sm:$0xff]  }
 0x1c2   :  { %v10565_v45 = vld [vmem:[#allocation2 + $0x7d0] ss:$8 sps:$4 sm:$0xff]  }
 0x1c3   :  { %v1328_v47 = vpack.c.bf16 %v1326_v44, %v1324_v43  ;;  %v10559_v43 = vld [vmem:[#allocation2 + $0x7e0] ss:$8 sps:$4 sm:$0xff]   ;;  %v10567_v44 = vld [vmem:[#allocation2 + $0x7d4] ss:$8 sps:$4 sm:$0xff]  }
 0x1c5   :  { %1496 = vmatprep.mubr.bf16.mxu1 %v1328_v47  ;;  %v10571_v47 = vld [vmem:[#allocation2 + $0x7c0] ss:$8 sps:$4 sm:$0xff]  }
 0x1c6   :  { %1497 = vmatmul.mubr.bf16.vlgmr.msra.gmra.mxu1 %v1327_v51  ;;  %v10583_v51 = vld [vmem:[#allocation2 + $0x7a0] ss:$8 sps:$4 sm:$0xff]  }
 0x1c7   :  { %2551 = vmatpush1.bf16.msra.mxu1 %v10403_v48  ;;  %2582 = vmatprep.mubr.bf16.mxu1 %v10501_v49  ;;  %v10579_v48 = vld [vmem:[#allocation2 + $0x7b4] ss:$8 sps:$4 sm:$0xff]   ;;  %v10577_v49 = vld [vmem:[#allocation2 + $0x7b0] ss:$8 sps:$4 sm:$0xff]  }
 0x1c8   :  { %2552 = vmatprep.subr.bf16.mxu1 %v10411_v52  ;;  %v10591_v52 = vld [vmem:[#allocation2 + $0x794] ss:$8 sps:$4 sm:$0xff]  }
 0x1cb   :  { %2553 = vmatpush1.bf16.msra.mxu1 %v10409_v55  ;;  %v10595_v55 = vld [vmem:[#allocation2 + $0x780] ss:$8 sps:$4 sm:$0xff]  }
 0x1cc   :  { %2554 = vmatprep.subr.bf16.mxu1 %v10417_v56  ;;  %v10606_v56 = vld [vmem:[#allocation2 + $0x974] ss:$8 sps:$4 sm:$0xff]  }
 0x1cf   :  { %2555 = vmatpush1.bf16.msra.mxu1 %v10415_v59  ;;  %v10601_v59 = vld [vmem:[%s12112_s0 + $0x60] ss:$40 sps:$4 sm:$0xff]  }
 0x1d0   :  { %2556 = vmatprep.subr.bf16.mxu1 %v10423_v60  ;;  %v10604_v60 = vld [vmem:[#allocation2 + $0x970] ss:$8 sps:$4 sm:$0xff]  }
 0x1d3   :  { %2557 = vmatpush1.bf16.msra.mxu1 %v10421_v61  ;;  %v10657_v61 = vld [vmem:[%s12112_s0 + $0x74] ss:$40 sps:$4 sm:$0xff]  }
 0x1d4   :  { %2558 = vmatprep.subr.bf16.mxu1 %v10429_v62  ;;  %v10612_v62 = vld [vmem:[#allocation2 + $0x964] ss:$8 sps:$4 sm:$0xff]  }
 0x1d7   :  { %2559 = vmatpush1.bf16.msra.mxu1 %v10427_v63  ;;  %v10610_v63 = vld [vmem:[#allocation2 + $0x960] ss:$8 sps:$4 sm:$0xff]  }
 0x1d8   :  { %2560 = vmatprep.subr.bf16.mxu1 %v10435_v0  ;;  %v10615_v0 = vld [vmem:[#allocation2 + $0x954] ss:$8 sps:$4 sm:$0xff]  }
 0x1db   :  { %2561 = vmatpush1.bf16.msra.mxu1 %v10433_v1  ;;  %v10613_v1 = vld [vmem:[#allocation2 + $0x950] ss:$8 sps:$4 sm:$0xff]  }
 0x1dc   :  { %2562 = vmatprep.subr.bf16.mxu1 %v10441_v2  ;;  %v10618_v2 = vld [vmem:[#allocation2 + $0x944] ss:$8 sps:$4 sm:$0xff]  }
 0x1df   :  { %2563 = vmatpush1.bf16.msra.mxu1 %v10439_v3  ;;  %v10616_v3 = vld [vmem:[#allocation2 + $0x940] ss:$8 sps:$4 sm:$0xff]  }
 0x1e0   :  { %2564 = vmatprep.subr.bf16.mxu1 %v10447_v4  ;;  %v10621_v4 = vld [vmem:[#allocation2 + $0x934] ss:$8 sps:$4 sm:$0xff]  }
 0x1e3   :  { %2565 = vmatpush1.bf16.msra.mxu1 %v10445_v5  ;;  %v10619_v5 = vld [vmem:[#allocation2 + $0x930] ss:$8 sps:$4 sm:$0xff]  }
 0x1e4   :  { %2566 = vmatprep.subr.bf16.mxu1 %v10453_v6  ;;  %v10624_v6 = vld [vmem:[#allocation2 + $0x924] ss:$8 sps:$4 sm:$0xff]  }
 0x1e7   :  { %2567 = vmatpush2.bf16.msra.mxu1 %v10451_v7  ;;  %v10622_v7 = vld [vmem:[#allocation2 + $0x920] ss:$8 sps:$4 sm:$0xff]  }
 0x1e8   :  { %2568 = vmatprep.subr.bf16.mxu1 %v10459_v8  ;;  %v10627_v8 = vld [vmem:[#allocation2 + $0x914] ss:$8 sps:$4 sm:$0xff]  }
 0x1eb   :  { %2569 = vmatpush2.bf16.msra.mxu1 %v10457_v9  ;;  %v10625_v9 = vld [vmem:[#allocation2 + $0x910] ss:$8 sps:$4 sm:$0xff]  }
 0x1ec   :  { %2570 = vmatprep.subr.bf16.mxu1 %v10465_v10  ;;  %v10630_v10 = vld [vmem:[#allocation2 + $0x904] ss:$8 sps:$4 sm:$0xff]  }
 0x1ef   :  { %2571 = vmatpush2.bf16.msra.mxu1 %v10463_v11  ;;  %v10628_v11 = vld [vmem:[#allocation2 + $0x900] ss:$8 sps:$4 sm:$0xff]  }
 0x1f0   :  { %2572 = vmatprep.subr.bf16.mxu1 %v10471_v12  ;;  %v10633_v12 = vld [vmem:[#allocation2 + $0x9f4] ss:$8 sps:$4 sm:$0xff]  }
 0x1f3   :  { %2573 = vmatpush2.bf16.msra.mxu1 %v10469_v13  ;;  %v10631_v13 = vld [vmem:[#allocation2 + $0x9f0] ss:$8 sps:$4 sm:$0xff]  }
 0x1f4   :  { %2574 = vmatprep.subr.bf16.mxu1 %v10477_v14  ;;  %v10636_v14 = vld [vmem:[#allocation2 + $0x9e4] ss:$8 sps:$4 sm:$0xff]  }
 0x1f7   :  { %2575 = vmatpush2.bf16.msra.mxu1 %v10475_v15  ;;  %v10634_v15 = vld [vmem:[#allocation2 + $0x9e0] ss:$8 sps:$4 sm:$0xff]  }
 0x1f8   :  { %2576 = vmatprep.subr.bf16.mxu1 %v10483_v16  ;;  %v10639_v16 = vld [vmem:[#allocation2 + $0x9d4] ss:$8 sps:$4 sm:$0xff]  }
 0x1fb   :  { %2577 = vmatpush2.bf16.msra.mxu1 %v10481_v17  ;;  %v10637_v17 = vld [vmem:[#allocation2 + $0x9d0] ss:$8 sps:$4 sm:$0xff]  }
 0x1fc   :  { %2578 = vmatprep.subr.bf16.mxu1 %v10489_v18  ;;  %v10642_v18 = vld [vmem:[#allocation2 + $0x9c4] ss:$8 sps:$4 sm:$0xff]  }
 0x1ff   :  { %2579 = vmatpush2.bf16.msra.mxu1 %v10487_v19  ;;  %v10640_v19 = vld [vmem:[#allocation2 + $0x9c0] ss:$8 sps:$4 sm:$0xff]  }
 0x200   :  { %2580 = vmatprep.subr.bf16.mxu1 %v10495_v20  ;;  %v10645_v20 = vld [vmem:[#allocation2 + $0x9b4] ss:$8 sps:$4 sm:$0xff]  }
 0x203   :  { %2581 = vmatpush2.bf16.msra.mxu1 %v10493_v21  ;;  %v10643_v21 = vld [vmem:[#allocation2 + $0x9b0] ss:$8 sps:$4 sm:$0xff]  }
 0x204   :  { %2636 = vmatprep.subr.bf16.mxu1 %v10504_v22  ;;  %v10648_v22 = vld [vmem:[#allocation2 + $0x9a4] ss:$8 sps:$4 sm:$0xff]  }
 0x206   :  { %2583 = vmatmul.mubr.bf16.vlgmr.msra.gmra.mxu1 %v10499_v23  ;;  %v10646_v23 = vld [vmem:[#allocation2 + $0x9a0] ss:$8 sps:$4 sm:$0xff]  }
 0x207   :  { %2637 = vmatpush1.bf16.msra.mxu1 %v10502_v24  ;;  %2668 = vmatprep.mubr.bf16.mxu1 %v10603_v26  ;;  %v10651_v24 = vld [vmem:[#allocation2 + $0x994] ss:$8 sps:$4 sm:$0xff]   ;;  %v10654_v26 = vld [vmem:[#allocation2 + $0x984] ss:$8 sps:$4 sm:$0xff]  }
 0x208   :  { %2638 = vmatprep.subr.bf16.mxu1 %v10513_v25  ;;  %v10649_v25 = vld [vmem:[#allocation2 + $0x990] ss:$8 sps:$4 sm:$0xff]  }
 0x20b   :  { %2639 = vmatpush1.bf16.msra.mxu1 %v10511_v27  ;;  %v10652_v27 = vld [vmem:[#allocation2 + $0x980] ss:$8 sps:$4 sm:$0xff]  }
 0x20c   :  { %2640 = vmatprep.subr.bf16.mxu1 %v10519_v28  ;;  %v10655_v28 = vld [vmem:[%s12112_s0 + $0x70] ss:$40 sps:$4 sm:$0xff]  }
 0x20f   :  { %2641 = vmatpush1.bf16.msra.mxu1 %v10517_v29 }
 0x210   :  { %2642 = vmatprep.subr.bf16.mxu1 %v10525_v30 }
 0x213   :  { %2643 = vmatpush1.bf16.msra.mxu1 %v10523_v31 }
 0x214   :  { %2644 = vmatprep.subr.bf16.mxu1 %v10531_v32 }
 0x217   :  { %2645 = vmatpush1.bf16.msra.mxu1 %v10529_v33  ;;  %v8917_v33 = vld [vmem:[#allocation7] ss:$0 sm:$0xff] }
 0x218   :  { %2646 = vmatprep.subr.bf16.mxu1 %v10537_v34 }
 0x21b   :  { %2647 = vmatpush1.bf16.msra.mxu1 %v10535_v35 }
 0x21c   :  { %2648 = vmatprep.subr.bf16.mxu1 %v10543_v36 }
 0x21f   :  { %2649 = vmatpush1.bf16.msra.mxu1 %v10541_v37 }
 0x220   :  { %2650 = vmatprep.subr.bf16.mxu1 %v10549_v38  ;;  %v10658_v38 = vld [vmem:[#allocation6 + $0xf8] sm:$0xff]  }
 0x221   :  { %10010 = vmatprep.subr.bf16.mxu0 %v10658_v38  ;;  %v10811_v38 = vld [vmem:[#allocation2 + $0xd24] ss:$8 sps:$4 sm:$0xff]  }
 0x223   :  { %2651 = vmatpush1.bf16.msra.mxu1 %v10547_v39  ;;  %v10659_v39 = vld [vmem:[#allocation6 + $0xb8] sm:$0xff]  }
 0x224   :  { %2652 = vmatprep.subr.bf16.mxu1 %v10555_v40  ;;  %v10660_v40 = vld [vmem:[#allocation6 + $0xf0] sm:$0xff]   ;;  %10011 = vmatpush3.bf16.msra.mxu0 %v10659_v39 }
 0x225   :  { %10012 = vmatprep.subr.bf16.mxu0 %v10660_v40  ;;  %v10809_v39 = vld [vmem:[#allocation2 + $0xd20] ss:$8 sps:$4 sm:$0xff]  }
 0x227   :  { %2653 = vmatpush2.bf16.msra.mxu1 %v10553_v41 }
 0x228   :  { %2654 = vmatprep.subr.bf16.mxu1 %v10561_v42  ;;  %v10661_v42 = vld [vmem:[#allocation6 + $0xb0] sm:$0xff]  }
 0x229   :  { %10013 = vmatpush3.bf16.msra.mxu0 %v10661_v42  ;;  %v10815_v42 = vld [vmem:[#allocation2 + $0xd10] ss:$8 sps:$4 sm:$0xff]  }
 0x22b   :  { %2655 = vmatpush2.bf16.msra.mxu1 %v10559_v43  ;;  %v10662_v43 = vld [vmem:[#allocation6 + $0xe8] sm:$0xff]  }
 0x22c   :  { %2656 = vmatprep.subr.bf16.mxu1 %v10567_v44  ;;  %v10663_v44 = vld [vmem:[#allocation6 + $0xa8] sm:$0xff]   ;;  %10014 = vmatprep.subr.bf16.mxu0 %v10662_v43 }
 0x22d   :  { %10015 = vmatpush3.bf16.msra.mxu0 %v10663_v44  ;;  %v2627_v44 = vpop.f32.mrf.mxu0 }
 0x22f   :  { %2657 = vmatpush2.bf16.msra.mxu1 %v10565_v45  ;;  %v10664_v45 = vld [vmem:[#allocation6 + $0xe0] sm:$0xff]  }
 0x230   :  { %2658 = vmatprep.subr.bf16.mxu1 %v10573_v46  ;;  %v10665_v46 = vld [vmem:[#allocation6 + $0xa0] sm:$0xff]   ;;  %10016 = vmatprep.subr.bf16.mxu0 %v10664_v45 }
 0x231   :  { %10017 = vmatpush3.bf16.msra.mxu0 %v10665_v46  ;;  %v10823_v45 = vld [vmem:[#allocation2 + $0xd04] ss:$8 sps:$4 sm:$0xff]   ;;  %v10821_v46 = vld [vmem:[#allocation2 + $0xd00] ss:$8 sps:$4 sm:$0xff]  }
 0x233   :  { %2659 = vmatpush2.bf16.msra.mxu1 %v10571_v47  ;;  %v10666_v47 = vld [vmem:[#allocation6 + $0xd8] sm:$0xff]  }
 0x234   :  { %2660 = vmatprep.subr.bf16.mxu1 %v10579_v48  ;;  %v10667_v48 = vld [vmem:[#allocation6 + $0x98] sm:$0xff]   ;;  %10018 = vmatprep.subr.bf16.mxu0 %v10666_v47 }
 0x235   :  { %10019 = vmatpush3.bf16.msra.mxu0 %v10667_v48  ;;  %v2629_v48 = vpop.f32.mrf.mxu0 }
 0x237   :  { %2661 = vmatpush2.bf16.msra.mxu1 %v10577_v49  ;;  %v10668_v49 = vld [vmem:[#allocation6 + $0xd0] sm:$0xff]  }
 0x238   :  { %2662 = vmatprep.subr.bf16.mxu1 %v10585_v50  ;;  %v10669_v50 = vld [vmem:[#allocation6 + $0x90] sm:$0xff]   ;;  %10020 = vmatprep.subr.bf16.mxu0 %v10668_v49 }
 0x239   :  { %10021 = vmatpush3.bf16.msra.mxu0 %v10669_v50  ;;  %v10829_v49 = vld [vmem:[#allocation2 + $0xdf4] ss:$8 sps:$4 sm:$0xff]   ;;  %v10827_v50 = vld [vmem:[#allocation2 + $0xdf0] ss:$8 sps:$4 sm:$0xff]  }
 0x23b   :  { %2663 = vmatpush2.bf16.msra.mxu1 %v10583_v51  ;;  %v10670_v51 = vld [vmem:[#allocation6 + $0xc8] sm:$0xff]  }
 0x23c   :  { %2664 = vmatprep.subr.bf16.mxu1 %v10591_v52  ;;  %v10671_v52 = vld [vmem:[#allocation6 + $0x88] sm:$0xff]   ;;  %10022 = vmatprep.subr.bf16.mxu0 %v10670_v51 }
 0x23d   :  { %10023 = vmatpush3.bf16.msra.mxu0 %v10671_v52  ;;  %v2631_v52 = vpop.f32.mrf.mxu0 }
 0x23f   :  { %2665 = vmatpush2.bf16.msra.mxu1 %v10589_v53  ;;  %v10672_v53 = vld [vmem:[#allocation6 + $0xc0] sm:$0xff]  }
 0x240   :  { %2666 = vmatprep.subr.bf16.mxu1 %v10597_v54  ;;  %v10673_v54 = vld [vmem:[#allocation6 + $0x80] sm:$0xff]   ;;  %10024 = vmatprep.subr.bf16.mxu0 %v10672_v53  ;;  %v1688_v53 = vld [vmem:[#allocation4 + $0x2] sm:$0x3] }
 0x241   :  { %10025 = vmatpush3.bf16.msra.mxu0 %v10673_v54 }
 0x243   :  { %2667 = vmatpush2.bf16.msra.mxu1 %v10595_v55  ;;  %v10676_v55 = vld [vmem:[#allocation2 + $0xa74] ss:$8 sps:$4 sm:$0xff]  }
 0x244   :  { %2722 = vmatprep.subr.bf16.mxu1 %v10606_v56  ;;  %3995 = vmatprep.subr.bf16.mxu0 %v10676_v55  ;;  %v10679_v56 = vld [vmem:[#allocation2 + $0xb74] ss:$8 sps:$4 sm:$0xff]   ;;  %v10835_v55 = vld [vmem:[#allocation2 + $0xde4] ss:$8 sps:$4 sm:$0xff]  }
 0x246   :  { %2669 = vmatmul.mubr.bf16.vlgmr.msra.gmra.mxu1 %v10601_v59  ;;  %v10677_v59 = vld [vmem:[#allocation2 + $0xb70] ss:$8 sps:$4 sm:$0xff]  }
 0x247   :  { %2723 = vmatpush1.bf16.msra.mxu1 %v10604_v60  ;;  %2754 = vmatprep.mubr.bf16.mxu1 %v10657_v61  ;;  %v10685_v60 = vld [vmem:[#allocation2 + $0xb64] ss:$8 sps:$4 sm:$0xff]   ;;  %v10683_v61 = vld [vmem:[#allocation2 + $0xb60] ss:$8 sps:$4 sm:$0xff]  }
 0x248   :  { %2724 = vmatprep.subr.bf16.mxu1 %v10612_v62  ;;  %v10691_v62 = vld [vmem:[#allocation2 + $0xb54] ss:$8 sps:$4 sm:$0xff]  }
 0x24b   :  { %2725 = vmatpush1.bf16.msra.mxu1 %v10610_v63  ;;  %v10689_v63 = vld [vmem:[#allocation2 + $0xb50] ss:$8 sps:$4 sm:$0xff]  }
 0x24c   :  { %2726 = vmatprep.subr.bf16.mxu1 %v10615_v0  ;;  %v10697_v0 = vld [vmem:[#allocation2 + $0xb44] ss:$8 sps:$4 sm:$0xff]  }
 0x24f   :  { %2727 = vmatpush1.bf16.msra.mxu1 %v10613_v1  ;;  %v10695_v1 = vld [vmem:[#allocation2 + $0xb40] ss:$8 sps:$4 sm:$0xff]  }
 0x250   :  { %2728 = vmatprep.subr.bf16.mxu1 %v10618_v2  ;;  %v10703_v2 = vld [vmem:[#allocation2 + $0xb34] ss:$8 sps:$4 sm:$0xff]  }
 0x253   :  { %2729 = vmatpush1.bf16.msra.mxu1 %v10616_v3  ;;  %v10701_v3 = vld [vmem:[#allocation2 + $0xb30] ss:$8 sps:$4 sm:$0xff]  }
 0x254   :  { %2730 = vmatprep.subr.bf16.mxu1 %v10621_v4  ;;  %v10709_v4 = vld [vmem:[#allocation2 + $0xb24] ss:$8 sps:$4 sm:$0xff]  }
 0x257   :  { %2731 = vmatpush1.bf16.msra.mxu1 %v10619_v5  ;;  %v10707_v5 = vld [vmem:[#allocation2 + $0xb20] ss:$8 sps:$4 sm:$0xff]  }
 0x258   :  { %2732 = vmatprep.subr.bf16.mxu1 %v10624_v6  ;;  %v10715_v6 = vld [vmem:[#allocation2 + $0xb14] ss:$8 sps:$4 sm:$0xff]  }
 0x25b   :  { %2733 = vmatpush1.bf16.msra.mxu1 %v10622_v7  ;;  %v10713_v7 = vld [vmem:[#allocation2 + $0xb10] ss:$8 sps:$4 sm:$0xff]  }
 0x25c   :  { %2734 = vmatprep.subr.bf16.mxu1 %v10627_v8  ;;  %v10721_v8 = vld [vmem:[#allocation2 + $0xb04] ss:$8 sps:$4 sm:$0xff]  }
 0x25f   :  { %2735 = vmatpush1.bf16.msra.mxu1 %v10625_v9  ;;  %v10719_v9 = vld [vmem:[#allocation2 + $0xb00] ss:$8 sps:$4 sm:$0xff]  }
 0x260   :  { %2736 = vmatprep.subr.bf16.mxu1 %v10630_v10  ;;  %v10727_v10 = vld [vmem:[#allocation2 + $0xbf4] ss:$8 sps:$4 sm:$0xff]  }
 0x263   :  { %2737 = vmatpush1.bf16.msra.mxu1 %v10628_v11  ;;  %v10725_v11 = vld [vmem:[#allocation2 + $0xbf0] ss:$8 sps:$4 sm:$0xff]  }
 0x264   :  { %2738 = vmatprep.subr.bf16.mxu1 %v10633_v12  ;;  %v10733_v12 = vld [vmem:[#allocation2 + $0xbe4] ss:$8 sps:$4 sm:$0xff]  }
 0x267   :  { %2739 = vmatpush2.bf16.msra.mxu1 %v10631_v13  ;;  %v10731_v13 = vld [vmem:[#allocation2 + $0xbe0] ss:$8 sps:$4 sm:$0xff]  }
 0x268   :  { %2740 = vmatprep.subr.bf16.mxu1 %v10636_v14  ;;  %v10739_v14 = vld [vmem:[#allocation2 + $0xbd4] ss:$8 sps:$4 sm:$0xff]  }
 0x26b   :  { %2741 = vmatpush2.bf16.msra.mxu1 %v10634_v15  ;;  %v10737_v15 = vld [vmem:[#allocation2 + $0xbd0] ss:$8 sps:$4 sm:$0xff]  }
 0x26c   :  { %2742 = vmatprep.subr.bf16.mxu1 %v10639_v16  ;;  %v10745_v16 = vld [vmem:[#allocation2 + $0xbc4] ss:$8 sps:$4 sm:$0xff]  }
 0x26f   :  { %2743 = vmatpush2.bf16.msra.mxu1 %v10637_v17  ;;  %v10743_v17 = vld [vmem:[#allocation2 + $0xbc0] ss:$8 sps:$4 sm:$0xff]  }
 0x270   :  { %2744 = vmatprep.subr.bf16.mxu1 %v10642_v18  ;;  %v10751_v18 = vld [vmem:[#allocation2 + $0xbb4] ss:$8 sps:$4 sm:$0xff]  }
 0x273   :  { %2745 = vmatpush2.bf16.msra.mxu1 %v10640_v19  ;;  %v10749_v19 = vld [vmem:[#allocation2 + $0xbb0] ss:$8 sps:$4 sm:$0xff]  }
 0x274   :  { %2746 = vmatprep.subr.bf16.mxu1 %v10645_v20  ;;  %v10757_v20 = vld [vmem:[#allocation2 + $0xba4] ss:$8 sps:$4 sm:$0xff]  }
 0x277   :  { %2747 = vmatpush2.bf16.msra.mxu1 %v10643_v21  ;;  %v10755_v21 = vld [vmem:[#allocation2 + $0xba0] ss:$8 sps:$4 sm:$0xff]  }
 0x278   :  { %2748 = vmatprep.subr.bf16.mxu1 %v10648_v22  ;;  %v10763_v22 = vld [vmem:[#allocation2 + $0xb94] ss:$8 sps:$4 sm:$0xff]  }
 0x27b   :  { %2749 = vmatpush2.bf16.msra.mxu1 %v10646_v23  ;;  %v10761_v23 = vld [vmem:[#allocation2 + $0xb90] ss:$8 sps:$4 sm:$0xff]  }
 0x27c   :  { %2750 = vmatprep.subr.bf16.mxu1 %v10651_v24  ;;  %v10769_v24 = vld [vmem:[#allocation2 + $0xb84] ss:$8 sps:$4 sm:$0xff]  }
 0x27f   :  { %2751 = vmatpush2.bf16.msra.mxu1 %v10649_v25  ;;  %v10767_v25 = vld [vmem:[#allocation2 + $0xb80] ss:$8 sps:$4 sm:$0xff]  }
 0x280   :  { %2752 = vmatprep.subr.bf16.mxu1 %v10654_v26  ;;  %v10778_v26 = vld [vmem:[%s12112_s0 + $0xac] ss:$40 sps:$4 sm:$0xff]  }
 0x283   :  { %2753 = vmatpush2.bf16.msra.mxu1 %v10652_v27  ;;  %v10776_v27 = vld [vmem:[%s12112_s0 + $0xa8] ss:$40 sps:$4 sm:$0xff]  }
 0x284   :  { %4038 = vmatprep.subr.bf16.mxu1 %v10679_v56  ;;  %v10833_v56 = vld [vmem:[#allocation2 + $0xde0] ss:$8 sps:$4 sm:$0xff]  }
 0x286   :  { %2755 = vmatmul.mubr.bf16.vlgmr.msra.gmra.mxu1 %v10655_v28  ;;  %v10004_v29 = vpop.f32.mrf.mxu1  ;;  %v10781_v28 = vld [vmem:[#allocation2 + $0xd74] ss:$8 sps:$4 sm:$0xff]  }
 0x287   :  { %4039 = vmatpush1.bf16.msra.mxu1 %v10677_v59  ;;  %4070 = vmatprep.mubr.bf16.mxu1 %v10778_v26  ;;  %v2633_v59 = vpop.f32.mrf.mxu0 }
 0x288   :  { %v10005_v30 = vpop.f32.mrf.mxu1  ;;  %4040 = vmatprep.subr.bf16.mxu1 %v10685_v60  ;;  %v1697_v60 = vrot.slane %v1688_v53, %v11934_v57 }
 0x289   :  { %v10006_v32 = vadd.f32 %v10005_v30, %v10004_v29  ;;  %v10779_v29 = vld [vmem:[#allocation2 + $0xd70] ss:$8 sps:$4 sm:$0xff]   ;;  %v10787_v30 = vld [vmem:[#allocation2 + $0xd64] ss:$8 sps:$4 sm:$0xff]  }
 0x28a   :  { %v10007_v31 = vpop.f32.mrf.mxu1 }
 0x28b   :  { %v1499_v36 = vadd.f32 %v10006_v32, %v8917_v33  ;;  %4041 = vmatpush1.bf16.msra.mxu1 %v10683_v61  ;;  %v10793_v32 = vld [vmem:[#allocation2 + $0xd54] ss:$8 sps:$4 sm:$0xff]   ;;  %v1693_v61 = vrot.slane %v1688_v53, %v11936_v58 }
 0x28c   :  { %v10008_v34 = vpop.f32.mrf.mxu1  ;;  %4042 = vmatprep.subr.bf16.mxu1 %v10691_v62  ;;  %v10688_v53 = vld [vmem:[#allocation2 + $0xa54] ss:$8 sps:$4 sm:$0xff]  }
 0x28d   :  { %v10009_v35 = vadd.f32 %v10008_v34, %v10007_v31  ;;  %v10785_v31 = vld [vmem:[#allocation2 + $0xd60] ss:$8 sps:$4 sm:$0xff]   ;;  %v10799_v34 = vld [vmem:[#allocation2 + $0xd44] ss:$8 sps:$4 sm:$0xff]  }
 0x28f   :  { %v1502_v37 = vadd.f32 %v10009_v35, %v8917_v33  ;;  %4043 = vmatpush1.bf16.msra.mxu1 %v10689_v63  ;;  %v10791_v33 = vld [vmem:[#allocation2 + $0xd50] ss:$8 sps:$4 sm:$0xff]   ;;  %v10797_v35 = vld [vmem:[#allocation2 + $0xd40] ss:$8 sps:$4 sm:$0xff]   ;;  %v2713_v63 = vpop.f32.mrf.mxu0 }
 0x290   :  { %4044 = vmatprep.subr.bf16.mxu1 %v10697_v0  ;;  %v10841_v0 = vld [vmem:[#allocation2 + $0xdd4] ss:$8 sps:$4 sm:$0xff]  }
 0x291   :  { %v9956_v41 = vpack.c.bf16 %v1502_v37, %v1499_v36  ;;  %v10805_v36 = vld [vmem:[#allocation2 + $0xd34] ss:$8 sps:$4 sm:$0xff]   ;;  %v10803_v37 = vld [vmem:[#allocation2 + $0xd30] ss:$8 sps:$4 sm:$0xff]  }
 0x293   :  { %9957 = vst [vmem:[%s12117_s5] sm:$0xff] %v9956_v41   ;;  %4045 = vmatpush1.bf16.msra.mxu1 %v10695_v1  ;;  %v10817_v41 = vld [vmem:[#allocation2 + $0xd14] ss:$8 sps:$4 sm:$0xff]   ;;  %v10839_v1 = vld [vmem:[#allocation2 + $0xdd0] ss:$8 sps:$4 sm:$0xff]  }
 0x294   :  { %4046 = vmatprep.subr.bf16.mxu1 %v10703_v2 }
 0x297   :  { %4047 = vmatpush1.bf16.msra.mxu1 %v10701_v3 }
 0x298   :  { %4048 = vmatprep.subr.bf16.mxu1 %v10709_v4 }
 0x29b   :  { %4049 = vmatpush1.bf16.msra.mxu1 %v10707_v5 }
 0x29c   :  { %4050 = vmatprep.subr.bf16.mxu1 %v10715_v6  ;;  %v2715_v6 = vpop.f32.mrf.mxu0 }
 0x29f   :  { %4051 = vmatpush1.bf16.msra.mxu1 %v10713_v7  ;;  %v10847_v7 = vld [vmem:[#allocation2 + $0xdc4] ss:$8 sps:$4 sm:$0xff]  }
 0x2a0   :  { %4052 = vmatprep.subr.bf16.mxu1 %v10721_v8 }
 0x2a3   :  { %4053 = vmatpush1.bf16.msra.mxu1 %v10719_v9  ;;  %v10845_v9 = vld [vmem:[#allocation2 + $0xdc0] ss:$8 sps:$4 sm:$0xff]  }
 0x2a4   :  { %4054 = vmatprep.subr.bf16.mxu1 %v10727_v10 }
 0x2a7   :  { %4055 = vmatpush2.bf16.msra.mxu1 %v10725_v11 }
 0x2a8   :  { %4056 = vmatprep.subr.bf16.mxu1 %v10733_v12 }
 0x2ab   :  { %4057 = vmatpush2.bf16.msra.mxu1 %v10731_v13 }
 0x2ac   :  { %4058 = vmatprep.subr.bf16.mxu1 %v10739_v14  ;;  %v2717_v14 = vpop.f32.mrf.mxu0 }
 0x2af   :  { %4059 = vmatpush2.bf16.msra.mxu1 %v10737_v15  ;;  %v10853_v15 = vld [vmem:[#allocation2 + $0xdb4] ss:$8 sps:$4 sm:$0xff]  }
 0x2b0   :  { %4060 = vmatprep.subr.bf16.mxu1 %v10745_v16 }
 0x2b3   :  { %4061 = vmatpush2.bf16.msra.mxu1 %v10743_v17 }
 0x2b4   :  { %4062 = vmatprep.subr.bf16.mxu1 %v10751_v18 }
 0x2b7   :  { %4063 = vmatpush2.bf16.msra.mxu1 %v10749_v19  ;;  %v10851_v19 = vld [vmem:[#allocation2 + $0xdb0] ss:$8 sps:$4 sm:$0xff]  }
 0x2b8   :  { %4064 = vmatprep.subr.bf16.mxu1 %v10757_v20 }
 0x2bb   :  { %4065 = vmatpush2.bf16.msra.mxu1 %v10755_v21 }
 0x2bc   :  { %4066 = vmatprep.subr.bf16.mxu1 %v10763_v22 }
 0x2bf   :  { %4067 = vmatpush2.bf16.msra.mxu1 %v10761_v23  ;;  %v2719_v23 = vpop.f32.mrf.mxu0 }
 0x2c0   :  { %4068 = vmatprep.subr.bf16.mxu1 %v10769_v24 }
 0x2c3   :  { %4069 = vmatpush2.bf16.msra.mxu1 %v10767_v25  ;;  %v10859_v25 = vld [vmem:[#allocation2 + $0xda4] ss:$8 sps:$4 sm:$0xff]  }
 0x2c4   :  { %4124 = vmatprep.subr.bf16.mxu1 %v10781_v28  ;;  %v10857_v28 = vld [vmem:[#allocation2 + $0xda0] ss:$8 sps:$4 sm:$0xff]  }
 0x2c6   :  { %4071 = vmatmul.mubr.bf16.vlgmr.msra.gmra.mxu1 %v10776_v27  ;;  %v2584_v40 = vpop.f32.mrf.mxu1 }
 0x2c7   :  { %4125 = vmatpush1.bf16.msra.mxu1 %v10779_v29  ;;  %v2585_v4 = vadd.f32 %v2584_v40, %v1693_v61 }
 0x2c8   :  { %4126 = vmatprep.subr.bf16.mxu1 %v10787_v30  ;;  %v2586_v43 = vpop.f32.mrf.mxu1 }
 0x2c9   :  { %v2587_v2 = vadd.f32 %v2586_v43, %v1697_v60  ;;  %v2628_v12 = vadd.f32 %v2627_v44, %v2585_v4  ;;  %v10871_v43 = vld [vmem:[#allocation2 + $0xd84] ss:$8 sps:$4 sm:$0xff]   ;;  %v10722_v4 = vld [vmem:[#allocation2 + $0xaf0] ss:$8 sps:$4 sm:$0xff]  }
 0x2ca   :  { %v2588_v47 = vpop.f32.mrf.mxu1 }
 0x2cb   :  { %4127 = vmatpush1.bf16.msra.mxu1 %v10785_v31  ;;  %v2589_v3 = vadd.f32 %v2588_v47, %v1693_v61  ;;  %v2630_v10 = vadd.f32 %v2629_v48, %v2587_v2  ;;  %v10869_v47 = vld [vmem:[#allocation2 + $0xd80] ss:$8 sps:$4 sm:$0xff]   ;;  %v10706_v61 = vld [vmem:[#allocation2 + $0xa24] ss:$8 sps:$4 sm:$0xff]  }
 0x2cc   :  { %4128 = vmatprep.subr.bf16.mxu1 %v10793_v32  ;;  %v2590_v51 = vpop.f32.mrf.mxu1  ;;  %v10716_v2 = vld [vmem:[#allocation2 + $0xa00] ss:$8 sps:$4 sm:$0xff]  }
 0x2cd   :  { %v2591_v8 = vadd.f32 %v2590_v51, %v1697_v60  ;;  %v2632_v11 = vadd.f32 %v2631_v52, %v2589_v3  ;;  %v10878_v51 = vld [vmem:[%s12112_s0 + $0xb8] ss:$40 sps:$4 sm:$0xff]   ;;  %v10724_v3 = vld [vmem:[#allocation2 + $0xaf4] ss:$8 sps:$4 sm:$0xff]  }
 0x2ce   :  { %v10680_v52 = vld [vmem:[#allocation2 + $0xa60] ss:$8 sps:$4 sm:$0xff]   ;;  %v10698_v60 = vld [vmem:[#allocation2 + $0xa30] ss:$8 sps:$4 sm:$0xff]  }
 0x2cf   :  { %4129 = vmatpush1.bf16.msra.mxu1 %v10791_v33  ;;  %v2634_v16 = vadd.f32 %v2633_v59, %v2591_v8  ;;  %v10700_v59 = vld [vmem:[#allocation2 + $0xa34] ss:$8 sps:$4 sm:$0xff]   ;;  %v10734_v8 = vld [vmem:[#allocation2 + $0xad0] ss:$8 sps:$4 sm:$0xff]  }
 0x2d0   :  { %4130 = vmatprep.subr.bf16.mxu1 %v10799_v34 }
 0x2d3   :  { %4131 = vmatpush1.bf16.msra.mxu1 %v10797_v35 }
 0x2d4   :  { %4132 = vmatprep.subr.bf16.mxu1 %v10805_v36  ;;  %v10865_v36 = vld [vmem:[#allocation2 + $0xd94] ss:$8 sps:$4 sm:$0xff]  }
 0x2d7   :  { %4133 = vmatpush1.bf16.msra.mxu1 %v10803_v37 }
 0x2d8   :  { %4134 = vmatprep.subr.bf16.mxu1 %v10811_v38  ;;  %v10863_v38 = vld [vmem:[#allocation2 + $0xd90] ss:$8 sps:$4 sm:$0xff]  }
 0x2db   :  { %4135 = vmatpush1.bf16.msra.mxu1 %v10809_v39 }
 0x2dc   :  { %4136 = vmatprep.subr.bf16.mxu1 %v10817_v41 }
 0x2df   :  { %4137 = vmatpush1.bf16.msra.mxu1 %v10815_v42 }
 0x2e0   :  { %4138 = vmatprep.subr.bf16.mxu1 %v10823_v45  ;;  %v10674_v45 = vld [vmem:[#allocation2 + $0xa70] ss:$8 sps:$4 sm:$0xff]  }
 0x2e3   :  { %4139 = vmatpush1.bf16.msra.mxu1 %v10821_v46  ;;  %v10772_v46 = vld [vmem:[%s12112_s0 + $0xa4] ss:$40 sps:$4 sm:$0xff]  }
 0x2e4   :  { %4140 = vmatprep.subr.bf16.mxu1 %v10829_v49  ;;  %v10682_v49 = vld [vmem:[#allocation2 + $0xa64] ss:$8 sps:$4 sm:$0xff]  }
 0x2e7   :  { %4141 = vmatpush2.bf16.msra.mxu1 %v10827_v50  ;;  %v10880_v50 = vld [vmem:[%s12112_s0 + $0xbc] ss:$40 sps:$4 sm:$0xff]  }
 0x2e8   :  { %4142 = vmatprep.subr.bf16.mxu1 %v10835_v55  ;;  %4156 = vmatprep.mubr.bf16.mxu1 %v10880_v50  ;;  %v10694_v55 = vld [vmem:[#allocation2 + $0xa44] ss:$8 sps:$4 sm:$0xff]   ;;  %v10860_v50 = vld [vmem:[#allocation2 + $0xc90] ss:$8 sps:$4 sm:$0xff]  }
 0x2eb   :  { %4143 = vmatpush2.bf16.msra.mxu1 %v10833_v56  ;;  %v10692_v56 = vld [vmem:[#allocation2 + $0xa40] ss:$8 sps:$4 sm:$0xff]  }
 0x2ec   :  { %4144 = vmatprep.subr.bf16.mxu1 %v10841_v0  ;;  %v10710_v0 = vld [vmem:[#allocation2 + $0xa10] ss:$8 sps:$4 sm:$0xff]  }
 0x2ef   :  { %4145 = vmatpush2.bf16.msra.mxu1 %v10839_v1  ;;  %v10718_v1 = vld [vmem:[#allocation2 + $0xa04] ss:$8 sps:$4 sm:$0xff]  }
 0x2f0   :  { %4146 = vmatprep.subr.bf16.mxu1 %v10847_v7  ;;  %v10736_v7 = vld [vmem:[#allocation2 + $0xad4] ss:$8 sps:$4 sm:$0xff]  }
 0x2f3   :  { %4147 = vmatpush2.bf16.msra.mxu1 %v10845_v9  ;;  %v10742_v9 = vld [vmem:[#allocation2 + $0xac4] ss:$8 sps:$4 sm:$0xff]  }
 0x2f4   :  { %4148 = vmatprep.subr.bf16.mxu1 %v10853_v15  ;;  %v10760_v15 = vld [vmem:[#allocation2 + $0xa94] ss:$8 sps:$4 sm:$0xff]  }
 0x2f7   :  { %4149 = vmatpush2.bf16.msra.mxu1 %v10851_v19  ;;  %v10775_v19 = vld [vmem:[#allocation2 + $0xc74] ss:$8 sps:$4 sm:$0xff]  }
 0x2f8   :  { %4150 = vmatprep.subr.bf16.mxu1 %v10859_v25  ;;  %v10790_v25 = vld [vmem:[#allocation2 + $0xc54] ss:$8 sps:$4 sm:$0xff]  }
 0x2fb   :  { %4151 = vmatpush2.bf16.msra.mxu1 %v10857_v28  ;;  %v10794_v28 = vld [vmem:[#allocation2 + $0xc40] ss:$8 sps:$4 sm:$0xff]  }
 0x2fc   :  { %4152 = vmatprep.subr.bf16.mxu1 %v10865_v36  ;;  %v10818_v36 = vld [vmem:[#allocation2 + $0xc00] ss:$8 sps:$4 sm:$0xff]  }
 0x2ff   :  { %4153 = vmatpush2.bf16.msra.mxu1 %v10863_v38  ;;  %v10824_v38 = vld [vmem:[#allocation2 + $0xcf0] ss:$8 sps:$4 sm:$0xff]  }
 0x300   :  { %4154 = vmatprep.subr.bf16.mxu1 %v10871_v43  ;;  %v10844_v43 = vld [vmem:[#allocation2 + $0xcc4] ss:$8 sps:$4 sm:$0xff]  }
 0x303   :  { %4155 = vmatpush2.bf16.msra.mxu1 %v10869_v47  ;;  %v10856_v47 = vld [vmem:[#allocation2 + $0xca4] ss:$8 sps:$4 sm:$0xff]  }
 0x306   :  { %v2670_v54 = vpop.f32.mrf.mxu1  ;;  %4157 = vmatmul.mubr.bf16.vlgmr.msra.gmra.mxu1 %v10878_v51  ;;  %v10868_v51 = vld [vmem:[#allocation2 + $0xc84] ss:$8 sps:$4 sm:$0xff]  }
 0x307   :  { %v2671_v20 = vadd.f32 %v2670_v54, %v2628_v12  ;;  %v10686_v54 = vld [vmem:[#allocation2 + $0xa50] ss:$8 sps:$4 sm:$0xff]  }
 0x308   :  { %v2672_v62 = vpop.f32.mrf.mxu1  ;;  %v10746_v12 = vld [vmem:[#allocation2 + $0xab0] ss:$8 sps:$4 sm:$0xff]  }
 0x309   :  { %v2673_v17 = vadd.f32 %v2672_v62, %v2630_v10  ;;  %v2714_v29 = vadd.f32 %v2713_v63, %v2671_v20  ;;  %v10704_v62 = vld [vmem:[#allocation2 + $0xa20] ss:$8 sps:$4 sm:$0xff]   ;;  %v10712_v63 = vld [vmem:[#allocation2 + $0xa14] ss:$8 sps:$4 sm:$0xff]  }
 0x30a   :  { %v2674_v5 = vpop.f32.mrf.mxu1  ;;  %v10740_v10 = vld [vmem:[#allocation2 + $0xac0] ss:$8 sps:$4 sm:$0xff]  }
 0x30b   :  { %v2675_v18 = vadd.f32 %v2674_v5, %v2632_v11  ;;  %v2716_v26 = vadd.f32 %v2715_v6, %v2673_v17  ;;  %v10730_v5 = vld [vmem:[#allocation2 + $0xae4] ss:$8 sps:$4 sm:$0xff]   ;;  %v10728_v6 = vld [vmem:[#allocation2 + $0xae0] ss:$8 sps:$4 sm:$0xff]   ;;  %v10748_v11 = vld [vmem:[#allocation2 + $0xab4] ss:$8 sps:$4 sm:$0xff]  }
 0x30c   :  { %v2676_v13 = vpop.f32.mrf.mxu1  ;;  %v10766_v17 = vld [vmem:[#allocation2 + $0xa84] ss:$8 sps:$4 sm:$0xff]   ;;  %v10770_v20 = vld [vmem:[%s12112_s0 + $0xa0] ss:$40 sps:$4 sm:$0xff]  }
 0x30d   :  { %v2677_v22 = vadd.f32 %v2676_v13, %v2634_v16  ;;  %v2718_v27 = vadd.f32 %v2717_v14, %v2675_v18  ;;  %v10754_v13 = vld [vmem:[#allocation2 + $0xaa4] ss:$8 sps:$4 sm:$0xff]   ;;  %v10752_v14 = vld [vmem:[#allocation2 + $0xaa0] ss:$8 sps:$4 sm:$0xff]   ;;  %v10758_v16 = vld [vmem:[#allocation2 + $0xa90] ss:$8 sps:$4 sm:$0xff]  }
 0x30e   :  { %v10764_v18 = vld [vmem:[#allocation2 + $0xa80] ss:$8 sps:$4 sm:$0xff]  }
 0x30f   :  { %v2720_v31 = vadd.f32 %v2719_v23, %v2677_v22  ;;  %v10874_v22 = vld [vmem:[%s12112_s0 + $0xb4] ss:$40 sps:$4 sm:$0xff]   ;;  %v10784_v23 = vld [vmem:[#allocation2 + $0xc64] ss:$8 sps:$4 sm:$0xff]  }
 0x346   :  { %v2756_v21 = vpop.f32.mrf.mxu1 }
 0x347   :  { %v2757_v34 = vadd.f32 %v2756_v21, %v2714_v29  ;;  %v10773_v21 = vld [vmem:[#allocation2 + $0xc70] ss:$8 sps:$4 sm:$0xff]   ;;  %v10802_v29 = vld [vmem:[#allocation2 + $0xc34] ss:$8 sps:$4 sm:$0xff]  }
 0x348   :  { %v2758_v24 = vpop.f32.mrf.mxu1 }
 0x349   :  { %v2759_v32 = vadd.f32 %v2758_v24, %v2716_v26  ;;  %v2765_v42 = vmax.f32 %v2757_v34, 0.0  ;;  %v10782_v24 = vld [vmem:[#allocation2 + $0xc60] ss:$8 sps:$4 sm:$0xff]   ;;  %v10788_v26 = vld [vmem:[#allocation2 + $0xc50] ss:$8 sps:$4 sm:$0xff]  }
 0x34a   :  { %v2760_v30 = vpop.f32.mrf.mxu1  ;;  %v10812_v34 = vld [vmem:[#allocation2 + $0xc10] ss:$8 sps:$4 sm:$0xff]  }
 0x34b   :  { %v2761_v33 = vadd.f32 %v2760_v30, %v2718_v27  ;;  %v2766_v40 = vmax.f32 %v2759_v32, 0.0  ;;  %v10796_v27 = vld [vmem:[#allocation2 + $0xc44] ss:$8 sps:$4 sm:$0xff]   ;;  %v10800_v30 = vld [vmem:[#allocation2 + $0xc30] ss:$8 sps:$4 sm:$0xff]  }
 0x34c   :  { %v2762_v35 = vpop.f32.mrf.mxu1  ;;  %v10806_v32 = vld [vmem:[#allocation2 + $0xc20] ss:$8 sps:$4 sm:$0xff]  }
 0x34d   :  { %v2763_v37 = vadd.f32 %v2762_v35, %v2720_v31  ;;  %v2767_v39 = vmax.f32 %v2761_v33, 0.0  ;;  %v10808_v31 = vld [vmem:[#allocation2 + $0xc24] ss:$8 sps:$4 sm:$0xff]   ;;  %v10814_v33 = vld [vmem:[#allocation2 + $0xc14] ss:$8 sps:$4 sm:$0xff]  }
 0x34e   :  { %v10820_v35 = vld [vmem:[#allocation2 + $0xc04] ss:$8 sps:$4 sm:$0xff]  }
 0x34f   :  { %v2768_v41 = vmax.f32 %v2763_v37, 0.0  ;;  %v2769_v48 = vpack.c.bf16 %v2767_v39, %v2765_v42  ;;  %v10826_v37 = vld [vmem:[#allocation2 + $0xcf4] ss:$8 sps:$4 sm:$0xff]   ;;  %v10832_v39 = vld [vmem:[#allocation2 + $0xce4] ss:$8 sps:$4 sm:$0xff]  }
 0x350   :  { %v10836_v42 = vld [vmem:[#allocation2 + $0xcd0] ss:$8 sps:$4 sm:$0xff]  }
 0x351   :  { %v2770_v44 = vpack.c.bf16 %v2768_v41, %v2766_v40  ;;  %v10830_v40 = vld [vmem:[#allocation2 + $0xce0] ss:$8 sps:$4 sm:$0xff]   ;;  %v10838_v41 = vld [vmem:[#allocation2 + $0xcd4] ss:$8 sps:$4 sm:$0xff]  }
 0x353   :  { %2940 = vmatprep.mubr.bf16.mxu0 %v2770_v44  ;;  %v10842_v44 = vld [vmem:[#allocation2 + $0xcc0] ss:$8 sps:$4 sm:$0xff]  }
 0x354   :  { %2941 = vmatmul.mubr.bf16.vlgmr.msra.gmra.mxu0 %v2769_v48  ;;  %v10854_v48 = vld [vmem:[#allocation2 + $0xca0] ss:$8 sps:$4 sm:$0xff]  }
 0x355   :  { %3996 = vmatpush1.bf16.msra.mxu0 %v10674_v45  ;;  %4027 = vmatprep.mubr.bf16.mxu0 %v10772_v46  ;;  %v10850_v45 = vld [vmem:[#allocation2 + $0xcb4] ss:$8 sps:$4 sm:$0xff]   ;;  %v10848_v46 = vld [vmem:[#allocation2 + $0xcb0] ss:$8 sps:$4 sm:$0xff]  }
 0x356   :  { %3997 = vmatprep.subr.bf16.mxu0 %v10682_v49  ;;  %v10862_v49 = vld [vmem:[#allocation2 + $0xc94] ss:$8 sps:$4 sm:$0xff]  }
 0x359   :  { %3998 = vmatpush1.bf16.msra.mxu0 %v10680_v52  ;;  %v10866_v52 = vld [vmem:[#allocation2 + $0xc80] ss:$8 sps:$4 sm:$0xff]  }
 0x35a   :  { %3999 = vmatprep.subr.bf16.mxu0 %v10688_v53  ;;  %v10877_v53 = vld [vmem:[#allocation2 + $0xe74] ss:$8 sps:$4 sm:$0xff]  }
 0x35d   :  { %4000 = vmatpush1.bf16.msra.mxu0 %v10686_v54  ;;  %v10872_v54 = vld [vmem:[%s12112_s0 + $0xb0] ss:$40 sps:$4 sm:$0xff]  }
 0x35e   :  { %4001 = vmatprep.subr.bf16.mxu0 %v10694_v55  ;;  %v10875_v55 = vld [vmem:[#allocation2 + $0xe70] ss:$8 sps:$4 sm:$0xff]  }
 0x361   :  { %4002 = vmatpush1.bf16.msra.mxu0 %v10692_v56  ;;  %v10928_v56 = vld [vmem:[%s12112_s0 + $0xc4] ss:$40 sps:$4 sm:$0xff]  }
 0x362   :  { %4003 = vmatprep.subr.bf16.mxu0 %v10700_v59  ;;  %v10883_v59 = vld [vmem:[#allocation2 + $0xe64] ss:$8 sps:$4 sm:$0xff]  }
 0x365   :  { %4004 = vmatpush1.bf16.msra.mxu0 %v10698_v60  ;;  %v10881_v60 = vld [vmem:[#allocation2 + $0xe60] ss:$8 sps:$4 sm:$0xff]  }
 0x366   :  { %4005 = vmatprep.subr.bf16.mxu0 %v10706_v61  ;;  %v10886_v61 = vld [vmem:[#allocation2 + $0xe54] ss:$8 sps:$4 sm:$0xff]  }
 0x369   :  { %4006 = vmatpush1.bf16.msra.mxu0 %v10704_v62  ;;  %v10884_v62 = vld [vmem:[#allocation2 + $0xe50] ss:$8 sps:$4 sm:$0xff]  }
 0x36a   :  { %4007 = vmatprep.subr.bf16.mxu0 %v10712_v63  ;;  %v10889_v63 = vld [vmem:[#allocation2 + $0xe44] ss:$8 sps:$4 sm:$0xff]  }
 0x36d   :  { %4008 = vmatpush1.bf16.msra.mxu0 %v10710_v0  ;;  %v10887_v0 = vld [vmem:[#allocation2 + $0xe40] ss:$8 sps:$4 sm:$0xff]  }
 0x36e   :  { %4009 = vmatprep.subr.bf16.mxu0 %v10718_v1  ;;  %v10892_v1 = vld [vmem:[#allocation2 + $0xe34] ss:$8 sps:$4 sm:$0xff]  }
 0x371   :  { %4010 = vmatpush1.bf16.msra.mxu0 %v10716_v2  ;;  %v10890_v2 = vld [vmem:[#allocation2 + $0xe30] ss:$8 sps:$4 sm:$0xff]  }
 0x372   :  { %4011 = vmatprep.subr.bf16.mxu0 %v10724_v3  ;;  %v10895_v3 = vld [vmem:[#allocation2 + $0xe24] ss:$8 sps:$4 sm:$0xff]  }
 0x375   :  { %4012 = vmatpush2.bf16.msra.mxu0 %v10722_v4  ;;  %v10893_v4 = vld [vmem:[#allocation2 + $0xe20] ss:$8 sps:$4 sm:$0xff]  }
 0x376   :  { %4013 = vmatprep.subr.bf16.mxu0 %v10730_v5  ;;  %v10898_v5 = vld [vmem:[#allocation2 + $0xe14] ss:$8 sps:$4 sm:$0xff]  }
 0x379   :  { %4014 = vmatpush2.bf16.msra.mxu0 %v10728_v6  ;;  %v10896_v6 = vld [vmem:[#allocation2 + $0xe10] ss:$8 sps:$4 sm:$0xff]  }
 0x37a   :  { %4015 = vmatprep.subr.bf16.mxu0 %v10736_v7  ;;  %v10901_v7 = vld [vmem:[#allocation2 + $0xe04] ss:$8 sps:$4 sm:$0xff]  }
 0x37d   :  { %4016 = vmatpush2.bf16.msra.mxu0 %v10734_v8  ;;  %v10899_v8 = vld [vmem:[#allocation2 + $0xe00] ss:$8 sps:$4 sm:$0xff]  }
 0x37e   :  { %4017 = vmatprep.subr.bf16.mxu0 %v10742_v9  ;;  %v10904_v9 = vld [vmem:[#allocation2 + $0xef4] ss:$8 sps:$4 sm:$0xff]  }
 0x381   :  { %4018 = vmatpush2.bf16.msra.mxu0 %v10740_v10  ;;  %v10902_v10 = vld [vmem:[#allocation2 + $0xef0] ss:$8 sps:$4 sm:$0xff]  }
 0x382   :  { %4019 = vmatprep.subr.bf16.mxu0 %v10748_v11  ;;  %v10907_v11 = vld [vmem:[#allocation2 + $0xee4] ss:$8 sps:$4 sm:$0xff]  }
 0x385   :  { %4020 = vmatpush2.bf16.msra.mxu0 %v10746_v12  ;;  %v10905_v12 = vld [vmem:[#allocation2 + $0xee0] ss:$8 sps:$4 sm:$0xff]  }
 0x386   :  { %4021 = vmatprep.subr.bf16.mxu0 %v10754_v13  ;;  %v10910_v13 = vld [vmem:[#allocation2 + $0xed4] ss:$8 sps:$4 sm:$0xff]  }
 0x389   :  { %4022 = vmatpush2.bf16.msra.mxu0 %v10752_v14  ;;  %v10908_v14 = vld [vmem:[#allocation2 + $0xed0] ss:$8 sps:$4 sm:$0xff]  }
 0x38a   :  { %4023 = vmatprep.subr.bf16.mxu0 %v10760_v15  ;;  %v10913_v15 = vld [vmem:[#allocation2 + $0xec4] ss:$8 sps:$4 sm:$0xff]  }
 0x38d   :  { %4024 = vmatpush2.bf16.msra.mxu0 %v10758_v16  ;;  %v10911_v16 = vld [vmem:[#allocation2 + $0xec0] ss:$8 sps:$4 sm:$0xff]  }
 0x38e   :  { %4025 = vmatprep.subr.bf16.mxu0 %v10766_v17  ;;  %v10916_v17 = vld [vmem:[#allocation2 + $0xeb4] ss:$8 sps:$4 sm:$0xff]  }
 0x391   :  { %4026 = vmatpush2.bf16.msra.mxu0 %v10764_v18  ;;  %v10914_v18 = vld [vmem:[#allocation2 + $0xeb0] ss:$8 sps:$4 sm:$0xff]  }
 0x392   :  { %4081 = vmatprep.subr.bf16.mxu0 %v10775_v19  ;;  %v10919_v19 = vld [vmem:[#allocation2 + $0xea4] ss:$8 sps:$4 sm:$0xff]  }
 0x394   :  { %4028 = vmatmul.mubr.bf16.vlgmr.msra.gmra.mxu0 %v10770_v20  ;;  %v10917_v20 = vld [vmem:[#allocation2 + $0xea0] ss:$8 sps:$4 sm:$0xff]  }
 0x395   :  { %4082 = vmatpush1.bf16.msra.mxu0 %v10773_v21  ;;  %4113 = vmatprep.mubr.bf16.mxu0 %v10874_v22  ;;  %v10922_v21 = vld [vmem:[#allocation2 + $0xe94] ss:$8 sps:$4 sm:$0xff]   ;;  %v10920_v22 = vld [vmem:[#allocation2 + $0xe90] ss:$8 sps:$4 sm:$0xff]  }
 0x396   :  { %4083 = vmatprep.subr.bf16.mxu0 %v10784_v23  ;;  %v10925_v23 = vld [vmem:[#allocation2 + $0xe84] ss:$8 sps:$4 sm:$0xff]  }
 0x399   :  { %4084 = vmatpush1.bf16.msra.mxu0 %v10782_v24  ;;  %v10923_v24 = vld [vmem:[#allocation2 + $0xe80] ss:$8 sps:$4 sm:$0xff]  }
 0x39a   :  { %4085 = vmatprep.subr.bf16.mxu0 %v10790_v25  ;;  %v10926_v25 = vld [vmem:[%s12112_s0 + $0xc0] ss:$40 sps:$4 sm:$0xff]  }
 0x39d   :  { %4086 = vmatpush1.bf16.msra.mxu0 %v10788_v26 }
 0x39e   :  { %4087 = vmatprep.subr.bf16.mxu0 %v10796_v27 }
 0x3a1   :  { %4088 = vmatpush1.bf16.msra.mxu0 %v10794_v28 }
 0x3a2   :  { %4089 = vmatprep.subr.bf16.mxu0 %v10802_v29 }
 0x3a5   :  { %4090 = vmatpush1.bf16.msra.mxu0 %v10800_v30  ;;  %v9116_v30 = vld [vmem:[#allocation7 + $0x1] ss:$0 sm:$0xff] }
 0x3a6   :  { %4091 = vmatprep.subr.bf16.mxu0 %v10808_v31 }
 0x3a9   :  { %4092 = vmatpush1.bf16.msra.mxu0 %v10806_v32 }
 0x3aa   :  { %4093 = vmatprep.subr.bf16.mxu0 %v10814_v33 }
 0x3ad   :  { %4094 = vmatpush1.bf16.msra.mxu0 %v10812_v34 }
 0x3ae   :  { %4095 = vmatprep.subr.bf16.mxu0 %v10820_v35  ;;  %v10929_v35 = vld [vmem:[#allocation6 + $0x178] sm:$0xff]  }
 0x3af   :  { %10032 = vmatprep.subr.bf16.mxu1 %v10929_v35  ;;  %v11082_v35 = vld [vmem:[#allocation2 + $0x1224] ss:$8 sps:$4 sm:$0xff]  }
 0x3b1   :  { %4096 = vmatpush1.bf16.msra.mxu0 %v10818_v36  ;;  %v10930_v36 = vld [vmem:[#allocation6 + $0x138] sm:$0xff]  }
 0x3b2   :  { %4097 = vmatprep.subr.bf16.mxu0 %v10826_v37  ;;  %v10931_v37 = vld [vmem:[#allocation6 + $0x170] sm:$0xff]   ;;  %10033 = vmatpush3.bf16.msra.mxu1 %v10930_v36 }
 0x3b3   :  { %10034 = vmatprep.subr.bf16.mxu1 %v10931_v37  ;;  %v11080_v36 = vld [vmem:[#allocation2 + $0x1220] ss:$8 sps:$4 sm:$0xff]  }
 0x3b5   :  { %4098 = vmatpush2.bf16.msra.mxu0 %v10824_v38 }
 0x3b6   :  { %4099 = vmatprep.subr.bf16.mxu0 %v10832_v39  ;;  %v10932_v39 = vld [vmem:[#allocation6 + $0x130] sm:$0xff]  }
 0x3b7   :  { %10035 = vmatpush3.bf16.msra.mxu1 %v10932_v39  ;;  %v11086_v39 = vld [vmem:[#allocation2 + $0x1210] ss:$8 sps:$4 sm:$0xff]  }
 0x3b9   :  { %4100 = vmatpush2.bf16.msra.mxu0 %v10830_v40  ;;  %v10933_v40 = vld [vmem:[#allocation6 + $0x168] sm:$0xff]  }
 0x3ba   :  { %4101 = vmatprep.subr.bf16.mxu0 %v10838_v41  ;;  %v10934_v41 = vld [vmem:[#allocation6 + $0x128] sm:$0xff]   ;;  %10036 = vmatprep.subr.bf16.mxu1 %v10933_v40 }
 0x3bb   :  { %10037 = vmatpush3.bf16.msra.mxu1 %v10934_v41  ;;  %v4072_v41 = vpop.f32.mrf.mxu1 }
 0x3bd   :  { %4102 = vmatpush2.bf16.msra.mxu0 %v10836_v42  ;;  %v10935_v42 = vld [vmem:[#allocation6 + $0x160] sm:$0xff]  }
 0x3be   :  { %4103 = vmatprep.subr.bf16.mxu0 %v10844_v43  ;;  %v10936_v43 = vld [vmem:[#allocation6 + $0x120] sm:$0xff]   ;;  %10038 = vmatprep.subr.bf16.mxu1 %v10935_v42 }
 0x3bf   :  { %10039 = vmatpush3.bf16.msra.mxu1 %v10936_v43  ;;  %v11094_v42 = vld [vmem:[#allocation2 + $0x1204] ss:$8 sps:$4 sm:$0xff]   ;;  %v11092_v43 = vld [vmem:[#allocation2 + $0x1200] ss:$8 sps:$4 sm:$0xff]  }
 0x3c1   :  { %4104 = vmatpush2.bf16.msra.mxu0 %v10842_v44  ;;  %v10937_v44 = vld [vmem:[#allocation6 + $0x158] sm:$0xff]  }
 0x3c2   :  { %4105 = vmatprep.subr.bf16.mxu0 %v10850_v45  ;;  %v10938_v45 = vld [vmem:[#allocation6 + $0x118] sm:$0xff]   ;;  %10040 = vmatprep.subr.bf16.mxu1 %v10937_v44 }
 0x3c3   :  { %10041 = vmatpush3.bf16.msra.mxu1 %v10938_v45  ;;  %v4074_v45 = vpop.f32.mrf.mxu1 }
 0x3c5   :  { %4106 = vmatpush2.bf16.msra.mxu0 %v10848_v46  ;;  %v10939_v46 = vld [vmem:[#allocation6 + $0x150] sm:$0xff]  }
 0x3c6   :  { %4107 = vmatprep.subr.bf16.mxu0 %v10856_v47  ;;  %v10940_v47 = vld [vmem:[#allocation6 + $0x110] sm:$0xff]   ;;  %10042 = vmatprep.subr.bf16.mxu1 %v10939_v46 }
 0x3c7   :  { %10043 = vmatpush3.bf16.msra.mxu1 %v10940_v47  ;;  %v11100_v46 = vld [vmem:[#allocation2 + $0x12f4] ss:$8 sps:$4 sm:$0xff]   ;;  %v11098_v47 = vld [vmem:[#allocation2 + $0x12f0] ss:$8 sps:$4 sm:$0xff]  }
 0x3c9   :  { %4108 = vmatpush2.bf16.msra.mxu0 %v10854_v48  ;;  %v10941_v48 = vld [vmem:[#allocation6 + $0x148] sm:$0xff]  }
 0x3ca   :  { %4109 = vmatprep.subr.bf16.mxu0 %v10862_v49  ;;  %v10942_v49 = vld [vmem:[#allocation6 + $0x108] sm:$0xff]   ;;  %10044 = vmatprep.subr.bf16.mxu1 %v10941_v48 }
 0x3cb   :  { %10045 = vmatpush3.bf16.msra.mxu1 %v10942_v49  ;;  %v4076_v49 = vpop.f32.mrf.mxu1 }
 0x3cd   :  { %4110 = vmatpush2.bf16.msra.mxu0 %v10860_v50  ;;  %v10943_v50 = vld [vmem:[#allocation6 + $0x140] sm:$0xff]  }
 0x3ce   :  { %4111 = vmatprep.subr.bf16.mxu0 %v10868_v51  ;;  %v10944_v51 = vld [vmem:[#allocation6 + $0x100] sm:$0xff]   ;;  %10046 = vmatprep.subr.bf16.mxu1 %v10943_v50  ;;  %v3133_v50 = vld [vmem:[#allocation4 + $0x4] sm:$0x3] }
 0x3cf   :  { %10047 = vmatpush3.bf16.msra.mxu1 %v10944_v51 }
 0x3d1   :  { %4112 = vmatpush2.bf16.msra.mxu0 %v10866_v52  ;;  %v10947_v52 = vld [vmem:[#allocation2 + $0xf74] ss:$8 sps:$4 sm:$0xff]  }
 0x3d2   :  { %4167 = vmatprep.subr.bf16.mxu0 %v10877_v53  ;;  %5440 = vmatprep.subr.bf16.mxu1 %v10947_v52  ;;  %v10950_v53 = vld [vmem:[#allocation2 + $0x1074] ss:$8 sps:$4 sm:$0xff]   ;;  %v11106_v52 = vld [vmem:[#allocation2 + $0x12e4] ss:$8 sps:$4 sm:$0xff]  }
 0x3d4   :  { %4114 = vmatmul.mubr.bf16.vlgmr.msra.gmra.mxu0 %v10872_v54  ;;  %v10948_v54 = vld [vmem:[#allocation2 + $0x1070] ss:$8 sps:$4 sm:$0xff]  }
 0x3d5   :  { %4168 = vmatpush1.bf16.msra.mxu0 %v10875_v55  ;;  %4199 = vmatprep.mubr.bf16.mxu0 %v10928_v56  ;;  %v10956_v55 = vld [vmem:[#allocation2 + $0x1064] ss:$8 sps:$4 sm:$0xff]   ;;  %v10954_v56 = vld [vmem:[#allocation2 + $0x1060] ss:$8 sps:$4 sm:$0xff]  }
 0x3d6   :  { %4169 = vmatprep.subr.bf16.mxu0 %v10883_v59  ;;  %v10962_v59 = vld [vmem:[#allocation2 + $0x1054] ss:$8 sps:$4 sm:$0xff]  }
 0x3d9   :  { %4170 = vmatpush1.bf16.msra.mxu0 %v10881_v60  ;;  %v10960_v60 = vld [vmem:[#allocation2 + $0x1050] ss:$8 sps:$4 sm:$0xff]  }
 0x3da   :  { %4171 = vmatprep.subr.bf16.mxu0 %v10886_v61  ;;  %v10968_v61 = vld [vmem:[#allocation2 + $0x1044] ss:$8 sps:$4 sm:$0xff]  }
 0x3dd   :  { %4172 = vmatpush1.bf16.msra.mxu0 %v10884_v62  ;;  %v10966_v62 = vld [vmem:[#allocation2 + $0x1040] ss:$8 sps:$4 sm:$0xff]  }
 0x3de   :  { %4173 = vmatprep.subr.bf16.mxu0 %v10889_v63  ;;  %v10974_v63 = vld [vmem:[#allocation2 + $0x1034] ss:$8 sps:$4 sm:$0xff]  }
 0x3e1   :  { %4174 = vmatpush1.bf16.msra.mxu0 %v10887_v0  ;;  %v10972_v0 = vld [vmem:[#allocation2 + $0x1030] ss:$8 sps:$4 sm:$0xff]  }
 0x3e2   :  { %4175 = vmatprep.subr.bf16.mxu0 %v10892_v1  ;;  %v10980_v1 = vld [vmem:[#allocation2 + $0x1024] ss:$8 sps:$4 sm:$0xff]  }
 0x3e5   :  { %4176 = vmatpush1.bf16.msra.mxu0 %v10890_v2  ;;  %v10978_v2 = vld [vmem:[#allocation2 + $0x1020] ss:$8 sps:$4 sm:$0xff]  }
 0x3e6   :  { %4177 = vmatprep.subr.bf16.mxu0 %v10895_v3  ;;  %v10986_v3 = vld [vmem:[#allocation2 + $0x1014] ss:$8 sps:$4 sm:$0xff]  }
 0x3e9   :  { %4178 = vmatpush1.bf16.msra.mxu0 %v10893_v4  ;;  %v10984_v4 = vld [vmem:[#allocation2 + $0x1010] ss:$8 sps:$4 sm:$0xff]  }
 0x3ea   :  { %4179 = vmatprep.subr.bf16.mxu0 %v10898_v5  ;;  %v10992_v5 = vld [vmem:[#allocation2 + $0x1004] ss:$8 sps:$4 sm:$0xff]  }
 0x3ed   :  { %4180 = vmatpush1.bf16.msra.mxu0 %v10896_v6  ;;  %v10990_v6 = vld [vmem:[#allocation2 + $0x1000] ss:$8 sps:$4 sm:$0xff]  }
 0x3ee   :  { %4181 = vmatprep.subr.bf16.mxu0 %v10901_v7  ;;  %v10998_v7 = vld [vmem:[#allocation2 + $0x10f4] ss:$8 sps:$4 sm:$0xff]  }
 0x3f1   :  { %4182 = vmatpush1.bf16.msra.mxu0 %v10899_v8  ;;  %v10996_v8 = vld [vmem:[#allocation2 + $0x10f0] ss:$8 sps:$4 sm:$0xff]  }
 0x3f2   :  { %4183 = vmatprep.subr.bf16.mxu0 %v10904_v9  ;;  %v11004_v9 = vld [vmem:[#allocation2 + $0x10e4] ss:$8 sps:$4 sm:$0xff]  }
 0x3f5   :  { %4184 = vmatpush2.bf16.msra.mxu0 %v10902_v10  ;;  %v11002_v10 = vld [vmem:[#allocation2 + $0x10e0] ss:$8 sps:$4 sm:$0xff]  }
 0x3f6   :  { %4185 = vmatprep.subr.bf16.mxu0 %v10907_v11  ;;  %v11010_v11 = vld [vmem:[#allocation2 + $0x10d4] ss:$8 sps:$4 sm:$0xff]  }
 0x3f9   :  { %4186 = vmatpush2.bf16.msra.mxu0 %v10905_v12  ;;  %v11008_v12 = vld [vmem:[#allocation2 + $0x10d0] ss:$8 sps:$4 sm:$0xff]  }
 0x3fa   :  { %4187 = vmatprep.subr.bf16.mxu0 %v10910_v13  ;;  %v11016_v13 = vld [vmem:[#allocation2 + $0x10c4] ss:$8 sps:$4 sm:$0xff]  }
 0x3fd   :  { %4188 = vmatpush2.bf16.msra.mxu0 %v10908_v14  ;;  %v11014_v14 = vld [vmem:[#allocation2 + $0x10c0] ss:$8 sps:$4 sm:$0xff]  }
 0x3fe   :  { %4189 = vmatprep.subr.bf16.mxu0 %v10913_v15  ;;  %v11022_v15 = vld [vmem:[#allocation2 + $0x10b4] ss:$8 sps:$4 sm:$0xff]  }
 0x401   :  { %4190 = vmatpush2.bf16.msra.mxu0 %v10911_v16  ;;  %v11020_v16 = vld [vmem:[#allocation2 + $0x10b0] ss:$8 sps:$4 sm:$0xff]  }
 0x402   :  { %4191 = vmatprep.subr.bf16.mxu0 %v10916_v17  ;;  %v11028_v17 = vld [vmem:[#allocation2 + $0x10a4] ss:$8 sps:$4 sm:$0xff]  }
 0x405   :  { %4192 = vmatpush2.bf16.msra.mxu0 %v10914_v18  ;;  %v11026_v18 = vld [vmem:[#allocation2 + $0x10a0] ss:$8 sps:$4 sm:$0xff]  }
 0x406   :  { %4193 = vmatprep.subr.bf16.mxu0 %v10919_v19  ;;  %v11034_v19 = vld [vmem:[#allocation2 + $0x1094] ss:$8 sps:$4 sm:$0xff]  }
 0x409   :  { %4194 = vmatpush2.bf16.msra.mxu0 %v10917_v20  ;;  %v11032_v20 = vld [vmem:[#allocation2 + $0x1090] ss:$8 sps:$4 sm:$0xff]  }
 0x40a   :  { %4195 = vmatprep.subr.bf16.mxu0 %v10922_v21  ;;  %v11040_v21 = vld [vmem:[#allocation2 + $0x1084] ss:$8 sps:$4 sm:$0xff]  }
 0x40d   :  { %4196 = vmatpush2.bf16.msra.mxu0 %v10920_v22  ;;  %v11038_v22 = vld [vmem:[#allocation2 + $0x1080] ss:$8 sps:$4 sm:$0xff]  }
 0x40e   :  { %4197 = vmatprep.subr.bf16.mxu0 %v10925_v23  ;;  %v11049_v23 = vld [vmem:[%s12112_s0 + $0xfc] ss:$40 sps:$4 sm:$0xff]  }
 0x411   :  { %4198 = vmatpush2.bf16.msra.mxu0 %v10923_v24  ;;  %v11047_v24 = vld [vmem:[%s12112_s0 + $0xf8] ss:$40 sps:$4 sm:$0xff]  }
 0x412   :  { %5483 = vmatprep.subr.bf16.mxu0 %v10950_v53  ;;  %v11104_v53 = vld [vmem:[#allocation2 + $0x12e0] ss:$8 sps:$4 sm:$0xff]  }
 0x414   :  { %4200 = vmatmul.mubr.bf16.vlgmr.msra.gmra.mxu0 %v10926_v25  ;;  %v10026_v26 = vpop.f32.mrf.mxu0  ;;  %v11052_v25 = vld [vmem:[#allocation2 + $0x1274] ss:$8 sps:$4 sm:$0xff]  }
 0x415   :  { %5484 = vmatpush1.bf16.msra.mxu0 %v10948_v54  ;;  %5515 = vmatprep.mubr.bf16.mxu0 %v11049_v23  ;;  %v4078_v54 = vpop.f32.mrf.mxu1 }
 0x416   :  { %v10027_v27 = vpop.f32.mrf.mxu0  ;;  %5485 = vmatprep.subr.bf16.mxu0 %v10956_v55  ;;  %v3142_v55 = vrot.slane %v3133_v50, %v11934_v57 }
 0x417   :  { %v10028_v29 = vadd.f32 %v10027_v27, %v10026_v26  ;;  %v11050_v26 = vld [vmem:[#allocation2 + $0x1270] ss:$8 sps:$4 sm:$0xff]   ;;  %v11058_v27 = vld [vmem:[#allocation2 + $0x1264] ss:$8 sps:$4 sm:$0xff]  }
 0x418   :  { %v10029_v28 = vpop.f32.mrf.mxu0 }
 0x419   :  { %v2943_v33 = vadd.f32 %v10028_v29, %v9116_v30  ;;  %5486 = vmatpush1.bf16.msra.mxu0 %v10954_v56  ;;  %v11064_v29 = vld [vmem:[#allocation2 + $0x1254] ss:$8 sps:$4 sm:$0xff]   ;;  %v3138_v56 = vrot.slane %v3133_v50, %v11936_v58 }
 0x41a   :  { %v10030_v31 = vpop.f32.mrf.mxu0  ;;  %5487 = vmatprep.subr.bf16.mxu0 %v10962_v59  ;;  %v10959_v50 = vld [vmem:[#allocation2 + $0xf54] ss:$8 sps:$4 sm:$0xff]  }
 0x41b   :  { %v10031_v32 = vadd.f32 %v10030_v31, %v10029_v28  ;;  %v11056_v28 = vld [vmem:[#allocation2 + $0x1260] ss:$8 sps:$4 sm:$0xff]   ;;  %v11070_v31 = vld [vmem:[#allocation2 + $0x1244] ss:$8 sps:$4 sm:$0xff]  }
 0x41d   :  { %v2946_v34 = vadd.f32 %v10031_v32, %v9116_v30  ;;  %5488 = vmatpush1.bf16.msra.mxu0 %v10960_v60  ;;  %v11062_v30 = vld [vmem:[#allocation2 + $0x1250] ss:$8 sps:$4 sm:$0xff]   ;;  %v11068_v32 = vld [vmem:[#allocation2 + $0x1240] ss:$8 sps:$4 sm:$0xff]   ;;  %v4158_v60 = vpop.f32.mrf.mxu1 }
 0x41e   :  { %5489 = vmatprep.subr.bf16.mxu0 %v10968_v61  ;;  %v11112_v61 = vld [vmem:[#allocation2 + $0x12d4] ss:$8 sps:$4 sm:$0xff]  }
 0x41f   :  { %v9961_v38 = vpack.c.bf16 %v2946_v34, %v2943_v33  ;;  %v11076_v33 = vld [vmem:[#allocation2 + $0x1234] ss:$8 sps:$4 sm:$0xff]   ;;  %v11074_v34 = vld [vmem:[#allocation2 + $0x1230] ss:$8 sps:$4 sm:$0xff]  }
 0x421   :  { %9983 = vst [vmem:[%s12117_s5 + $0x8] sm:$0xff] %v9961_v38   ;;  %5490 = vmatpush1.bf16.msra.mxu0 %v10966_v62  ;;  %v11088_v38 = vld [vmem:[#allocation2 + $0x1214] ss:$8 sps:$4 sm:$0xff]   ;;  %v11110_v62 = vld [vmem:[#allocation2 + $0x12d0] ss:$8 sps:$4 sm:$0xff]  }
 0x422   :  { %5491 = vmatprep.subr.bf16.mxu0 %v10974_v63 }
 0x425   :  { %5492 = vmatpush1.bf16.msra.mxu0 %v10972_v0 }
 0x426   :  { %5493 = vmatprep.subr.bf16.mxu0 %v10980_v1 }
 0x429   :  { %5494 = vmatpush1.bf16.msra.mxu0 %v10978_v2 }
 0x42a   :  { %5495 = vmatprep.subr.bf16.mxu0 %v10986_v3  ;;  %v4160_v3 = vpop.f32.mrf.mxu1 }
 0x42d   :  { %5496 = vmatpush1.bf16.msra.mxu0 %v10984_v4  ;;  %v11118_v4 = vld [vmem:[#allocation2 + $0x12c4] ss:$8 sps:$4 sm:$0xff]  }
 0x42e   :  { %5497 = vmatprep.subr.bf16.mxu0 %v10992_v5 }
 0x431   :  { %5498 = vmatpush1.bf16.msra.mxu0 %v10990_v6  ;;  %v11116_v6 = vld [vmem:[#allocation2 + $0x12c0] ss:$8 sps:$4 sm:$0xff]  }
 0x432   :  { %5499 = vmatprep.subr.bf16.mxu0 %v10998_v7 }
 0x435   :  { %5500 = vmatpush2.bf16.msra.mxu0 %v10996_v8 }
 0x436   :  { %5501 = vmatprep.subr.bf16.mxu0 %v11004_v9 }
 0x439   :  { %5502 = vmatpush2.bf16.msra.mxu0 %v11002_v10 }
 0x43a   :  { %5503 = vmatprep.subr.bf16.mxu0 %v11010_v11  ;;  %v4162_v11 = vpop.f32.mrf.mxu1 }
 0x43d   :  { %5504 = vmatpush2.bf16.msra.mxu0 %v11008_v12  ;;  %v11124_v12 = vld [vmem:[#allocation2 + $0x12b4] ss:$8 sps:$4 sm:$0xff]  }
 0x43e   :  { %5505 = vmatprep.subr.bf16.mxu0 %v11016_v13 }
 0x441   :  { %5506 = vmatpush2.bf16.msra.mxu0 %v11014_v14 }
 0x442   :  { %5507 = vmatprep.subr.bf16.mxu0 %v11022_v15 }
 0x445   :  { %5508 = vmatpush2.bf16.msra.mxu0 %v11020_v16  ;;  %v11122_v16 = vld [vmem:[#allocation2 + $0x12b0] ss:$8 sps:$4 sm:$0xff]  }
 0x446   :  { %5509 = vmatprep.subr.bf16.mxu0 %v11028_v17 }
 0x449   :  { %5510 = vmatpush2.bf16.msra.mxu0 %v11026_v18 }
 0x44a   :  { %5511 = vmatprep.subr.bf16.mxu0 %v11034_v19 }
 0x44d   :  { %5512 = vmatpush2.bf16.msra.mxu0 %v11032_v20  ;;  %v4164_v20 = vpop.f32.mrf.mxu1 }
 0x44e   :  { %5513 = vmatprep.subr.bf16.mxu0 %v11040_v21 }
 0x451   :  { %5514 = vmatpush2.bf16.msra.mxu0 %v11038_v22  ;;  %v11130_v22 = vld [vmem:[#allocation2 + $0x12a4] ss:$8 sps:$4 sm:$0xff]  }
 0x452   :  { %5569 = vmatprep.subr.bf16.mxu0 %v11052_v25  ;;  %v11128_v25 = vld [vmem:[#allocation2 + $0x12a0] ss:$8 sps:$4 sm:$0xff]  }
 0x454   :  { %5516 = vmatmul.mubr.bf16.vlgmr.msra.gmra.mxu0 %v11047_v24  ;;  %v4029_v37 = vpop.f32.mrf.mxu0 }
 0x455   :  { %5570 = vmatpush1.bf16.msra.mxu0 %v11050_v26  ;;  %v4030_v1 = vadd.f32 %v4029_v37, %v3138_v56 }
 0x456   :  { %5571 = vmatprep.subr.bf16.mxu0 %v11058_v27  ;;  %v4031_v40 = vpop.f32.mrf.mxu0 }
 0x457   :  { %v4032_v63 = vadd.f32 %v4031_v40, %v3142_v55  ;;  %v4073_v9 = vadd.f32 %v4072_v41, %v4030_v1  ;;  %v11142_v40 = vld [vmem:[#allocation2 + $0x1284] ss:$8 sps:$4 sm:$0xff]   ;;  %v10993_v1 = vld [vmem:[#allocation2 + $0xff0] ss:$8 sps:$4 sm:$0xff]  }
 0x458   :  { %v4033_v44 = vpop.f32.mrf.mxu0 }
 0x459   :  { %5572 = vmatpush1.bf16.msra.mxu0 %v11056_v28  ;;  %v4034_v0 = vadd.f32 %v4033_v44, %v3138_v56  ;;  %v4075_v7 = vadd.f32 %v4074_v45, %v4032_v63  ;;  %v11140_v44 = vld [vmem:[#allocation2 + $0x1280] ss:$8 sps:$4 sm:$0xff]   ;;  %v10977_v56 = vld [vmem:[#allocation2 + $0xf24] ss:$8 sps:$4 sm:$0xff]  }
 0x45a   :  { %5573 = vmatprep.subr.bf16.mxu0 %v11064_v29  ;;  %v4035_v48 = vpop.f32.mrf.mxu0  ;;  %v10987_v63 = vld [vmem:[#allocation2 + $0xf00] ss:$8 sps:$4 sm:$0xff]  }
 0x45b   :  { %v4036_v5 = vadd.f32 %v4035_v48, %v3142_v55  ;;  %v4077_v8 = vadd.f32 %v4076_v49, %v4034_v0  ;;  %v11149_v48 = vld [vmem:[%s12112_s0 + $0x108] ss:$40 sps:$4 sm:$0xff]   ;;  %v10995_v0 = vld [vmem:[#allocation2 + $0xff4] ss:$8 sps:$4 sm:$0xff]  }
 0x45c   :  { %v10951_v49 = vld [vmem:[#allocation2 + $0xf60] ss:$8 sps:$4 sm:$0xff]   ;;  %v10969_v55 = vld [vmem:[#allocation2 + $0xf30] ss:$8 sps:$4 sm:$0xff]  }
 0x45d   :  { %5574 = vmatpush1.bf16.msra.mxu0 %v11062_v30  ;;  %v4079_v13 = vadd.f32 %v4078_v54, %v4036_v5  ;;  %v10971_v54 = vld [vmem:[#allocation2 + $0xf34] ss:$8 sps:$4 sm:$0xff]   ;;  %v11005_v5 = vld [vmem:[#allocation2 + $0xfd0] ss:$8 sps:$4 sm:$0xff]  }
 0x45e   :  { %5575 = vmatprep.subr.bf16.mxu0 %v11070_v31 }
 0x461   :  { %5576 = vmatpush1.bf16.msra.mxu0 %v11068_v32 }
 0x462   :  { %5577 = vmatprep.subr.bf16.mxu0 %v11076_v33  ;;  %v11136_v33 = vld [vmem:[#allocation2 + $0x1294] ss:$8 sps:$4 sm:$0xff]  }
 0x465   :  { %5578 = vmatpush1.bf16.msra.mxu0 %v11074_v34 }
 0x466   :  { %5579 = vmatprep.subr.bf16.mxu0 %v11082_v35  ;;  %v11134_v35 = vld [vmem:[#allocation2 + $0x1290] ss:$8 sps:$4 sm:$0xff]  }
 0x469   :  { %5580 = vmatpush1.bf16.msra.mxu0 %v11080_v36 }
 0x46a   :  { %5581 = vmatprep.subr.bf16.mxu0 %v11088_v38 }
 0x46d   :  { %5582 = vmatpush1.bf16.msra.mxu0 %v11086_v39 }
 0x46e   :  { %5583 = vmatprep.subr.bf16.mxu0 %v11094_v42  ;;  %v10945_v42 = vld [vmem:[#allocation2 + $0xf70] ss:$8 sps:$4 sm:$0xff]  }
 0x471   :  { %5584 = vmatpush1.bf16.msra.mxu0 %v11092_v43  ;;  %v11043_v43 = vld [vmem:[%s12112_s0 + $0xf4] ss:$40 sps:$4 sm:$0xff]  }
 0x472   :  { %5585 = vmatprep.subr.bf16.mxu0 %v11100_v46  ;;  %v10953_v46 = vld [vmem:[#allocation2 + $0xf64] ss:$8 sps:$4 sm:$0xff]  }
 0x475   :  { %5586 = vmatpush2.bf16.msra.mxu0 %v11098_v47  ;;  %v11151_v47 = vld [vmem:[%s12112_s0 + $0x10c] ss:$40 sps:$4 sm:$0xff]  }
 0x476   :  { %5587 = vmatprep.subr.bf16.mxu0 %v11106_v52  ;;  %5601 = vmatprep.mubr.bf16.mxu0 %v11151_v47  ;;  %v10965_v52 = vld [vmem:[#allocation2 + $0xf44] ss:$8 sps:$4 sm:$0xff]   ;;  %v11131_v47 = vld [vmem:[#allocation2 + $0x1190] ss:$8 sps:$4 sm:$0xff]  }
 0x479   :  { %5588 = vmatpush2.bf16.msra.mxu0 %v11104_v53  ;;  %v10963_v53 = vld [vmem:[#allocation2 + $0xf40] ss:$8 sps:$4 sm:$0xff]  }
 0x47a   :  { %5589 = vmatprep.subr.bf16.mxu0 %v11112_v61  ;;  %v10981_v61 = vld [vmem:[#allocation2 + $0xf10] ss:$8 sps:$4 sm:$0xff]  }
 0x47d   :  { %5590 = vmatpush2.bf16.msra.mxu0 %v11110_v62  ;;  %v10989_v62 = vld [vmem:[#allocation2 + $0xf04] ss:$8 sps:$4 sm:$0xff]  }
 0x47e   :  { %5591 = vmatprep.subr.bf16.mxu0 %v11118_v4  ;;  %v11007_v4 = vld [vmem:[#allocation2 + $0xfd4] ss:$8 sps:$4 sm:$0xff]  }
 0x481   :  { %5592 = vmatpush2.bf16.msra.mxu0 %v11116_v6  ;;  %v11013_v6 = vld [vmem:[#allocation2 + $0xfc4] ss:$8 sps:$4 sm:$0xff]  }
 0x482   :  { %5593 = vmatprep.subr.bf16.mxu0 %v11124_v12  ;;  %v11031_v12 = vld [vmem:[#allocation2 + $0xf94] ss:$8 sps:$4 sm:$0xff]  }
 0x485   :  { %5594 = vmatpush2.bf16.msra.mxu0 %v11122_v16  ;;  %v11046_v16 = vld [vmem:[#allocation2 + $0x1174] ss:$8 sps:$4 sm:$0xff]  }
 0x486   :  { %5595 = vmatprep.subr.bf16.mxu0 %v11130_v22  ;;  %v11061_v22 = vld [vmem:[#allocation2 + $0x1154] ss:$8 sps:$4 sm:$0xff]  }
 0x489   :  { %5596 = vmatpush2.bf16.msra.mxu0 %v11128_v25  ;;  %v11065_v25 = vld [vmem:[#allocation2 + $0x1140] ss:$8 sps:$4 sm:$0xff]  }
 0x48a   :  { %5597 = vmatprep.subr.bf16.mxu0 %v11136_v33  ;;  %v11089_v33 = vld [vmem:[#allocation2 + $0x1100] ss:$8 sps:$4 sm:$0xff]  }
 0x48d   :  { %5598 = vmatpush2.bf16.msra.mxu0 %v11134_v35  ;;  %v11095_v35 = vld [vmem:[#allocation2 + $0x11f0] ss:$8 sps:$4 sm:$0xff]  }
 0x48e   :  { %5599 = vmatprep.subr.bf16.mxu0 %v11142_v40  ;;  %v11115_v40 = vld [vmem:[#allocation2 + $0x11c4] ss:$8 sps:$4 sm:$0xff]  }
 0x491   :  { %5600 = vmatpush2.bf16.msra.mxu0 %v11140_v44  ;;  %v11127_v44 = vld [vmem:[#allocation2 + $0x11a4] ss:$8 sps:$4 sm:$0xff]  }
 0x494   :  { %v4115_v51 = vpop.f32.mrf.mxu0  ;;  %5602 = vmatmul.mubr.bf16.vlgmr.msra.gmra.mxu0 %v11149_v48  ;;  %v11139_v48 = vld [vmem:[#allocation2 + $0x1184] ss:$8 sps:$4 sm:$0xff]  }
 0x495   :  { %v4116_v17 = vadd.f32 %v4115_v51, %v4073_v9  ;;  %v10957_v51 = vld [vmem:[#allocation2 + $0xf50] ss:$8 sps:$4 sm:$0xff]  }
 0x496   :  { %v4117_v59 = vpop.f32.mrf.mxu0  ;;  %v11017_v9 = vld [vmem:[#allocation2 + $0xfb0] ss:$8 sps:$4 sm:$0xff]  }
 0x497   :  { %v4118_v14 = vadd.f32 %v4117_v59, %v4075_v7  ;;  %v4159_v26 = vadd.f32 %v4158_v60, %v4116_v17  ;;  %v10975_v59 = vld [vmem:[#allocation2 + $0xf20] ss:$8 sps:$4 sm:$0xff]   ;;  %v10983_v60 = vld [vmem:[#allocation2 + $0xf14] ss:$8 sps:$4 sm:$0xff]   ;;  %v11041_v17 = vld [vmem:[%s12112_s0 + $0xf0] ss:$40 sps:$4 sm:$0xff]  }
 0x498   :  { %v4119_v2 = vpop.f32.mrf.mxu0  ;;  %v11011_v7 = vld [vmem:[#allocation2 + $0xfc0] ss:$8 sps:$4 sm:$0xff]  }
 0x499   :  { %v4120_v15 = vadd.f32 %v4119_v2, %v4077_v8  ;;  %v4161_v23 = vadd.f32 %v4160_v3, %v4118_v14  ;;  %v11001_v2 = vld [vmem:[#allocation2 + $0xfe4] ss:$8 sps:$4 sm:$0xff]   ;;  %v10999_v3 = vld [vmem:[#allocation2 + $0xfe0] ss:$8 sps:$4 sm:$0xff]   ;;  %v11019_v8 = vld [vmem:[#allocation2 + $0xfb4] ss:$8 sps:$4 sm:$0xff]  }
 0x49a   :  { %v4121_v10 = vpop.f32.mrf.mxu0  ;;  %v11037_v14 = vld [vmem:[#allocation2 + $0xf84] ss:$8 sps:$4 sm:$0xff]  }
 0x49b   :  { %v4122_v19 = vadd.f32 %v4121_v10, %v4079_v13  ;;  %v4163_v24 = vadd.f32 %v4162_v11, %v4120_v15  ;;  %v11025_v10 = vld [vmem:[#allocation2 + $0xfa4] ss:$8 sps:$4 sm:$0xff]   ;;  %v11023_v11 = vld [vmem:[#allocation2 + $0xfa0] ss:$8 sps:$4 sm:$0xff]   ;;  %v11029_v13 = vld [vmem:[#allocation2 + $0xf90] ss:$8 sps:$4 sm:$0xff]  }
 0x49c   :  { %v11035_v15 = vld [vmem:[#allocation2 + $0xf80] ss:$8 sps:$4 sm:$0xff]  }
 0x49d   :  { %v4165_v28 = vadd.f32 %v4164_v20, %v4122_v19  ;;  %v11145_v19 = vld [vmem:[%s12112_s0 + $0x104] ss:$40 sps:$4 sm:$0xff]  }
 0x49e   :  { %v11055_v20 = vld [vmem:[#allocation2 + $0x1164] ss:$8 sps:$4 sm:$0xff]  }
 0x4d4   :  { %v4201_v18 = vpop.f32.mrf.mxu0 }
 0x4d5   :  { %v4202_v31 = vadd.f32 %v4201_v18, %v4159_v26  ;;  %v11044_v18 = vld [vmem:[#allocation2 + $0x1170] ss:$8 sps:$4 sm:$0xff]   ;;  %v11073_v26 = vld [vmem:[#allocation2 + $0x1134] ss:$8 sps:$4 sm:$0xff]  }
 0x4d6   :  { %v4203_v21 = vpop.f32.mrf.mxu0 }
 0x4d7   :  { %v4204_v29 = vadd.f32 %v4203_v21, %v4161_v23  ;;  %v4210_v39 = vmax.f32 %v4202_v31, 0.0  ;;  %v11053_v21 = vld [vmem:[#allocation2 + $0x1160] ss:$8 sps:$4 sm:$0xff]   ;;  %v11059_v23 = vld [vmem:[#allocation2 + $0x1150] ss:$8 sps:$4 sm:$0xff]  }
 0x4d8   :  { %v4205_v27 = vpop.f32.mrf.mxu0  ;;  %v11083_v31 = vld [vmem:[#allocation2 + $0x1110] ss:$8 sps:$4 sm:$0xff]  }
 0x4d9   :  { %v4206_v30 = vadd.f32 %v4205_v27, %v4163_v24  ;;  %v4211_v37 = vmax.f32 %v4204_v29, 0.0  ;;  %v11067_v24 = vld [vmem:[#allocation2 + $0x1144] ss:$8 sps:$4 sm:$0xff]   ;;  %v11071_v27 = vld [vmem:[#allocation2 + $0x1130] ss:$8 sps:$4 sm:$0xff]  }
 0x4da   :  { %v4207_v32 = vpop.f32.mrf.mxu0  ;;  %v11077_v29 = vld [vmem:[#allocation2 + $0x1120] ss:$8 sps:$4 sm:$0xff]  }
 0x4db   :  { %v4208_v34 = vadd.f32 %v4207_v32, %v4165_v28  ;;  %v4212_v36 = vmax.f32 %v4206_v30, 0.0  ;;  %v11079_v28 = vld [vmem:[#allocation2 + $0x1124] ss:$8 sps:$4 sm:$0xff]   ;;  %v11085_v30 = vld [vmem:[#allocation2 + $0x1114] ss:$8 sps:$4 sm:$0xff]  }
 0x4dc   :  { %v11091_v32 = vld [vmem:[#allocation2 + $0x1104] ss:$8 sps:$4 sm:$0xff]  }
 0x4dd   :  { %v4213_v38 = vmax.f32 %v4208_v34, 0.0  ;;  %v4214_v45 = vpack.c.bf16 %v4212_v36, %v4210_v39  ;;  %v11097_v34 = vld [vmem:[#allocation2 + $0x11f4] ss:$8 sps:$4 sm:$0xff]   ;;  %v11103_v36 = vld [vmem:[#allocation2 + $0x11e4] ss:$8 sps:$4 sm:$0xff]  }
 0x4de   :  { %v11107_v39 = vld [vmem:[#allocation2 + $0x11d0] ss:$8 sps:$4 sm:$0xff]  }
 0x4df   :  { %v4215_v41 = vpack.c.bf16 %v4213_v38, %v4211_v37  ;;  %v11101_v37 = vld [vmem:[#allocation2 + $0x11e0] ss:$8 sps:$4 sm:$0xff]   ;;  %v11109_v38 = vld [vmem:[#allocation2 + $0x11d4] ss:$8 sps:$4 sm:$0xff]  }
 0x4e1   :  { %4385 = vmatprep.mubr.bf16.mxu1 %v4215_v41  ;;  %v11113_v41 = vld [vmem:[#allocation2 + $0x11c0] ss:$8 sps:$4 sm:$0xff]  }
 0x4e2   :  { %4386 = vmatmul.mubr.bf16.vlgmr.msra.gmra.mxu1 %v4214_v45  ;;  %v11125_v45 = vld [vmem:[#allocation2 + $0x11a0] ss:$8 sps:$4 sm:$0xff]  }
 0x4e3   :  { %5441 = vmatpush1.bf16.msra.mxu1 %v10945_v42  ;;  %5472 = vmatprep.mubr.bf16.mxu1 %v11043_v43  ;;  %v11121_v42 = vld [vmem:[#allocation2 + $0x11b4] ss:$8 sps:$4 sm:$0xff]   ;;  %v11119_v43 = vld [vmem:[#allocation2 + $0x11b0] ss:$8 sps:$4 sm:$0xff]  }
 0x4e4   :  { %5442 = vmatprep.subr.bf16.mxu1 %v10953_v46  ;;  %v11133_v46 = vld [vmem:[#allocation2 + $0x1194] ss:$8 sps:$4 sm:$0xff]  }
 0x4e7   :  { %5443 = vmatpush1.bf16.msra.mxu1 %v10951_v49  ;;  %v11137_v49 = vld [vmem:[#allocation2 + $0x1180] ss:$8 sps:$4 sm:$0xff]  }
 0x4e8   :  { %5444 = vmatprep.subr.bf16.mxu1 %v10959_v50  ;;  %v11148_v50 = vld [vmem:[#allocation2 + $0x1374] ss:$8 sps:$4 sm:$0xff]  }
 0x4eb   :  { %5445 = vmatpush1.bf16.msra.mxu1 %v10957_v51  ;;  %v11143_v51 = vld [vmem:[%s12112_s0 + $0x100] ss:$40 sps:$4 sm:$0xff]  }
 0x4ec   :  { %5446 = vmatprep.subr.bf16.mxu1 %v10965_v52  ;;  %v11146_v52 = vld [vmem:[#allocation2 + $0x1370] ss:$8 sps:$4 sm:$0xff]  }
 0x4ef   :  { %5447 = vmatpush1.bf16.msra.mxu1 %v10963_v53  ;;  %v11199_v53 = vld [vmem:[%s12112_s0 + $0x114] ss:$40 sps:$4 sm:$0xff]  }
 0x4f0   :  { %5448 = vmatprep.subr.bf16.mxu1 %v10971_v54  ;;  %v11154_v54 = vld [vmem:[#allocation2 + $0x1364] ss:$8 sps:$4 sm:$0xff]  }
 0x4f3   :  { %5449 = vmatpush1.bf16.msra.mxu1 %v10969_v55  ;;  %v11152_v55 = vld [vmem:[#allocation2 + $0x1360] ss:$8 sps:$4 sm:$0xff]  }
 0x4f4   :  { %5450 = vmatprep.subr.bf16.mxu1 %v10977_v56  ;;  %v11157_v56 = vld [vmem:[#allocation2 + $0x1354] ss:$8 sps:$4 sm:$0xff]  }
 0x4f7   :  { %5451 = vmatpush1.bf16.msra.mxu1 %v10975_v59  ;;  %v11155_v59 = vld [vmem:[#allocation2 + $0x1350] ss:$8 sps:$4 sm:$0xff]  }
 0x4f8   :  { %5452 = vmatprep.subr.bf16.mxu1 %v10983_v60  ;;  %v11160_v60 = vld [vmem:[#allocation2 + $0x1344] ss:$8 sps:$4 sm:$0xff]  }
 0x4fb   :  { %5453 = vmatpush1.bf16.msra.mxu1 %v10981_v61  ;;  %v11158_v61 = vld [vmem:[#allocation2 + $0x1340] ss:$8 sps:$4 sm:$0xff]  }
 0x4fc   :  { %5454 = vmatprep.subr.bf16.mxu1 %v10989_v62  ;;  %v11163_v62 = vld [vmem:[#allocation2 + $0x1334] ss:$8 sps:$4 sm:$0xff]  }
 0x4ff   :  { %5455 = vmatpush1.bf16.msra.mxu1 %v10987_v63  ;;  %v11161_v63 = vld [vmem:[#allocation2 + $0x1330] ss:$8 sps:$4 sm:$0xff]  }
 0x500   :  { %5456 = vmatprep.subr.bf16.mxu1 %v10995_v0  ;;  %v11166_v0 = vld [vmem:[#allocation2 + $0x1324] ss:$8 sps:$4 sm:$0xff]  }
 0x503   :  { %5457 = vmatpush2.bf16.msra.mxu1 %v10993_v1  ;;  %v11164_v1 = vld [vmem:[#allocation2 + $0x1320] ss:$8 sps:$4 sm:$0xff]  }
 0x504   :  { %5458 = vmatprep.subr.bf16.mxu1 %v11001_v2  ;;  %v11169_v2 = vld [vmem:[#allocation2 + $0x1314] ss:$8 sps:$4 sm:$0xff]  }
 0x507   :  { %5459 = vmatpush2.bf16.msra.mxu1 %v10999_v3  ;;  %v11167_v3 = vld [vmem:[#allocation2 + $0x1310] ss:$8 sps:$4 sm:$0xff]  }
 0x508   :  { %5460 = vmatprep.subr.bf16.mxu1 %v11007_v4  ;;  %v11172_v4 = vld [vmem:[#allocation2 + $0x1304] ss:$8 sps:$4 sm:$0xff]  }
 0x50b   :  { %5461 = vmatpush2.bf16.msra.mxu1 %v11005_v5  ;;  %v11170_v5 = vld [vmem:[#allocation2 + $0x1300] ss:$8 sps:$4 sm:$0xff]  }
 0x50c   :  { %5462 = vmatprep.subr.bf16.mxu1 %v11013_v6  ;;  %v11175_v6 = vld [vmem:[#allocation2 + $0x13f4] ss:$8 sps:$4 sm:$0xff]  }
 0x50f   :  { %5463 = vmatpush2.bf16.msra.mxu1 %v11011_v7  ;;  %v11173_v7 = vld [vmem:[#allocation2 + $0x13f0] ss:$8 sps:$4 sm:$0xff]  }
 0x510   :  { %5464 = vmatprep.subr.bf16.mxu1 %v11019_v8  ;;  %v11178_v8 = vld [vmem:[#allocation2 + $0x13e4] ss:$8 sps:$4 sm:$0xff]  }
 0x513   :  { %5465 = vmatpush2.bf16.msra.mxu1 %v11017_v9  ;;  %v11176_v9 = vld [vmem:[#allocation2 + $0x13e0] ss:$8 sps:$4 sm:$0xff]  }
 0x514   :  { %5466 = vmatprep.subr.bf16.mxu1 %v11025_v10  ;;  %v11181_v10 = vld [vmem:[#allocation2 + $0x13d4] ss:$8 sps:$4 sm:$0xff]  }
 0x517   :  { %5467 = vmatpush2.bf16.msra.mxu1 %v11023_v11  ;;  %v11179_v11 = vld [vmem:[#allocation2 + $0x13d0] ss:$8 sps:$4 sm:$0xff]  }
 0x518   :  { %5468 = vmatprep.subr.bf16.mxu1 %v11031_v12  ;;  %v11184_v12 = vld [vmem:[#allocation2 + $0x13c4] ss:$8 sps:$4 sm:$0xff]  }
 0x51b   :  { %5469 = vmatpush2.bf16.msra.mxu1 %v11029_v13  ;;  %v11182_v13 = vld [vmem:[#allocation2 + $0x13c0] ss:$8 sps:$4 sm:$0xff]  }
 0x51c   :  { %5470 = vmatprep.subr.bf16.mxu1 %v11037_v14  ;;  %v11187_v14 = vld [vmem:[#allocation2 + $0x13b4] ss:$8 sps:$4 sm:$0xff]  }
 0x51f   :  { %5471 = vmatpush2.bf16.msra.mxu1 %v11035_v15  ;;  %v11185_v15 = vld [vmem:[#allocation2 + $0x13b0] ss:$8 sps:$4 sm:$0xff]  }
 0x520   :  { %5526 = vmatprep.subr.bf16.mxu1 %v11046_v16  ;;  %v11190_v16 = vld [vmem:[#allocation2 + $0x13a4] ss:$8 sps:$4 sm:$0xff]  }
 0x522   :  { %5473 = vmatmul.mubr.bf16.vlgmr.msra.gmra.mxu1 %v11041_v17  ;;  %v11188_v17 = vld [vmem:[#allocation2 + $0x13a0] ss:$8 sps:$4 sm:$0xff]  }
 0x523   :  { %5527 = vmatpush1.bf16.msra.mxu1 %v11044_v18  ;;  %5558 = vmatprep.mubr.bf16.mxu1 %v11145_v19  ;;  %v11193_v18 = vld [vmem:[#allocation2 + $0x1394] ss:$8 sps:$4 sm:$0xff]   ;;  %v11191_v19 = vld [vmem:[#allocation2 + $0x1390] ss:$8 sps:$4 sm:$0xff]  }
 0x524   :  { %5528 = vmatprep.subr.bf16.mxu1 %v11055_v20  ;;  %v11196_v20 = vld [vmem:[#allocation2 + $0x1384] ss:$8 sps:$4 sm:$0xff]  }
 0x527   :  { %5529 = vmatpush1.bf16.msra.mxu1 %v11053_v21  ;;  %v11194_v21 = vld [vmem:[#allocation2 + $0x1380] ss:$8 sps:$4 sm:$0xff]  }
 0x528   :  { %5530 = vmatprep.subr.bf16.mxu1 %v11061_v22  ;;  %v11197_v22 = vld [vmem:[%s12112_s0 + $0x110] ss:$40 sps:$4 sm:$0xff]  }
 0x52b   :  { %5531 = vmatpush1.bf16.msra.mxu1 %v11059_v23 }
 0x52c   :  { %5532 = vmatprep.subr.bf16.mxu1 %v11067_v24 }
 0x52f   :  { %5533 = vmatpush1.bf16.msra.mxu1 %v11065_v25 }
 0x530   :  { %5534 = vmatprep.subr.bf16.mxu1 %v11073_v26 }
 0x533   :  { %5535 = vmatpush1.bf16.msra.mxu1 %v11071_v27  ;;  %v9317_v27 = vld [vmem:[#allocation7 + $0x2] ss:$0 sm:$0xff] }
 0x534   :  { %5536 = vmatprep.subr.bf16.mxu1 %v11079_v28 }
 0x537   :  { %5537 = vmatpush1.bf16.msra.mxu1 %v11077_v29 }
 0x538   :  { %5538 = vmatprep.subr.bf16.mxu1 %v11085_v30 }
 0x53b   :  { %5539 = vmatpush1.bf16.msra.mxu1 %v11083_v31 }
 0x53c   :  { %5540 = vmatprep.subr.bf16.mxu1 %v11091_v32  ;;  %v11200_v32 = vld [vmem:[#allocation6 + $0x1f8] sm:$0xff]  }
 0x53d   :  { %10054 = vmatprep.subr.bf16.mxu0 %v11200_v32  ;;  %v11353_v32 = vld [vmem:[#allocation2 + $0x1724] ss:$8 sps:$4 sm:$0xff]  }
 0x53f   :  { %5541 = vmatpush1.bf16.msra.mxu1 %v11089_v33  ;;  %v11201_v33 = vld [vmem:[#allocation6 + $0x1b8] sm:$0xff]  }
 0x540   :  { %5542 = vmatprep.subr.bf16.mxu1 %v11097_v34  ;;  %v11202_v34 = vld [vmem:[#allocation6 + $0x1f0] sm:$0xff]   ;;  %10055 = vmatpush3.bf16.msra.mxu0 %v11201_v33 }
 0x541   :  { %10056 = vmatprep.subr.bf16.mxu0 %v11202_v34  ;;  %v11351_v33 = vld [vmem:[#allocation2 + $0x1720] ss:$8 sps:$4 sm:$0xff]  }
 0x543   :  { %5543 = vmatpush2.bf16.msra.mxu1 %v11095_v35 }
 0x544   :  { %5544 = vmatprep.subr.bf16.mxu1 %v11103_v36  ;;  %v11203_v36 = vld [vmem:[#allocation6 + $0x1b0] sm:$0xff]  }
 0x545   :  { %10057 = vmatpush3.bf16.msra.mxu0 %v11203_v36  ;;  %v11357_v36 = vld [vmem:[#allocation2 + $0x1710] ss:$8 sps:$4 sm:$0xff]  }
 0x547   :  { %5545 = vmatpush2.bf16.msra.mxu1 %v11101_v37  ;;  %v11204_v37 = vld [vmem:[#allocation6 + $0x1e8] sm:$0xff]  }
 0x548   :  { %5546 = vmatprep.subr.bf16.mxu1 %v11109_v38  ;;  %v11205_v38 = vld [vmem:[#allocation6 + $0x1a8] sm:$0xff]   ;;  %10058 = vmatprep.subr.bf16.mxu0 %v11204_v37 }
 0x549   :  { %10059 = vmatpush3.bf16.msra.mxu0 %v11205_v38  ;;  %v5517_v38 = vpop.f32.mrf.mxu0 }
 0x54b   :  { %5547 = vmatpush2.bf16.msra.mxu1 %v11107_v39  ;;  %v11206_v39 = vld [vmem:[#allocation6 + $0x1e0] sm:$0xff]  }
 0x54c   :  { %5548 = vmatprep.subr.bf16.mxu1 %v11115_v40  ;;  %v11207_v40 = vld [vmem:[#allocation6 + $0x1a0] sm:$0xff]   ;;  %10060 = vmatprep.subr.bf16.mxu0 %v11206_v39 }
 0x54d   :  { %10061 = vmatpush3.bf16.msra.mxu0 %v11207_v40  ;;  %v11365_v39 = vld [vmem:[#allocation2 + $0x1704] ss:$8 sps:$4 sm:$0xff]   ;;  %v11363_v40 = vld [vmem:[#allocation2 + $0x1700] ss:$8 sps:$4 sm:$0xff]  }
 0x54f   :  { %5549 = vmatpush2.bf16.msra.mxu1 %v11113_v41  ;;  %v11208_v41 = vld [vmem:[#allocation6 + $0x1d8] sm:$0xff]  }
 0x550   :  { %5550 = vmatprep.subr.bf16.mxu1 %v11121_v42  ;;  %v11209_v42 = vld [vmem:[#allocation6 + $0x198] sm:$0xff]   ;;  %10062 = vmatprep.subr.bf16.mxu0 %v11208_v41 }
 0x551   :  { %10063 = vmatpush3.bf16.msra.mxu0 %v11209_v42  ;;  %v5519_v42 = vpop.f32.mrf.mxu0 }
 0x553   :  { %5551 = vmatpush2.bf16.msra.mxu1 %v11119_v43  ;;  %v11210_v43 = vld [vmem:[#allocation6 + $0x1d0] sm:$0xff]  }
 0x554   :  { %5552 = vmatprep.subr.bf16.mxu1 %v11127_v44  ;;  %v11211_v44 = vld [vmem:[#allocation6 + $0x190] sm:$0xff]   ;;  %10064 = vmatprep.subr.bf16.mxu0 %v11210_v43 }
 0x555   :  { %10065 = vmatpush3.bf16.msra.mxu0 %v11211_v44  ;;  %v11371_v43 = vld [vmem:[#allocation2 + $0x17f4] ss:$8 sps:$4 sm:$0xff]   ;;  %v11369_v44 = vld [vmem:[#allocation2 + $0x17f0] ss:$8 sps:$4 sm:$0xff]  }
 0x557   :  { %5553 = vmatpush2.bf16.msra.mxu1 %v11125_v45  ;;  %v11212_v45 = vld [vmem:[#allocation6 + $0x1c8] sm:$0xff]  }
 0x558   :  { %5554 = vmatprep.subr.bf16.mxu1 %v11133_v46  ;;  %v11213_v46 = vld [vmem:[#allocation6 + $0x188] sm:$0xff]   ;;  %10066 = vmatprep.subr.bf16.mxu0 %v11212_v45 }
 0x559   :  { %10067 = vmatpush3.bf16.msra.mxu0 %v11213_v46  ;;  %v5521_v46 = vpop.f32.mrf.mxu0 }
 0x55b   :  { %5555 = vmatpush2.bf16.msra.mxu1 %v11131_v47  ;;  %v11214_v47 = vld [vmem:[#allocation6 + $0x1c0] sm:$0xff]  }
 0x55c   :  { %5556 = vmatprep.subr.bf16.mxu1 %v11139_v48  ;;  %v11215_v48 = vld [vmem:[#allocation6 + $0x180] sm:$0xff]   ;;  %10068 = vmatprep.subr.bf16.mxu0 %v11214_v47  ;;  %v4578_v47 = vld [vmem:[#allocation4 + $0x6] sm:$0x3] }
 0x55d   :  { %10069 = vmatpush3.bf16.msra.mxu0 %v11215_v48 }
 0x55f   :  { %5557 = vmatpush2.bf16.msra.mxu1 %v11137_v49  ;;  %v11218_v49 = vld [vmem:[#allocation2 + $0x1474] ss:$8 sps:$4 sm:$0xff]  }
 0x560   :  { %5612 = vmatprep.subr.bf16.mxu1 %v11148_v50  ;;  %6885 = vmatprep.subr.bf16.mxu0 %v11218_v49  ;;  %v11221_v50 = vld [vmem:[#allocation2 + $0x1574] ss:$8 sps:$4 sm:$0xff]   ;;  %v11377_v49 = vld [vmem:[#allocation2 + $0x17e4] ss:$8 sps:$4 sm:$0xff]  }
 0x562   :  { %5559 = vmatmul.mubr.bf16.vlgmr.msra.gmra.mxu1 %v11143_v51  ;;  %v11219_v51 = vld [vmem:[#allocation2 + $0x1570] ss:$8 sps:$4 sm:$0xff]  }
 0x563   :  { %5613 = vmatpush1.bf16.msra.mxu1 %v11146_v52  ;;  %5644 = vmatprep.mubr.bf16.mxu1 %v11199_v53  ;;  %v11227_v52 = vld [vmem:[#allocation2 + $0x1564] ss:$8 sps:$4 sm:$0xff]   ;;  %v11225_v53 = vld [vmem:[#allocation2 + $0x1560] ss:$8 sps:$4 sm:$0xff]  }
 0x564   :  { %5614 = vmatprep.subr.bf16.mxu1 %v11154_v54  ;;  %v11233_v54 = vld [vmem:[#allocation2 + $0x1554] ss:$8 sps:$4 sm:$0xff]  }
 0x567   :  { %5615 = vmatpush1.bf16.msra.mxu1 %v11152_v55  ;;  %v11231_v55 = vld [vmem:[#allocation2 + $0x1550] ss:$8 sps:$4 sm:$0xff]  }
 0x568   :  { %5616 = vmatprep.subr.bf16.mxu1 %v11157_v56  ;;  %v11239_v56 = vld [vmem:[#allocation2 + $0x1544] ss:$8 sps:$4 sm:$0xff]  }
 0x56b   :  { %5617 = vmatpush1.bf16.msra.mxu1 %v11155_v59  ;;  %v11237_v59 = vld [vmem:[#allocation2 + $0x1540] ss:$8 sps:$4 sm:$0xff]  }
 0x56c   :  { %5618 = vmatprep.subr.bf16.mxu1 %v11160_v60  ;;  %v11245_v60 = vld [vmem:[#allocation2 + $0x1534] ss:$8 sps:$4 sm:$0xff]  }
 0x56f   :  { %5619 = vmatpush1.bf16.msra.mxu1 %v11158_v61  ;;  %v11243_v61 = vld [vmem:[#allocation2 + $0x1530] ss:$8 sps:$4 sm:$0xff]  }
 0x570   :  { %5620 = vmatprep.subr.bf16.mxu1 %v11163_v62  ;;  %v11251_v62 = vld [vmem:[#allocation2 + $0x1524] ss:$8 sps:$4 sm:$0xff]  }
 0x573   :  { %5621 = vmatpush1.bf16.msra.mxu1 %v11161_v63  ;;  %v11249_v63 = vld [vmem:[#allocation2 + $0x1520] ss:$8 sps:$4 sm:$0xff]  }
 0x574   :  { %5622 = vmatprep.subr.bf16.mxu1 %v11166_v0  ;;  %v11257_v0 = vld [vmem:[#allocation2 + $0x1514] ss:$8 sps:$4 sm:$0xff]  }
 0x577   :  { %5623 = vmatpush1.bf16.msra.mxu1 %v11164_v1  ;;  %v11255_v1 = vld [vmem:[#allocation2 + $0x1510] ss:$8 sps:$4 sm:$0xff]  }
 0x578   :  { %5624 = vmatprep.subr.bf16.mxu1 %v11169_v2  ;;  %v11263_v2 = vld [vmem:[#allocation2 + $0x1504] ss:$8 sps:$4 sm:$0xff]  }
 0x57b   :  { %5625 = vmatpush1.bf16.msra.mxu1 %v11167_v3  ;;  %v11261_v3 = vld [vmem:[#allocation2 + $0x1500] ss:$8 sps:$4 sm:$0xff]  }
 0x57c   :  { %5626 = vmatprep.subr.bf16.mxu1 %v11172_v4  ;;  %v11269_v4 = vld [vmem:[#allocation2 + $0x15f4] ss:$8 sps:$4 sm:$0xff]  }
 0x57f   :  { %5627 = vmatpush1.bf16.msra.mxu1 %v11170_v5  ;;  %v11267_v5 = vld [vmem:[#allocation2 + $0x15f0] ss:$8 sps:$4 sm:$0xff]  }
 0x580   :  { %5628 = vmatprep.subr.bf16.mxu1 %v11175_v6  ;;  %v11275_v6 = vld [vmem:[#allocation2 + $0x15e4] ss:$8 sps:$4 sm:$0xff]  }
 0x583   :  { %5629 = vmatpush2.bf16.msra.mxu1 %v11173_v7  ;;  %v11273_v7 = vld [vmem:[#allocation2 + $0x15e0] ss:$8 sps:$4 sm:$0xff]  }
 0x584   :  { %5630 = vmatprep.subr.bf16.mxu1 %v11178_v8  ;;  %v11281_v8 = vld [vmem:[#allocation2 + $0x15d4] ss:$8 sps:$4 sm:$0xff]  }
 0x587   :  { %5631 = vmatpush2.bf16.msra.mxu1 %v11176_v9  ;;  %v11279_v9 = vld [vmem:[#allocation2 + $0x15d0] ss:$8 sps:$4 sm:$0xff]  }
 0x588   :  { %5632 = vmatprep.subr.bf16.mxu1 %v11181_v10  ;;  %v11287_v10 = vld [vmem:[#allocation2 + $0x15c4] ss:$8 sps:$4 sm:$0xff]  }
 0x58b   :  { %5633 = vmatpush2.bf16.msra.mxu1 %v11179_v11  ;;  %v11285_v11 = vld [vmem:[#allocation2 + $0x15c0] ss:$8 sps:$4 sm:$0xff]  }
 0x58c   :  { %5634 = vmatprep.subr.bf16.mxu1 %v11184_v12  ;;  %v11293_v12 = vld [vmem:[#allocation2 + $0x15b4] ss:$8 sps:$4 sm:$0xff]  }
 0x58f   :  { %5635 = vmatpush2.bf16.msra.mxu1 %v11182_v13  ;;  %v11291_v13 = vld [vmem:[#allocation2 + $0x15b0] ss:$8 sps:$4 sm:$0xff]  }
 0x590   :  { %5636 = vmatprep.subr.bf16.mxu1 %v11187_v14  ;;  %v11299_v14 = vld [vmem:[#allocation2 + $0x15a4] ss:$8 sps:$4 sm:$0xff]  }
 0x593   :  { %5637 = vmatpush2.bf16.msra.mxu1 %v11185_v15  ;;  %v11297_v15 = vld [vmem:[#allocation2 + $0x15a0] ss:$8 sps:$4 sm:$0xff]  }
 0x594   :  { %5638 = vmatprep.subr.bf16.mxu1 %v11190_v16  ;;  %v11305_v16 = vld [vmem:[#allocation2 + $0x1594] ss:$8 sps:$4 sm:$0xff]  }
 0x597   :  { %5639 = vmatpush2.bf16.msra.mxu1 %v11188_v17  ;;  %v11303_v17 = vld [vmem:[#allocation2 + $0x1590] ss:$8 sps:$4 sm:$0xff]  }
 0x598   :  { %5640 = vmatprep.subr.bf16.mxu1 %v11193_v18  ;;  %v11311_v18 = vld [vmem:[#allocation2 + $0x1584] ss:$8 sps:$4 sm:$0xff]  }
 0x59b   :  { %5641 = vmatpush2.bf16.msra.mxu1 %v11191_v19  ;;  %v11309_v19 = vld [vmem:[#allocation2 + $0x1580] ss:$8 sps:$4 sm:$0xff]  }
 0x59c   :  { %5642 = vmatprep.subr.bf16.mxu1 %v11196_v20  ;;  %v11320_v20 = vld [vmem:[%s12112_s0 + $0x14c] ss:$40 sps:$4 sm:$0xff]  }
 0x59f   :  { %5643 = vmatpush2.bf16.msra.mxu1 %v11194_v21  ;;  %v11318_v21 = vld [vmem:[%s12112_s0 + $0x148] ss:$40 sps:$4 sm:$0xff]  }
 0x5a0   :  { %6928 = vmatprep.subr.bf16.mxu1 %v11221_v50  ;;  %v11375_v50 = vld [vmem:[#allocation2 + $0x17e0] ss:$8 sps:$4 sm:$0xff]  }
 0x5a2   :  { %5645 = vmatmul.mubr.bf16.vlgmr.msra.gmra.mxu1 %v11197_v22  ;;  %v10048_v23 = vpop.f32.mrf.mxu1  ;;  %v11323_v22 = vld [vmem:[#allocation2 + $0x1774] ss:$8 sps:$4 sm:$0xff]  }
 0x5a3   :  { %6929 = vmatpush1.bf16.msra.mxu1 %v11219_v51  ;;  %6960 = vmatprep.mubr.bf16.mxu1 %v11320_v20  ;;  %v5523_v51 = vpop.f32.mrf.mxu0 }
 0x5a4   :  { %v10049_v24 = vpop.f32.mrf.mxu1  ;;  %6930 = vmatprep.subr.bf16.mxu1 %v11227_v52  ;;  %v4587_v52 = vrot.slane %v4578_v47, %v11934_v57 }
 0x5a5   :  { %v10050_v26 = vadd.f32 %v10049_v24, %v10048_v23  ;;  %v11321_v23 = vld [vmem:[#allocation2 + $0x1770] ss:$8 sps:$4 sm:$0xff]   ;;  %v11329_v24 = vld [vmem:[#allocation2 + $0x1764] ss:$8 sps:$4 sm:$0xff]  }
 0x5a6   :  { %v10051_v25 = vpop.f32.mrf.mxu1 }
 0x5a7   :  { %v4388_v30 = vadd.f32 %v10050_v26, %v9317_v27  ;;  %6931 = vmatpush1.bf16.msra.mxu1 %v11225_v53  ;;  %v11335_v26 = vld [vmem:[#allocation2 + $0x1754] ss:$8 sps:$4 sm:$0xff]   ;;  %v4583_v53 = vrot.slane %v4578_v47, %v11936_v58 }
 0x5a8   :  { %v10052_v28 = vpop.f32.mrf.mxu1  ;;  %6932 = vmatprep.subr.bf16.mxu1 %v11233_v54  ;;  %v11230_v47 = vld [vmem:[#allocation2 + $0x1454] ss:$8 sps:$4 sm:$0xff]  }
 0x5a9   :  { %v10053_v29 = vadd.f32 %v10052_v28, %v10051_v25  ;;  %v11327_v25 = vld [vmem:[#allocation2 + $0x1760] ss:$8 sps:$4 sm:$0xff]   ;;  %v11341_v28 = vld [vmem:[#allocation2 + $0x1744] ss:$8 sps:$4 sm:$0xff]  }
 0x5ab   :  { %v4391_v31 = vadd.f32 %v10053_v29, %v9317_v27  ;;  %6933 = vmatpush1.bf16.msra.mxu1 %v11231_v55  ;;  %v11333_v27 = vld [vmem:[#allocation2 + $0x1750] ss:$8 sps:$4 sm:$0xff]   ;;  %v11339_v29 = vld [vmem:[#allocation2 + $0x1740] ss:$8 sps:$4 sm:$0xff]   ;;  %v5603_v55 = vpop.f32.mrf.mxu0 }
 0x5ac   :  { %6934 = vmatprep.subr.bf16.mxu1 %v11239_v56  ;;  %v11383_v56 = vld [vmem:[#allocation2 + $0x17d4] ss:$8 sps:$4 sm:$0xff]  }
 0x5ad   :  { %v9966_v35 = vpack.c.bf16 %v4391_v31, %v4388_v30  ;;  %v11347_v30 = vld [vmem:[#allocation2 + $0x1734] ss:$8 sps:$4 sm:$0xff]   ;;  %v11345_v31 = vld [vmem:[#allocation2 + $0x1730] ss:$8 sps:$4 sm:$0xff]  }
 0x5af   :  { %9984 = vst [vmem:[%s12117_s5 + $0x10] sm:$0xff] %v9966_v35   ;;  %6935 = vmatpush1.bf16.msra.mxu1 %v11237_v59  ;;  %v11359_v35 = vld [vmem:[#allocation2 + $0x1714] ss:$8 sps:$4 sm:$0xff]   ;;  %v11381_v59 = vld [vmem:[#allocation2 + $0x17d0] ss:$8 sps:$4 sm:$0xff]  }
 0x5b0   :  { %6936 = vmatprep.subr.bf16.mxu1 %v11245_v60 }
 0x5b3   :  { %6937 = vmatpush1.bf16.msra.mxu1 %v11243_v61 }
 0x5b4   :  { %6938 = vmatprep.subr.bf16.mxu1 %v11251_v62 }
 0x5b7   :  { %6939 = vmatpush1.bf16.msra.mxu1 %v11249_v63 }
 0x5b8   :  { %6940 = vmatprep.subr.bf16.mxu1 %v11257_v0  ;;  %v5605_v0 = vpop.f32.mrf.mxu0 }
 0x5bb   :  { %6941 = vmatpush1.bf16.msra.mxu1 %v11255_v1  ;;  %v11389_v1 = vld [vmem:[#allocation2 + $0x17c4] ss:$8 sps:$4 sm:$0xff]  }
 0x5bc   :  { %6942 = vmatprep.subr.bf16.mxu1 %v11263_v2 }
 0x5bf   :  { %6943 = vmatpush1.bf16.msra.mxu1 %v11261_v3  ;;  %v11387_v3 = vld [vmem:[#allocation2 + $0x17c0] ss:$8 sps:$4 sm:$0xff]  }
 0x5c0   :  { %6944 = vmatprep.subr.bf16.mxu1 %v11269_v4 }
 0x5c3   :  { %6945 = vmatpush2.bf16.msra.mxu1 %v11267_v5 }
 0x5c4   :  { %6946 = vmatprep.subr.bf16.mxu1 %v11275_v6 }
 0x5c7   :  { %6947 = vmatpush2.bf16.msra.mxu1 %v11273_v7 }
 0x5c8   :  { %6948 = vmatprep.subr.bf16.mxu1 %v11281_v8  ;;  %v5607_v8 = vpop.f32.mrf.mxu0 }
 0x5cb   :  { %6949 = vmatpush2.bf16.msra.mxu1 %v11279_v9  ;;  %v11395_v9 = vld [vmem:[#allocation2 + $0x17b4] ss:$8 sps:$4 sm:$0xff]  }
 0x5cc   :  { %6950 = vmatprep.subr.bf16.mxu1 %v11287_v10 }
 0x5cf   :  { %6951 = vmatpush2.bf16.msra.mxu1 %v11285_v11 }
 0x5d0   :  { %6952 = vmatprep.subr.bf16.mxu1 %v11293_v12 }
 0x5d3   :  { %6953 = vmatpush2.bf16.msra.mxu1 %v11291_v13  ;;  %v11393_v13 = vld [vmem:[#allocation2 + $0x17b0] ss:$8 sps:$4 sm:$0xff]  }
 0x5d4   :  { %6954 = vmatprep.subr.bf16.mxu1 %v11299_v14 }
 0x5d7   :  { %6955 = vmatpush2.bf16.msra.mxu1 %v11297_v15 }
 0x5d8   :  { %6956 = vmatprep.subr.bf16.mxu1 %v11305_v16 }
 0x5db   :  { %6957 = vmatpush2.bf16.msra.mxu1 %v11303_v17  ;;  %v5609_v17 = vpop.f32.mrf.mxu0 }
 0x5dc   :  { %6958 = vmatprep.subr.bf16.mxu1 %v11311_v18 }
 0x5df   :  { %6959 = vmatpush2.bf16.msra.mxu1 %v11309_v19  ;;  %v11401_v19 = vld [vmem:[#allocation2 + $0x17a4] ss:$8 sps:$4 sm:$0xff]  }
 0x5e0   :  { %7014 = vmatprep.subr.bf16.mxu1 %v11323_v22  ;;  %v11399_v22 = vld [vmem:[#allocation2 + $0x17a0] ss:$8 sps:$4 sm:$0xff]  }
 0x5e2   :  { %6961 = vmatmul.mubr.bf16.vlgmr.msra.gmra.mxu1 %v11318_v21  ;;  %v5474_v34 = vpop.f32.mrf.mxu1 }
 0x5e3   :  { %7015 = vmatpush1.bf16.msra.mxu1 %v11321_v23  ;;  %v5475_v62 = vadd.f32 %v5474_v34, %v4583_v53 }
 0x5e4   :  { %7016 = vmatprep.subr.bf16.mxu1 %v11329_v24  ;;  %v5476_v37 = vpop.f32.mrf.mxu1 }
 0x5e5   :  { %v5477_v60 = vadd.f32 %v5476_v37, %v4587_v52  ;;  %v5518_v6 = vadd.f32 %v5517_v38, %v5475_v62  ;;  %v11413_v37 = vld [vmem:[#allocation2 + $0x1784] ss:$8 sps:$4 sm:$0xff]   ;;  %v11264_v62 = vld [vmem:[#allocation2 + $0x14f0] ss:$8 sps:$4 sm:$0xff]  }
 0x5e6   :  { %v5478_v41 = vpop.f32.mrf.mxu1 }
 0x5e7   :  { %7017 = vmatpush1.bf16.msra.mxu1 %v11327_v25  ;;  %v5479_v61 = vadd.f32 %v5478_v41, %v4583_v53  ;;  %v5520_v4 = vadd.f32 %v5519_v42, %v5477_v60  ;;  %v11411_v41 = vld [vmem:[#allocation2 + $0x1780] ss:$8 sps:$4 sm:$0xff]   ;;  %v11248_v53 = vld [vmem:[#allocation2 + $0x1424] ss:$8 sps:$4 sm:$0xff]  }
 0x5e8   :  { %7018 = vmatprep.subr.bf16.mxu1 %v11335_v26  ;;  %v5480_v45 = vpop.f32.mrf.mxu1  ;;  %v11258_v60 = vld [vmem:[#allocation2 + $0x1400] ss:$8 sps:$4 sm:$0xff]  }
 0x5e9   :  { %v5481_v2 = vadd.f32 %v5480_v45, %v4587_v52  ;;  %v5522_v5 = vadd.f32 %v5521_v46, %v5479_v61  ;;  %v11420_v45 = vld [vmem:[%s12112_s0 + $0x158] ss:$40 sps:$4 sm:$0xff]   ;;  %v11266_v61 = vld [vmem:[#allocation2 + $0x14f4] ss:$8 sps:$4 sm:$0xff]  }
 0x5ea   :  { %v11222_v46 = vld [vmem:[#allocation2 + $0x1460] ss:$8 sps:$4 sm:$0xff]   ;;  %v11240_v52 = vld [vmem:[#allocation2 + $0x1430] ss:$8 sps:$4 sm:$0xff]  }
 0x5eb   :  { %7019 = vmatpush1.bf16.msra.mxu1 %v11333_v27  ;;  %v5524_v10 = vadd.f32 %v5523_v51, %v5481_v2  ;;  %v11242_v51 = vld [vmem:[#allocation2 + $0x1434] ss:$8 sps:$4 sm:$0xff]   ;;  %v11276_v2 = vld [vmem:[#allocation2 + $0x14d0] ss:$8 sps:$4 sm:$0xff]  }
 0x5ec   :  { %7020 = vmatprep.subr.bf16.mxu1 %v11341_v28 }
 0x5ef   :  { %7021 = vmatpush1.bf16.msra.mxu1 %v11339_v29 }
 0x5f0   :  { %7022 = vmatprep.subr.bf16.mxu1 %v11347_v30  ;;  %v11407_v30 = vld [vmem:[#allocation2 + $0x1794] ss:$8 sps:$4 sm:$0xff]  }
 0x5f3   :  { %7023 = vmatpush1.bf16.msra.mxu1 %v11345_v31 }
 0x5f4   :  { %7024 = vmatprep.subr.bf16.mxu1 %v11353_v32  ;;  %v11405_v32 = vld [vmem:[#allocation2 + $0x1790] ss:$8 sps:$4 sm:$0xff]  }
 0x5f7   :  { %7025 = vmatpush1.bf16.msra.mxu1 %v11351_v33 }
 0x5f8   :  { %7026 = vmatprep.subr.bf16.mxu1 %v11359_v35 }
 0x5fb   :  { %7027 = vmatpush1.bf16.msra.mxu1 %v11357_v36 }
 0x5fc   :  { %7028 = vmatprep.subr.bf16.mxu1 %v11365_v39  ;;  %v11216_v39 = vld [vmem:[#allocation2 + $0x1470] ss:$8 sps:$4 sm:$0xff]  }
 0x5ff   :  { %7029 = vmatpush1.bf16.msra.mxu1 %v11363_v40  ;;  %v11314_v40 = vld [vmem:[%s12112_s0 + $0x144] ss:$40 sps:$4 sm:$0xff]  }
 0x600   :  { %7030 = vmatprep.subr.bf16.mxu1 %v11371_v43  ;;  %v11224_v43 = vld [vmem:[#allocation2 + $0x1464] ss:$8 sps:$4 sm:$0xff]  }
 0x603   :  { %7031 = vmatpush2.bf16.msra.mxu1 %v11369_v44  ;;  %v11422_v44 = vld [vmem:[%s12112_s0 + $0x15c] ss:$40 sps:$4 sm:$0xff]  }
 0x604   :  { %7032 = vmatprep.subr.bf16.mxu1 %v11377_v49  ;;  %7046 = vmatprep.mubr.bf16.mxu1 %v11422_v44  ;;  %v11236_v49 = vld [vmem:[#allocation2 + $0x1444] ss:$8 sps:$4 sm:$0xff]   ;;  %v11402_v44 = vld [vmem:[#allocation2 + $0x1690] ss:$8 sps:$4 sm:$0xff]  }
 0x607   :  { %7033 = vmatpush2.bf16.msra.mxu1 %v11375_v50  ;;  %v11234_v50 = vld [vmem:[#allocation2 + $0x1440] ss:$8 sps:$4 sm:$0xff]  }
 0x608   :  { %7034 = vmatprep.subr.bf16.mxu1 %v11383_v56  ;;  %v11252_v56 = vld [vmem:[#allocation2 + $0x1410] ss:$8 sps:$4 sm:$0xff]  }
 0x60b   :  { %7035 = vmatpush2.bf16.msra.mxu1 %v11381_v59  ;;  %v11260_v59 = vld [vmem:[#allocation2 + $0x1404] ss:$8 sps:$4 sm:$0xff]  }
 0x60c   :  { %7036 = vmatprep.subr.bf16.mxu1 %v11389_v1  ;;  %v11278_v1 = vld [vmem:[#allocation2 + $0x14d4] ss:$8 sps:$4 sm:$0xff]  }
 0x60f   :  { %7037 = vmatpush2.bf16.msra.mxu1 %v11387_v3  ;;  %v11284_v3 = vld [vmem:[#allocation2 + $0x14c4] ss:$8 sps:$4 sm:$0xff]  }
 0x610   :  { %7038 = vmatprep.subr.bf16.mxu1 %v11395_v9  ;;  %v11302_v9 = vld [vmem:[#allocation2 + $0x1494] ss:$8 sps:$4 sm:$0xff]  }
 0x613   :  { %7039 = vmatpush2.bf16.msra.mxu1 %v11393_v13  ;;  %v11317_v13 = vld [vmem:[#allocation2 + $0x1674] ss:$8 sps:$4 sm:$0xff]  }
 0x614   :  { %7040 = vmatprep.subr.bf16.mxu1 %v11401_v19  ;;  %v11332_v19 = vld [vmem:[#allocation2 + $0x1654] ss:$8 sps:$4 sm:$0xff]  }
 0x617   :  { %7041 = vmatpush2.bf16.msra.mxu1 %v11399_v22  ;;  %v11336_v22 = vld [vmem:[#allocation2 + $0x1640] ss:$8 sps:$4 sm:$0xff]  }
 0x618   :  { %7042 = vmatprep.subr.bf16.mxu1 %v11407_v30  ;;  %v11360_v30 = vld [vmem:[#allocation2 + $0x1600] ss:$8 sps:$4 sm:$0xff]  }
 0x61b   :  { %7043 = vmatpush2.bf16.msra.mxu1 %v11405_v32  ;;  %v11366_v32 = vld [vmem:[#allocation2 + $0x16f0] ss:$8 sps:$4 sm:$0xff]  }
 0x61c   :  { %7044 = vmatprep.subr.bf16.mxu1 %v11413_v37  ;;  %v11386_v37 = vld [vmem:[#allocation2 + $0x16c4] ss:$8 sps:$4 sm:$0xff]  }
 0x61f   :  { %7045 = vmatpush2.bf16.msra.mxu1 %v11411_v41  ;;  %v11398_v41 = vld [vmem:[#allocation2 + $0x16a4] ss:$8 sps:$4 sm:$0xff]  }
 0x622   :  { %v5560_v48 = vpop.f32.mrf.mxu1  ;;  %7047 = vmatmul.mubr.bf16.vlgmr.msra.gmra.mxu1 %v11420_v45  ;;  %v11410_v45 = vld [vmem:[#allocation2 + $0x1684] ss:$8 sps:$4 sm:$0xff]  }
 0x623   :  { %v5561_v14 = vadd.f32 %v5560_v48, %v5518_v6  ;;  %v11228_v48 = vld [vmem:[#allocation2 + $0x1450] ss:$8 sps:$4 sm:$0xff]  }
 0x624   :  { %v5562_v54 = vpop.f32.mrf.mxu1  ;;  %v11288_v6 = vld [vmem:[#allocation2 + $0x14b0] ss:$8 sps:$4 sm:$0xff]  }
 0x625   :  { %v5563_v11 = vadd.f32 %v5562_v54, %v5520_v4  ;;  %v5604_v23 = vadd.f32 %v5603_v55, %v5561_v14  ;;  %v11246_v54 = vld [vmem:[#allocation2 + $0x1420] ss:$8 sps:$4 sm:$0xff]   ;;  %v11254_v55 = vld [vmem:[#allocation2 + $0x1414] ss:$8 sps:$4 sm:$0xff]  }
 0x626   :  { %v5564_v63 = vpop.f32.mrf.mxu1  ;;  %v11282_v4 = vld [vmem:[#allocation2 + $0x14c0] ss:$8 sps:$4 sm:$0xff]  }
 0x627   :  { %v5565_v12 = vadd.f32 %v5564_v63, %v5522_v5  ;;  %v5606_v20 = vadd.f32 %v5605_v0, %v5563_v11  ;;  %v11272_v63 = vld [vmem:[#allocation2 + $0x14e4] ss:$8 sps:$4 sm:$0xff]   ;;  %v11270_v0 = vld [vmem:[#allocation2 + $0x14e0] ss:$8 sps:$4 sm:$0xff]   ;;  %v11290_v5 = vld [vmem:[#allocation2 + $0x14b4] ss:$8 sps:$4 sm:$0xff]  }
 0x628   :  { %v5566_v7 = vpop.f32.mrf.mxu1  ;;  %v11308_v11 = vld [vmem:[#allocation2 + $0x1484] ss:$8 sps:$4 sm:$0xff]   ;;  %v11312_v14 = vld [vmem:[%s12112_s0 + $0x140] ss:$40 sps:$4 sm:$0xff]  }
 0x629   :  { %v5567_v16 = vadd.f32 %v5566_v7, %v5524_v10  ;;  %v5608_v21 = vadd.f32 %v5607_v8, %v5565_v12  ;;  %v11296_v7 = vld [vmem:[#allocation2 + $0x14a4] ss:$8 sps:$4 sm:$0xff]   ;;  %v11294_v8 = vld [vmem:[#allocation2 + $0x14a0] ss:$8 sps:$4 sm:$0xff]   ;;  %v11300_v10 = vld [vmem:[#allocation2 + $0x1490] ss:$8 sps:$4 sm:$0xff]  }
 0x62a   :  { %v11306_v12 = vld [vmem:[#allocation2 + $0x1480] ss:$8 sps:$4 sm:$0xff]  }
 0x62b   :  { %v5610_v25 = vadd.f32 %v5609_v17, %v5567_v16  ;;  %v11416_v16 = vld [vmem:[%s12112_s0 + $0x154] ss:$40 sps:$4 sm:$0xff]   ;;  %v11326_v17 = vld [vmem:[#allocation2 + $0x1664] ss:$8 sps:$4 sm:$0xff]  }
 0x662   :  { %v5646_v15 = vpop.f32.mrf.mxu1 }
 0x663   :  { %v5647_v28 = vadd.f32 %v5646_v15, %v5604_v23  ;;  %v11315_v15 = vld [vmem:[#allocation2 + $0x1670] ss:$8 sps:$4 sm:$0xff]   ;;  %v11344_v23 = vld [vmem:[#allocation2 + $0x1634] ss:$8 sps:$4 sm:$0xff]  }
 0x664   :  { %v5648_v18 = vpop.f32.mrf.mxu1 }
 0x665   :  { %v5649_v26 = vadd.f32 %v5648_v18, %v5606_v20  ;;  %v5655_v36 = vmax.f32 %v5647_v28, 0.0  ;;  %v11324_v18 = vld [vmem:[#allocation2 + $0x1660] ss:$8 sps:$4 sm:$0xff]   ;;  %v11330_v20 = vld [vmem:[#allocation2 + $0x1650] ss:$8 sps:$4 sm:$0xff]  }
 0x666   :  { %v5650_v24 = vpop.f32.mrf.mxu1  ;;  %v11354_v28 = vld [vmem:[#allocation2 + $0x1610] ss:$8 sps:$4 sm:$0xff]  }
 0x667   :  { %v5651_v27 = vadd.f32 %v5650_v24, %v5608_v21  ;;  %v5656_v34 = vmax.f32 %v5649_v26, 0.0  ;;  %v11338_v21 = vld [vmem:[#allocation2 + $0x1644] ss:$8 sps:$4 sm:$0xff]   ;;  %v11342_v24 = vld [vmem:[#allocation2 + $0x1630] ss:$8 sps:$4 sm:$0xff]  }
 0x668   :  { %v5652_v29 = vpop.f32.mrf.mxu1  ;;  %v11348_v26 = vld [vmem:[#allocation2 + $0x1620] ss:$8 sps:$4 sm:$0xff]  }
 0x669   :  { %v5653_v31 = vadd.f32 %v5652_v29, %v5610_v25  ;;  %v5657_v33 = vmax.f32 %v5651_v27, 0.0  ;;  %v11350_v25 = vld [vmem:[#allocation2 + $0x1624] ss:$8 sps:$4 sm:$0xff]   ;;  %v11356_v27 = vld [vmem:[#allocation2 + $0x1614] ss:$8 sps:$4 sm:$0xff]  }
 0x66a   :  { %v11362_v29 = vld [vmem:[#allocation2 + $0x1604] ss:$8 sps:$4 sm:$0xff]  }
 0x66b   :  { %v5658_v35 = vmax.f32 %v5653_v31, 0.0  ;;  %v5659_v42 = vpack.c.bf16 %v5657_v33, %v5655_v36  ;;  %v11368_v31 = vld [vmem:[#allocation2 + $0x16f4] ss:$8 sps:$4 sm:$0xff]   ;;  %v11374_v33 = vld [vmem:[#allocation2 + $0x16e4] ss:$8 sps:$4 sm:$0xff]  }
 0x66c   :  { %v11378_v36 = vld [vmem:[#allocation2 + $0x16d0] ss:$8 sps:$4 sm:$0xff]  }
 0x66d   :  { %v5660_v38 = vpack.c.bf16 %v5658_v35, %v5656_v34  ;;  %v11372_v34 = vld [vmem:[#allocation2 + $0x16e0] ss:$8 sps:$4 sm:$0xff]   ;;  %v11380_v35 = vld [vmem:[#allocation2 + $0x16d4] ss:$8 sps:$4 sm:$0xff]  }
 0x66f   :  { %5830 = vmatprep.mubr.bf16.mxu0 %v5660_v38  ;;  %v11384_v38 = vld [vmem:[#allocation2 + $0x16c0] ss:$8 sps:$4 sm:$0xff]  }
 0x670   :  { %5831 = vmatmul.mubr.bf16.vlgmr.msra.gmra.mxu0 %v5659_v42  ;;  %v11396_v42 = vld [vmem:[#allocation2 + $0x16a0] ss:$8 sps:$4 sm:$0xff]  }
 0x671   :  { %6886 = vmatpush1.bf16.msra.mxu0 %v11216_v39  ;;  %6917 = vmatprep.mubr.bf16.mxu0 %v11314_v40  ;;  %v11392_v39 = vld [vmem:[#allocation2 + $0x16b4] ss:$8 sps:$4 sm:$0xff]   ;;  %v11390_v40 = vld [vmem:[#allocation2 + $0x16b0] ss:$8 sps:$4 sm:$0xff]  }
 0x672   :  { %6887 = vmatprep.subr.bf16.mxu0 %v11224_v43  ;;  %v11404_v43 = vld [vmem:[#allocation2 + $0x1694] ss:$8 sps:$4 sm:$0xff]  }
 0x675   :  { %6888 = vmatpush1.bf16.msra.mxu0 %v11222_v46  ;;  %v11408_v46 = vld [vmem:[#allocation2 + $0x1680] ss:$8 sps:$4 sm:$0xff]  }
 0x676   :  { %6889 = vmatprep.subr.bf16.mxu0 %v11230_v47  ;;  %v11419_v47 = vld [vmem:[#allocation2 + $0x1874] ss:$8 sps:$4 sm:$0xff]  }
 0x679   :  { %6890 = vmatpush1.bf16.msra.mxu0 %v11228_v48  ;;  %v11414_v48 = vld [vmem:[%s12112_s0 + $0x150] ss:$40 sps:$4 sm:$0xff]  }
 0x67a   :  { %6891 = vmatprep.subr.bf16.mxu0 %v11236_v49  ;;  %v11417_v49 = vld [vmem:[#allocation2 + $0x1870] ss:$8 sps:$4 sm:$0xff]  }
 0x67d   :  { %6892 = vmatpush1.bf16.msra.mxu0 %v11234_v50  ;;  %v11470_v50 = vld [vmem:[%s12112_s0 + $0x164] ss:$40 sps:$4 sm:$0xff]  }
 0x67e   :  { %6893 = vmatprep.subr.bf16.mxu0 %v11242_v51  ;;  %v11425_v51 = vld [vmem:[#allocation2 + $0x1864] ss:$8 sps:$4 sm:$0xff]  }
 0x681   :  { %6894 = vmatpush1.bf16.msra.mxu0 %v11240_v52  ;;  %v11423_v52 = vld [vmem:[#allocation2 + $0x1860] ss:$8 sps:$4 sm:$0xff]  }
 0x682   :  { %6895 = vmatprep.subr.bf16.mxu0 %v11248_v53  ;;  %v11428_v53 = vld [vmem:[#allocation2 + $0x1854] ss:$8 sps:$4 sm:$0xff]  }
 0x685   :  { %6896 = vmatpush1.bf16.msra.mxu0 %v11246_v54  ;;  %v11426_v54 = vld [vmem:[#allocation2 + $0x1850] ss:$8 sps:$4 sm:$0xff]  }
 0x686   :  { %6897 = vmatprep.subr.bf16.mxu0 %v11254_v55  ;;  %v11431_v55 = vld [vmem:[#allocation2 + $0x1844] ss:$8 sps:$4 sm:$0xff]  }
 0x689   :  { %6898 = vmatpush1.bf16.msra.mxu0 %v11252_v56  ;;  %v11429_v56 = vld [vmem:[#allocation2 + $0x1840] ss:$8 sps:$4 sm:$0xff]  }
 0x68a   :  { %6899 = vmatprep.subr.bf16.mxu0 %v11260_v59  ;;  %v11434_v59 = vld [vmem:[#allocation2 + $0x1834] ss:$8 sps:$4 sm:$0xff]  }
 0x68d   :  { %6900 = vmatpush1.bf16.msra.mxu0 %v11258_v60  ;;  %v11432_v60 = vld [vmem:[#allocation2 + $0x1830] ss:$8 sps:$4 sm:$0xff]  }
 0x68e   :  { %6901 = vmatprep.subr.bf16.mxu0 %v11266_v61  ;;  %v11437_v61 = vld [vmem:[#allocation2 + $0x1824] ss:$8 sps:$4 sm:$0xff]  }
 0x691   :  { %6902 = vmatpush2.bf16.msra.mxu0 %v11264_v62  ;;  %v11435_v62 = vld [vmem:[#allocation2 + $0x1820] ss:$8 sps:$4 sm:$0xff]  }
 0x692   :  { %6903 = vmatprep.subr.bf16.mxu0 %v11272_v63  ;;  %v11440_v63 = vld [vmem:[#allocation2 + $0x1814] ss:$8 sps:$4 sm:$0xff]  }
 0x695   :  { %6904 = vmatpush2.bf16.msra.mxu0 %v11270_v0  ;;  %v11438_v0 = vld [vmem:[#allocation2 + $0x1810] ss:$8 sps:$4 sm:$0xff]  }
 0x696   :  { %6905 = vmatprep.subr.bf16.mxu0 %v11278_v1  ;;  %v11443_v1 = vld [vmem:[#allocation2 + $0x1804] ss:$8 sps:$4 sm:$0xff]  }
 0x699   :  { %6906 = vmatpush2.bf16.msra.mxu0 %v11276_v2  ;;  %v11441_v2 = vld [vmem:[#allocation2 + $0x1800] ss:$8 sps:$4 sm:$0xff]  }
 0x69a   :  { %6907 = vmatprep.subr.bf16.mxu0 %v11284_v3  ;;  %v11446_v3 = vld [vmem:[#allocation2 + $0x18f4] ss:$8 sps:$4 sm:$0xff]  }
 0x69d   :  { %6908 = vmatpush2.bf16.msra.mxu0 %v11282_v4  ;;  %v11444_v4 = vld [vmem:[#allocation2 + $0x18f0] ss:$8 sps:$4 sm:$0xff]  }
 0x69e   :  { %6909 = vmatprep.subr.bf16.mxu0 %v11290_v5  ;;  %v11449_v5 = vld [vmem:[#allocation2 + $0x18e4] ss:$8 sps:$4 sm:$0xff]  }
 0x6a1   :  { %6910 = vmatpush2.bf16.msra.mxu0 %v11288_v6  ;;  %v11447_v6 = vld [vmem:[#allocation2 + $0x18e0] ss:$8 sps:$4 sm:$0xff]  }
 0x6a2   :  { %6911 = vmatprep.subr.bf16.mxu0 %v11296_v7  ;;  %v11452_v7 = vld [vmem:[#allocation2 + $0x18d4] ss:$8 sps:$4 sm:$0xff]  }
 0x6a5   :  { %6912 = vmatpush2.bf16.msra.mxu0 %v11294_v8  ;;  %v11450_v8 = vld [vmem:[#allocation2 + $0x18d0] ss:$8 sps:$4 sm:$0xff]  }
 0x6a6   :  { %6913 = vmatprep.subr.bf16.mxu0 %v11302_v9  ;;  %v11455_v9 = vld [vmem:[#allocation2 + $0x18c4] ss:$8 sps:$4 sm:$0xff]  }
 0x6a9   :  { %6914 = vmatpush2.bf16.msra.mxu0 %v11300_v10  ;;  %v11453_v10 = vld [vmem:[#allocation2 + $0x18c0] ss:$8 sps:$4 sm:$0xff]  }
 0x6aa   :  { %6915 = vmatprep.subr.bf16.mxu0 %v11308_v11  ;;  %v11458_v11 = vld [vmem:[#allocation2 + $0x18b4] ss:$8 sps:$4 sm:$0xff]  }
 0x6ad   :  { %6916 = vmatpush2.bf16.msra.mxu0 %v11306_v12  ;;  %v11456_v12 = vld [vmem:[#allocation2 + $0x18b0] ss:$8 sps:$4 sm:$0xff]  }
 0x6ae   :  { %6971 = vmatprep.subr.bf16.mxu0 %v11317_v13  ;;  %v11461_v13 = vld [vmem:[#allocation2 + $0x18a4] ss:$8 sps:$4 sm:$0xff]  }
 0x6b0   :  { %6918 = vmatmul.mubr.bf16.vlgmr.msra.gmra.mxu0 %v11312_v14  ;;  %v11459_v14 = vld [vmem:[#allocation2 + $0x18a0] ss:$8 sps:$4 sm:$0xff]  }
 0x6b1   :  { %6972 = vmatpush1.bf16.msra.mxu0 %v11315_v15  ;;  %7003 = vmatprep.mubr.bf16.mxu0 %v11416_v16  ;;  %v11464_v15 = vld [vmem:[#allocation2 + $0x1894] ss:$8 sps:$4 sm:$0xff]   ;;  %v11462_v16 = vld [vmem:[#allocation2 + $0x1890] ss:$8 sps:$4 sm:$0xff]  }
 0x6b2   :  { %6973 = vmatprep.subr.bf16.mxu0 %v11326_v17  ;;  %v11467_v17 = vld [vmem:[#allocation2 + $0x1884] ss:$8 sps:$4 sm:$0xff]  }
 0x6b5   :  { %6974 = vmatpush1.bf16.msra.mxu0 %v11324_v18  ;;  %v11465_v18 = vld [vmem:[#allocation2 + $0x1880] ss:$8 sps:$4 sm:$0xff]  }
 0x6b6   :  { %6975 = vmatprep.subr.bf16.mxu0 %v11332_v19  ;;  %v11468_v19 = vld [vmem:[%s12112_s0 + $0x160] ss:$40 sps:$4 sm:$0xff]  }
 0x6b9   :  { %6976 = vmatpush1.bf16.msra.mxu0 %v11330_v20 }
 0x6ba   :  { %6977 = vmatprep.subr.bf16.mxu0 %v11338_v21 }
 0x6bd   :  { %6978 = vmatpush1.bf16.msra.mxu0 %v11336_v22 }
 0x6be   :  { %6979 = vmatprep.subr.bf16.mxu0 %v11344_v23 }
 0x6c1   :  { %6980 = vmatpush1.bf16.msra.mxu0 %v11342_v24  ;;  %v9518_v24 = vld [vmem:[#allocation7 + $0x3] ss:$0 sm:$0xff] }
 0x6c2   :  { %6981 = vmatprep.subr.bf16.mxu0 %v11350_v25 }
 0x6c5   :  { %6982 = vmatpush1.bf16.msra.mxu0 %v11348_v26 }
 0x6c6   :  { %6983 = vmatprep.subr.bf16.mxu0 %v11356_v27 }
 0x6c9   :  { %6984 = vmatpush1.bf16.msra.mxu0 %v11354_v28 }
 0x6ca   :  { %6985 = vmatprep.subr.bf16.mxu0 %v11362_v29  ;;  %v11471_v29 = vld [vmem:[#allocation6 + $0x278] sm:$0xff]  }
 0x6cb   :  { %10076 = vmatprep.subr.bf16.mxu1 %v11471_v29  ;;  %v11624_v29 = vld [vmem:[#allocation2 + $0x1c24] ss:$8 sps:$4 sm:$0xff]  }
 0x6cd   :  { %6986 = vmatpush1.bf16.msra.mxu0 %v11360_v30  ;;  %v11472_v30 = vld [vmem:[#allocation6 + $0x238] sm:$0xff]  }
 0x6ce   :  { %6987 = vmatprep.subr.bf16.mxu0 %v11368_v31  ;;  %v11473_v31 = vld [vmem:[#allocation6 + $0x270] sm:$0xff]   ;;  %10077 = vmatpush3.bf16.msra.mxu1 %v11472_v30 }
 0x6cf   :  { %10078 = vmatprep.subr.bf16.mxu1 %v11473_v31  ;;  %v11622_v30 = vld [vmem:[#allocation2 + $0x1c20] ss:$8 sps:$4 sm:$0xff]  }
 0x6d1   :  { %6988 = vmatpush2.bf16.msra.mxu0 %v11366_v32 }
 0x6d2   :  { %6989 = vmatprep.subr.bf16.mxu0 %v11374_v33  ;;  %v11474_v33 = vld [vmem:[#allocation6 + $0x230] sm:$0xff]  }
 0x6d3   :  { %10079 = vmatpush3.bf16.msra.mxu1 %v11474_v33  ;;  %v11628_v33 = vld [vmem:[#allocation2 + $0x1c10] ss:$8 sps:$4 sm:$0xff]  }
 0x6d5   :  { %6990 = vmatpush2.bf16.msra.mxu0 %v11372_v34  ;;  %v11475_v34 = vld [vmem:[#allocation6 + $0x268] sm:$0xff]  }
 0x6d6   :  { %6991 = vmatprep.subr.bf16.mxu0 %v11380_v35  ;;  %v11476_v35 = vld [vmem:[#allocation6 + $0x228] sm:$0xff]   ;;  %10080 = vmatprep.subr.bf16.mxu1 %v11475_v34 }
 0x6d7   :  { %10081 = vmatpush3.bf16.msra.mxu1 %v11476_v35  ;;  %v6962_v35 = vpop.f32.mrf.mxu1 }
 0x6d9   :  { %6992 = vmatpush2.bf16.msra.mxu0 %v11378_v36  ;;  %v11477_v36 = vld [vmem:[#allocation6 + $0x260] sm:$0xff]  }
 0x6da   :  { %6993 = vmatprep.subr.bf16.mxu0 %v11386_v37  ;;  %v11478_v37 = vld [vmem:[#allocation6 + $0x220] sm:$0xff]   ;;  %10082 = vmatprep.subr.bf16.mxu1 %v11477_v36 }
 0x6db   :  { %10083 = vmatpush3.bf16.msra.mxu1 %v11478_v37  ;;  %v11636_v36 = vld [vmem:[#allocation2 + $0x1c04] ss:$8 sps:$4 sm:$0xff]   ;;  %v11634_v37 = vld [vmem:[#allocation2 + $0x1c00] ss:$8 sps:$4 sm:$0xff]  }
 0x6dd   :  { %6994 = vmatpush2.bf16.msra.mxu0 %v11384_v38  ;;  %v11479_v38 = vld [vmem:[#allocation6 + $0x258] sm:$0xff]  }
 0x6de   :  { %6995 = vmatprep.subr.bf16.mxu0 %v11392_v39  ;;  %v11480_v39 = vld [vmem:[#allocation6 + $0x218] sm:$0xff]   ;;  %10084 = vmatprep.subr.bf16.mxu1 %v11479_v38 }
 0x6df   :  { %10085 = vmatpush3.bf16.msra.mxu1 %v11480_v39  ;;  %v6964_v39 = vpop.f32.mrf.mxu1 }
 0x6e1   :  { %6996 = vmatpush2.bf16.msra.mxu0 %v11390_v40  ;;  %v11481_v40 = vld [vmem:[#allocation6 + $0x250] sm:$0xff]  }
 0x6e2   :  { %6997 = vmatprep.subr.bf16.mxu0 %v11398_v41  ;;  %v11482_v41 = vld [vmem:[#allocation6 + $0x210] sm:$0xff]   ;;  %10086 = vmatprep.subr.bf16.mxu1 %v11481_v40 }
 0x6e3   :  { %10087 = vmatpush3.bf16.msra.mxu1 %v11482_v41  ;;  %v11642_v40 = vld [vmem:[#allocation2 + $0x1cf4] ss:$8 sps:$4 sm:$0xff]   ;;  %v11640_v41 = vld [vmem:[#allocation2 + $0x1cf0] ss:$8 sps:$4 sm:$0xff]  }
 0x6e5   :  { %6998 = vmatpush2.bf16.msra.mxu0 %v11396_v42  ;;  %v11483_v42 = vld [vmem:[#allocation6 + $0x248] sm:$0xff]  }
 0x6e6   :  { %6999 = vmatprep.subr.bf16.mxu0 %v11404_v43  ;;  %v11484_v43 = vld [vmem:[#allocation6 + $0x208] sm:$0xff]   ;;  %10088 = vmatprep.subr.bf16.mxu1 %v11483_v42 }
 0x6e7   :  { %10089 = vmatpush3.bf16.msra.mxu1 %v11484_v43  ;;  %v6966_v43 = vpop.f32.mrf.mxu1 }
 0x6e9   :  { %7000 = vmatpush2.bf16.msra.mxu0 %v11402_v44  ;;  %v11485_v44 = vld [vmem:[#allocation6 + $0x240] sm:$0xff]  }
 0x6ea   :  { %7001 = vmatprep.subr.bf16.mxu0 %v11410_v45  ;;  %v11486_v45 = vld [vmem:[#allocation6 + $0x200] sm:$0xff]   ;;  %10090 = vmatprep.subr.bf16.mxu1 %v11485_v44  ;;  %v6023_v44 = vld [vmem:[#allocation4 + $0x8] sm:$0x3] }
 0x6eb   :  { %10091 = vmatpush3.bf16.msra.mxu1 %v11486_v45 }
 0x6ed   :  { %7002 = vmatpush2.bf16.msra.mxu0 %v11408_v46  ;;  %v11489_v46 = vld [vmem:[#allocation2 + $0x1974] ss:$8 sps:$4 sm:$0xff]  }
 0x6ee   :  { %7057 = vmatprep.subr.bf16.mxu0 %v11419_v47  ;;  %8330 = vmatprep.subr.bf16.mxu1 %v11489_v46  ;;  %v11492_v47 = vld [vmem:[#allocation2 + $0x1a74] ss:$8 sps:$4 sm:$0xff]   ;;  %v11648_v46 = vld [vmem:[#allocation2 + $0x1ce4] ss:$8 sps:$4 sm:$0xff]  }
 0x6f0   :  { %7004 = vmatmul.mubr.bf16.vlgmr.msra.gmra.mxu0 %v11414_v48  ;;  %v11490_v48 = vld [vmem:[#allocation2 + $0x1a70] ss:$8 sps:$4 sm:$0xff]  }
 0x6f1   :  { %7058 = vmatpush1.bf16.msra.mxu0 %v11417_v49  ;;  %7089 = vmatprep.mubr.bf16.mxu0 %v11470_v50  ;;  %v11498_v49 = vld [vmem:[#allocation2 + $0x1a64] ss:$8 sps:$4 sm:$0xff]   ;;  %v11496_v50 = vld [vmem:[#allocation2 + $0x1a60] ss:$8 sps:$4 sm:$0xff]  }
 0x6f2   :  { %7059 = vmatprep.subr.bf16.mxu0 %v11425_v51  ;;  %v11504_v51 = vld [vmem:[#allocation2 + $0x1a54] ss:$8 sps:$4 sm:$0xff]  }
 0x6f5   :  { %7060 = vmatpush1.bf16.msra.mxu0 %v11423_v52  ;;  %v11502_v52 = vld [vmem:[#allocation2 + $0x1a50] ss:$8 sps:$4 sm:$0xff]  }
 0x6f6   :  { %7061 = vmatprep.subr.bf16.mxu0 %v11428_v53  ;;  %v11510_v53 = vld [vmem:[#allocation2 + $0x1a44] ss:$8 sps:$4 sm:$0xff]  }
 0x6f9   :  { %7062 = vmatpush1.bf16.msra.mxu0 %v11426_v54  ;;  %v11508_v54 = vld [vmem:[#allocation2 + $0x1a40] ss:$8 sps:$4 sm:$0xff]  }
 0x6fa   :  { %7063 = vmatprep.subr.bf16.mxu0 %v11431_v55  ;;  %v11516_v55 = vld [vmem:[#allocation2 + $0x1a34] ss:$8 sps:$4 sm:$0xff]  }
 0x6fd   :  { %7064 = vmatpush1.bf16.msra.mxu0 %v11429_v56  ;;  %v11514_v56 = vld [vmem:[#allocation2 + $0x1a30] ss:$8 sps:$4 sm:$0xff]  }
 0x6fe   :  { %7065 = vmatprep.subr.bf16.mxu0 %v11434_v59  ;;  %v11522_v59 = vld [vmem:[#allocation2 + $0x1a24] ss:$8 sps:$4 sm:$0xff]  }
 0x701   :  { %7066 = vmatpush1.bf16.msra.mxu0 %v11432_v60  ;;  %v11520_v60 = vld [vmem:[#allocation2 + $0x1a20] ss:$8 sps:$4 sm:$0xff]  }
 0x702   :  { %7067 = vmatprep.subr.bf16.mxu0 %v11437_v61  ;;  %v11528_v61 = vld [vmem:[#allocation2 + $0x1a14] ss:$8 sps:$4 sm:$0xff]  }
 0x705   :  { %7068 = vmatpush1.bf16.msra.mxu0 %v11435_v62  ;;  %v11526_v62 = vld [vmem:[#allocation2 + $0x1a10] ss:$8 sps:$4 sm:$0xff]  }
 0x706   :  { %7069 = vmatprep.subr.bf16.mxu0 %v11440_v63  ;;  %v11534_v63 = vld [vmem:[#allocation2 + $0x1a04] ss:$8 sps:$4 sm:$0xff]  }
 0x709   :  { %7070 = vmatpush1.bf16.msra.mxu0 %v11438_v0  ;;  %v11532_v0 = vld [vmem:[#allocation2 + $0x1a00] ss:$8 sps:$4 sm:$0xff]  }
 0x70a   :  { %7071 = vmatprep.subr.bf16.mxu0 %v11443_v1  ;;  %v11540_v1 = vld [vmem:[#allocation2 + $0x1af4] ss:$8 sps:$4 sm:$0xff]  }
 0x70d   :  { %7072 = vmatpush1.bf16.msra.mxu0 %v11441_v2  ;;  %v11538_v2 = vld [vmem:[#allocation2 + $0x1af0] ss:$8 sps:$4 sm:$0xff]  }
 0x70e   :  { %7073 = vmatprep.subr.bf16.mxu0 %v11446_v3  ;;  %v11546_v3 = vld [vmem:[#allocation2 + $0x1ae4] ss:$8 sps:$4 sm:$0xff]  }
 0x711   :  { %7074 = vmatpush2.bf16.msra.mxu0 %v11444_v4  ;;  %v11544_v4 = vld [vmem:[#allocation2 + $0x1ae0] ss:$8 sps:$4 sm:$0xff]  }
 0x712   :  { %7075 = vmatprep.subr.bf16.mxu0 %v11449_v5  ;;  %v11552_v5 = vld [vmem:[#allocation2 + $0x1ad4] ss:$8 sps:$4 sm:$0xff]  }
 0x715   :  { %7076 = vmatpush2.bf16.msra.mxu0 %v11447_v6  ;;  %v11550_v6 = vld [vmem:[#allocation2 + $0x1ad0] ss:$8 sps:$4 sm:$0xff]  }
 0x716   :  { %7077 = vmatprep.subr.bf16.mxu0 %v11452_v7  ;;  %v11558_v7 = vld [vmem:[#allocation2 + $0x1ac4] ss:$8 sps:$4 sm:$0xff]  }
 0x719   :  { %7078 = vmatpush2.bf16.msra.mxu0 %v11450_v8  ;;  %v11556_v8 = vld [vmem:[#allocation2 + $0x1ac0] ss:$8 sps:$4 sm:$0xff]  }
 0x71a   :  { %7079 = vmatprep.subr.bf16.mxu0 %v11455_v9  ;;  %v11564_v9 = vld [vmem:[#allocation2 + $0x1ab4] ss:$8 sps:$4 sm:$0xff]  }
 0x71d   :  { %7080 = vmatpush2.bf16.msra.mxu0 %v11453_v10  ;;  %v11562_v10 = vld [vmem:[#allocation2 + $0x1ab0] ss:$8 sps:$4 sm:$0xff]  }
 0x71e   :  { %7081 = vmatprep.subr.bf16.mxu0 %v11458_v11  ;;  %v11570_v11 = vld [vmem:[#allocation2 + $0x1aa4] ss:$8 sps:$4 sm:$0xff]  }
 0x721   :  { %7082 = vmatpush2.bf16.msra.mxu0 %v11456_v12  ;;  %v11568_v12 = vld [vmem:[#allocation2 + $0x1aa0] ss:$8 sps:$4 sm:$0xff]  }
 0x722   :  { %7083 = vmatprep.subr.bf16.mxu0 %v11461_v13  ;;  %v11576_v13 = vld [vmem:[#allocation2 + $0x1a94] ss:$8 sps:$4 sm:$0xff]  }
 0x725   :  { %7084 = vmatpush2.bf16.msra.mxu0 %v11459_v14  ;;  %v11574_v14 = vld [vmem:[#allocation2 + $0x1a90] ss:$8 sps:$4 sm:$0xff]  }
 0x726   :  { %7085 = vmatprep.subr.bf16.mxu0 %v11464_v15  ;;  %v11582_v15 = vld [vmem:[#allocation2 + $0x1a84] ss:$8 sps:$4 sm:$0xff]  }
 0x729   :  { %7086 = vmatpush2.bf16.msra.mxu0 %v11462_v16  ;;  %v11580_v16 = vld [vmem:[#allocation2 + $0x1a80] ss:$8 sps:$4 sm:$0xff]  }
 0x72a   :  { %7087 = vmatprep.subr.bf16.mxu0 %v11467_v17  ;;  %v11591_v17 = vld [vmem:[%s12112_s0 + $0x19c] ss:$40 sps:$4 sm:$0xff]  }
 0x72d   :  { %7088 = vmatpush2.bf16.msra.mxu0 %v11465_v18  ;;  %v11589_v18 = vld [vmem:[%s12112_s0 + $0x198] ss:$40 sps:$4 sm:$0xff]  }
 0x72e   :  { %8373 = vmatprep.subr.bf16.mxu0 %v11492_v47  ;;  %v11646_v47 = vld [vmem:[#allocation2 + $0x1ce0] ss:$8 sps:$4 sm:$0xff]  }
 0x730   :  { %7090 = vmatmul.mubr.bf16.vlgmr.msra.gmra.mxu0 %v11468_v19  ;;  %v10070_v20 = vpop.f32.mrf.mxu0  ;;  %v11594_v19 = vld [vmem:[#allocation2 + $0x1c74] ss:$8 sps:$4 sm:$0xff]  }
 0x731   :  { %8374 = vmatpush1.bf16.msra.mxu0 %v11490_v48  ;;  %8405 = vmatprep.mubr.bf16.mxu0 %v11591_v17  ;;  %v6968_v48 = vpop.f32.mrf.mxu1 }
 0x732   :  { %v10071_v21 = vpop.f32.mrf.mxu0  ;;  %8375 = vmatprep.subr.bf16.mxu0 %v11498_v49  ;;  %v6032_v49 = vrot.slane %v6023_v44, %v11934_v57 }
 0x733   :  { %v10072_v23 = vadd.f32 %v10071_v21, %v10070_v20  ;;  %v11592_v20 = vld [vmem:[#allocation2 + $0x1c70] ss:$8 sps:$4 sm:$0xff]   ;;  %v11600_v21 = vld [vmem:[#allocation2 + $0x1c64] ss:$8 sps:$4 sm:$0xff]  }
 0x734   :  { %v10073_v22 = vpop.f32.mrf.mxu0 }
 0x735   :  { %v5833_v27 = vadd.f32 %v10072_v23, %v9518_v24  ;;  %8376 = vmatpush1.bf16.msra.mxu0 %v11496_v50  ;;  %v11606_v23 = vld [vmem:[#allocation2 + $0x1c54] ss:$8 sps:$4 sm:$0xff]   ;;  %v6028_v50 = vrot.slane %v6023_v44, %v11936_v58 }
 0x736   :  { %v10074_v25 = vpop.f32.mrf.mxu0  ;;  %8377 = vmatprep.subr.bf16.mxu0 %v11504_v51  ;;  %v11501_v44 = vld [vmem:[#allocation2 + $0x1954] ss:$8 sps:$4 sm:$0xff]  }
 0x737   :  { %v10075_v26 = vadd.f32 %v10074_v25, %v10073_v22  ;;  %v11598_v22 = vld [vmem:[#allocation2 + $0x1c60] ss:$8 sps:$4 sm:$0xff]   ;;  %v11612_v25 = vld [vmem:[#allocation2 + $0x1c44] ss:$8 sps:$4 sm:$0xff]  }
 0x739   :  { %v5836_v28 = vadd.f32 %v10075_v26, %v9518_v24  ;;  %8378 = vmatpush1.bf16.msra.mxu0 %v11502_v52  ;;  %v11604_v24 = vld [vmem:[#allocation2 + $0x1c50] ss:$8 sps:$4 sm:$0xff]   ;;  %v11610_v26 = vld [vmem:[#allocation2 + $0x1c40] ss:$8 sps:$4 sm:$0xff]   ;;  %v7048_v52 = vpop.f32.mrf.mxu1 }
 0x73a   :  { %8379 = vmatprep.subr.bf16.mxu0 %v11510_v53  ;;  %v11654_v53 = vld [vmem:[#allocation2 + $0x1cd4] ss:$8 sps:$4 sm:$0xff]  }
 0x73b   :  { %v9971_v32 = vpack.c.bf16 %v5836_v28, %v5833_v27  ;;  %v11618_v27 = vld [vmem:[#allocation2 + $0x1c34] ss:$8 sps:$4 sm:$0xff]   ;;  %v11616_v28 = vld [vmem:[#allocation2 + $0x1c30] ss:$8 sps:$4 sm:$0xff]  }
 0x73d   :  { %9985 = vst [vmem:[%s12117_s5 + $0x18] sm:$0xff] %v9971_v32   ;;  %8380 = vmatpush1.bf16.msra.mxu0 %v11508_v54  ;;  %v11630_v32 = vld [vmem:[#allocation2 + $0x1c14] ss:$8 sps:$4 sm:$0xff]   ;;  %v11652_v54 = vld [vmem:[#allocation2 + $0x1cd0] ss:$8 sps:$4 sm:$0xff]  }
 0x73e   :  { %8381 = vmatprep.subr.bf16.mxu0 %v11516_v55 }
 0x741   :  { %8382 = vmatpush1.bf16.msra.mxu0 %v11514_v56 }
 0x742   :  { %8383 = vmatprep.subr.bf16.mxu0 %v11522_v59 }
 0x745   :  { %8384 = vmatpush1.bf16.msra.mxu0 %v11520_v60 }
 0x746   :  { %8385 = vmatprep.subr.bf16.mxu0 %v11528_v61  ;;  %v7050_v61 = vpop.f32.mrf.mxu1 }
 0x749   :  { %8386 = vmatpush1.bf16.msra.mxu0 %v11526_v62  ;;  %v11660_v62 = vld [vmem:[#allocation2 + $0x1cc4] ss:$8 sps:$4 sm:$0xff]  }
 0x74a   :  { %8387 = vmatprep.subr.bf16.mxu0 %v11534_v63 }
 0x74d   :  { %8388 = vmatpush1.bf16.msra.mxu0 %v11532_v0  ;;  %v11658_v0 = vld [vmem:[#allocation2 + $0x1cc0] ss:$8 sps:$4 sm:$0xff]  }
 0x74e   :  { %8389 = vmatprep.subr.bf16.mxu0 %v11540_v1 }
 0x751   :  { %8390 = vmatpush2.bf16.msra.mxu0 %v11538_v2 }
 0x752   :  { %8391 = vmatprep.subr.bf16.mxu0 %v11546_v3 }
 0x755   :  { %8392 = vmatpush2.bf16.msra.mxu0 %v11544_v4 }
 0x756   :  { %8393 = vmatprep.subr.bf16.mxu0 %v11552_v5  ;;  %v7052_v5 = vpop.f32.mrf.mxu1 }
 0x759   :  { %8394 = vmatpush2.bf16.msra.mxu0 %v11550_v6  ;;  %v11666_v6 = vld [vmem:[#allocation2 + $0x1cb4] ss:$8 sps:$4 sm:$0xff]  }
 0x75a   :  { %8395 = vmatprep.subr.bf16.mxu0 %v11558_v7 }
 0x75d   :  { %8396 = vmatpush2.bf16.msra.mxu0 %v11556_v8 }
 0x75e   :  { %8397 = vmatprep.subr.bf16.mxu0 %v11564_v9 }
 0x761   :  { %8398 = vmatpush2.bf16.msra.mxu0 %v11562_v10  ;;  %v11664_v10 = vld [vmem:[#allocation2 + $0x1cb0] ss:$8 sps:$4 sm:$0xff]  }
 0x762   :  { %8399 = vmatprep.subr.bf16.mxu0 %v11570_v11 }
 0x765   :  { %8400 = vmatpush2.bf16.msra.mxu0 %v11568_v12 }
 0x766   :  { %8401 = vmatprep.subr.bf16.mxu0 %v11576_v13 }
 0x769   :  { %8402 = vmatpush2.bf16.msra.mxu0 %v11574_v14  ;;  %v7054_v14 = vpop.f32.mrf.mxu1 }
 0x76a   :  { %8403 = vmatprep.subr.bf16.mxu0 %v11582_v15 }
 0x76d   :  { %8404 = vmatpush2.bf16.msra.mxu0 %v11580_v16  ;;  %v11672_v16 = vld [vmem:[#allocation2 + $0x1ca4] ss:$8 sps:$4 sm:$0xff]  }
 0x76e   :  { %8459 = vmatprep.subr.bf16.mxu0 %v11594_v19  ;;  %v11670_v19 = vld [vmem:[#allocation2 + $0x1ca0] ss:$8 sps:$4 sm:$0xff]  }
 0x770   :  { %8406 = vmatmul.mubr.bf16.vlgmr.msra.gmra.mxu0 %v11589_v18  ;;  %v6919_v31 = vpop.f32.mrf.mxu0 }
 0x771   :  { %8460 = vmatpush1.bf16.msra.mxu0 %v11592_v20  ;;  %v6920_v59 = vadd.f32 %v6919_v31, %v6028_v50 }
 0x772   :  { %8461 = vmatprep.subr.bf16.mxu0 %v11600_v21  ;;  %v6921_v34 = vpop.f32.mrf.mxu0 }
 0x773   :  { %v6922_v55 = vadd.f32 %v6921_v34, %v6032_v49  ;;  %v6963_v3 = vadd.f32 %v6962_v35, %v6920_v59  ;;  %v11684_v34 = vld [vmem:[#allocation2 + $0x1c84] ss:$8 sps:$4 sm:$0xff]   ;;  %v11535_v59 = vld [vmem:[#allocation2 + $0x19f0] ss:$8 sps:$4 sm:$0xff]  }
 0x774   :  { %v6923_v38 = vpop.f32.mrf.mxu0 }
 0x775   :  { %8462 = vmatpush1.bf16.msra.mxu0 %v11598_v22  ;;  %v6924_v56 = vadd.f32 %v6923_v38, %v6028_v50  ;;  %v6965_v1 = vadd.f32 %v6964_v39, %v6922_v55  ;;  %v11682_v38 = vld [vmem:[#allocation2 + $0x1c80] ss:$8 sps:$4 sm:$0xff]   ;;  %v11519_v50 = vld [vmem:[#allocation2 + $0x1924] ss:$8 sps:$4 sm:$0xff]  }
 0x776   :  { %8463 = vmatprep.subr.bf16.mxu0 %v11606_v23  ;;  %v6925_v42 = vpop.f32.mrf.mxu0  ;;  %v11529_v55 = vld [vmem:[#allocation2 + $0x1900] ss:$8 sps:$4 sm:$0xff]  }
 0x777   :  { %v6926_v63 = vadd.f32 %v6925_v42, %v6032_v49  ;;  %v6967_v2 = vadd.f32 %v6966_v43, %v6924_v56  ;;  %v11691_v42 = vld [vmem:[%s12112_s0 + $0x1a8] ss:$40 sps:$4 sm:$0xff]   ;;  %v11537_v56 = vld [vmem:[#allocation2 + $0x19f4] ss:$8 sps:$4 sm:$0xff]  }
 0x778   :  { %v11493_v43 = vld [vmem:[#allocation2 + $0x1960] ss:$8 sps:$4 sm:$0xff]   ;;  %v11511_v49 = vld [vmem:[#allocation2 + $0x1930] ss:$8 sps:$4 sm:$0xff]  }
 0x779   :  { %8464 = vmatpush1.bf16.msra.mxu0 %v11604_v24  ;;  %v6969_v7 = vadd.f32 %v6968_v48, %v6926_v63  ;;  %v11513_v48 = vld [vmem:[#allocation2 + $0x1934] ss:$8 sps:$4 sm:$0xff]   ;;  %v11547_v63 = vld [vmem:[#allocation2 + $0x19d0] ss:$8 sps:$4 sm:$0xff]  }
 0x77a   :  { %8465 = vmatprep.subr.bf16.mxu0 %v11612_v25 }
 0x77d   :  { %8466 = vmatpush1.bf16.msra.mxu0 %v11610_v26 }
 0x77e   :  { %8467 = vmatprep.subr.bf16.mxu0 %v11618_v27  ;;  %v11678_v27 = vld [vmem:[#allocation2 + $0x1c94] ss:$8 sps:$4 sm:$0xff]  }
 0x781   :  { %8468 = vmatpush1.bf16.msra.mxu0 %v11616_v28 }
 0x782   :  { %8469 = vmatprep.subr.bf16.mxu0 %v11624_v29  ;;  %v11676_v29 = vld [vmem:[#allocation2 + $0x1c90] ss:$8 sps:$4 sm:$0xff]  }
 0x785   :  { %8470 = vmatpush1.bf16.msra.mxu0 %v11622_v30 }
 0x786   :  { %8471 = vmatprep.subr.bf16.mxu0 %v11630_v32 }
 0x789   :  { %8472 = vmatpush1.bf16.msra.mxu0 %v11628_v33 }
 0x78a   :  { %8473 = vmatprep.subr.bf16.mxu0 %v11636_v36  ;;  %v11487_v36 = vld [vmem:[#allocation2 + $0x1970] ss:$8 sps:$4 sm:$0xff]  }
 0x78d   :  { %8474 = vmatpush1.bf16.msra.mxu0 %v11634_v37  ;;  %v11585_v37 = vld [vmem:[%s12112_s0 + $0x194] ss:$40 sps:$4 sm:$0xff]  }
 0x78e   :  { %8475 = vmatprep.subr.bf16.mxu0 %v11642_v40  ;;  %v11495_v40 = vld [vmem:[#allocation2 + $0x1964] ss:$8 sps:$4 sm:$0xff]  }
 0x791   :  { %8476 = vmatpush2.bf16.msra.mxu0 %v11640_v41  ;;  %v11693_v41 = vld [vmem:[%s12112_s0 + $0x1ac] ss:$40 sps:$4 sm:$0xff]  }
 0x792   :  { %8477 = vmatprep.subr.bf16.mxu0 %v11648_v46  ;;  %8491 = vmatprep.mubr.bf16.mxu0 %v11693_v41  ;;  %v11507_v46 = vld [vmem:[#allocation2 + $0x1944] ss:$8 sps:$4 sm:$0xff]   ;;  %v11673_v41 = vld [vmem:[#allocation2 + $0x1b90] ss:$8 sps:$4 sm:$0xff]  }
 0x795   :  { %8478 = vmatpush2.bf16.msra.mxu0 %v11646_v47  ;;  %v11505_v47 = vld [vmem:[#allocation2 + $0x1940] ss:$8 sps:$4 sm:$0xff]  }
 0x796   :  { %8479 = vmatprep.subr.bf16.mxu0 %v11654_v53  ;;  %v11523_v53 = vld [vmem:[#allocation2 + $0x1910] ss:$8 sps:$4 sm:$0xff]  }
 0x799   :  { %8480 = vmatpush2.bf16.msra.mxu0 %v11652_v54  ;;  %v11531_v54 = vld [vmem:[#allocation2 + $0x1904] ss:$8 sps:$4 sm:$0xff]  }
 0x79a   :  { %8481 = vmatprep.subr.bf16.mxu0 %v11660_v62  ;;  %v11549_v62 = vld [vmem:[#allocation2 + $0x19d4] ss:$8 sps:$4 sm:$0xff]  }
 0x79d   :  { %8482 = vmatpush2.bf16.msra.mxu0 %v11658_v0  ;;  %v11555_v0 = vld [vmem:[#allocation2 + $0x19c4] ss:$8 sps:$4 sm:$0xff]  }
 0x79e   :  { %8483 = vmatprep.subr.bf16.mxu0 %v11666_v6  ;;  %v11573_v6 = vld [vmem:[#allocation2 + $0x1994] ss:$8 sps:$4 sm:$0xff]  }
 0x7a1   :  { %8484 = vmatpush2.bf16.msra.mxu0 %v11664_v10  ;;  %v11588_v10 = vld [vmem:[#allocation2 + $0x1b74] ss:$8 sps:$4 sm:$0xff]  }
 0x7a2   :  { %8485 = vmatprep.subr.bf16.mxu0 %v11672_v16  ;;  %v11603_v16 = vld [vmem:[#allocation2 + $0x1b54] ss:$8 sps:$4 sm:$0xff]  }
 0x7a5   :  { %8486 = vmatpush2.bf16.msra.mxu0 %v11670_v19  ;;  %v11607_v19 = vld [vmem:[#allocation2 + $0x1b40] ss:$8 sps:$4 sm:$0xff]  }
 0x7a6   :  { %8487 = vmatprep.subr.bf16.mxu0 %v11678_v27  ;;  %v11631_v27 = vld [vmem:[#allocation2 + $0x1b00] ss:$8 sps:$4 sm:$0xff]  }
 0x7a9   :  { %8488 = vmatpush2.bf16.msra.mxu0 %v11676_v29  ;;  %v11637_v29 = vld [vmem:[#allocation2 + $0x1bf0] ss:$8 sps:$4 sm:$0xff]  }
 0x7aa   :  { %8489 = vmatprep.subr.bf16.mxu0 %v11684_v34  ;;  %v11657_v34 = vld [vmem:[#allocation2 + $0x1bc4] ss:$8 sps:$4 sm:$0xff]  }
 0x7ad   :  { %8490 = vmatpush2.bf16.msra.mxu0 %v11682_v38  ;;  %v11669_v38 = vld [vmem:[#allocation2 + $0x1ba4] ss:$8 sps:$4 sm:$0xff]  }
 0x7b0   :  { %v7005_v45 = vpop.f32.mrf.mxu0  ;;  %8492 = vmatmul.mubr.bf16.vlgmr.msra.gmra.mxu0 %v11691_v42  ;;  %v11681_v42 = vld [vmem:[#allocation2 + $0x1b84] ss:$8 sps:$4 sm:$0xff]  }
 0x7b1   :  { %v7006_v11 = vadd.f32 %v7005_v45, %v6963_v3  ;;  %v11499_v45 = vld [vmem:[#allocation2 + $0x1950] ss:$8 sps:$4 sm:$0xff]  }
 0x7b2   :  { %v7007_v51 = vpop.f32.mrf.mxu0  ;;  %v11559_v3 = vld [vmem:[#allocation2 + $0x19b0] ss:$8 sps:$4 sm:$0xff]  }
 0x7b3   :  { %v7008_v8 = vadd.f32 %v7007_v51, %v6965_v1  ;;  %v7049_v20 = vadd.f32 %v7048_v52, %v7006_v11  ;;  %v11517_v51 = vld [vmem:[#allocation2 + $0x1920] ss:$8 sps:$4 sm:$0xff]   ;;  %v11525_v52 = vld [vmem:[#allocation2 + $0x1914] ss:$8 sps:$4 sm:$0xff]   ;;  %v11583_v11 = vld [vmem:[%s12112_s0 + $0x190] ss:$40 sps:$4 sm:$0xff]  }
 0x7b4   :  { %v7009_v60 = vpop.f32.mrf.mxu0  ;;  %v11553_v1 = vld [vmem:[#allocation2 + $0x19c0] ss:$8 sps:$4 sm:$0xff]  }
 0x7b5   :  { %v7010_v9 = vadd.f32 %v7009_v60, %v6967_v2  ;;  %v7051_v17 = vadd.f32 %v7050_v61, %v7008_v8  ;;  %v11543_v60 = vld [vmem:[#allocation2 + $0x19e4] ss:$8 sps:$4 sm:$0xff]   ;;  %v11541_v61 = vld [vmem:[#allocation2 + $0x19e0] ss:$8 sps:$4 sm:$0xff]   ;;  %v11561_v2 = vld [vmem:[#allocation2 + $0x19b4] ss:$8 sps:$4 sm:$0xff]  }
 0x7b6   :  { %v7011_v4 = vpop.f32.mrf.mxu0  ;;  %v11579_v8 = vld [vmem:[#allocation2 + $0x1984] ss:$8 sps:$4 sm:$0xff]  }
 0x7b7   :  { %v7012_v13 = vadd.f32 %v7011_v4, %v6969_v7  ;;  %v7053_v18 = vadd.f32 %v7052_v5, %v7010_v9  ;;  %v11567_v4 = vld [vmem:[#allocation2 + $0x19a4] ss:$8 sps:$4 sm:$0xff]   ;;  %v11565_v5 = vld [vmem:[#allocation2 + $0x19a0] ss:$8 sps:$4 sm:$0xff]   ;;  %v11571_v7 = vld [vmem:[#allocation2 + $0x1990] ss:$8 sps:$4 sm:$0xff]  }
 0x7b8   :  { %v11577_v9 = vld [vmem:[#allocation2 + $0x1980] ss:$8 sps:$4 sm:$0xff]  }
 0x7b9   :  { %v7055_v22 = vadd.f32 %v7054_v14, %v7012_v13  ;;  %v11687_v13 = vld [vmem:[%s12112_s0 + $0x1a4] ss:$40 sps:$4 sm:$0xff]  }
 0x7ba   :  { %v11597_v14 = vld [vmem:[#allocation2 + $0x1b64] ss:$8 sps:$4 sm:$0xff]  }
 0x7f0   :  { %v7091_v12 = vpop.f32.mrf.mxu0 }
 0x7f1   :  { %v7092_v25 = vadd.f32 %v7091_v12, %v7049_v20  ;;  %v11586_v12 = vld [vmem:[#allocation2 + $0x1b70] ss:$8 sps:$4 sm:$0xff]   ;;  %v11615_v20 = vld [vmem:[#allocation2 + $0x1b34] ss:$8 sps:$4 sm:$0xff]  }
 0x7f2   :  { %v7093_v15 = vpop.f32.mrf.mxu0 }
 0x7f3   :  { %v7094_v23 = vadd.f32 %v7093_v15, %v7051_v17  ;;  %v7100_v33 = vmax.f32 %v7092_v25, 0.0  ;;  %v11595_v15 = vld [vmem:[#allocation2 + $0x1b60] ss:$8 sps:$4 sm:$0xff]   ;;  %v11601_v17 = vld [vmem:[#allocation2 + $0x1b50] ss:$8 sps:$4 sm:$0xff]  }
 0x7f4   :  { %v7095_v21 = vpop.f32.mrf.mxu0  ;;  %v11625_v25 = vld [vmem:[#allocation2 + $0x1b10] ss:$8 sps:$4 sm:$0xff]  }
 0x7f5   :  { %v7096_v24 = vadd.f32 %v7095_v21, %v7053_v18  ;;  %v7101_v31 = vmax.f32 %v7094_v23, 0.0  ;;  %v11609_v18 = vld [vmem:[#allocation2 + $0x1b44] ss:$8 sps:$4 sm:$0xff]   ;;  %v11613_v21 = vld [vmem:[#allocation2 + $0x1b30] ss:$8 sps:$4 sm:$0xff]  }
 0x7f6   :  { %v7097_v26 = vpop.f32.mrf.mxu0  ;;  %v11619_v23 = vld [vmem:[#allocation2 + $0x1b20] ss:$8 sps:$4 sm:$0xff]  }
 0x7f7   :  { %v7098_v28 = vadd.f32 %v7097_v26, %v7055_v22  ;;  %v7102_v30 = vmax.f32 %v7096_v24, 0.0  ;;  %v11621_v22 = vld [vmem:[#allocation2 + $0x1b24] ss:$8 sps:$4 sm:$0xff]   ;;  %v11627_v24 = vld [vmem:[#allocation2 + $0x1b14] ss:$8 sps:$4 sm:$0xff]  }
 0x7f8   :  { %v11633_v26 = vld [vmem:[#allocation2 + $0x1b04] ss:$8 sps:$4 sm:$0xff]  }
 0x7f9   :  { %v7103_v32 = vmax.f32 %v7098_v28, 0.0  ;;  %v7104_v39 = vpack.c.bf16 %v7102_v30, %v7100_v33  ;;  %v11639_v28 = vld [vmem:[#allocation2 + $0x1bf4] ss:$8 sps:$4 sm:$0xff]   ;;  %v11645_v30 = vld [vmem:[#allocation2 + $0x1be4] ss:$8 sps:$4 sm:$0xff]  }
 0x7fa   :  { %v11649_v33 = vld [vmem:[#allocation2 + $0x1bd0] ss:$8 sps:$4 sm:$0xff]  }
 0x7fb   :  { %v7105_v35 = vpack.c.bf16 %v7103_v32, %v7101_v31  ;;  %v11643_v31 = vld [vmem:[#allocation2 + $0x1be0] ss:$8 sps:$4 sm:$0xff]   ;;  %v11651_v32 = vld [vmem:[#allocation2 + $0x1bd4] ss:$8 sps:$4 sm:$0xff]  }
 0x7fd   :  { %7275 = vmatprep.mubr.bf16.mxu1 %v7105_v35  ;;  %v11655_v35 = vld [vmem:[#allocation2 + $0x1bc0] ss:$8 sps:$4 sm:$0xff]  }
 0x7fe   :  { %7276 = vmatmul.mubr.bf16.vlgmr.msra.gmra.mxu1 %v7104_v39  ;;  %v11667_v39 = vld [vmem:[#allocation2 + $0x1ba0] ss:$8 sps:$4 sm:$0xff]  }
 0x7ff   :  { %8331 = vmatpush1.bf16.msra.mxu1 %v11487_v36  ;;  %8362 = vmatprep.mubr.bf16.mxu1 %v11585_v37  ;;  %v11663_v36 = vld [vmem:[#allocation2 + $0x1bb4] ss:$8 sps:$4 sm:$0xff]   ;;  %v11661_v37 = vld [vmem:[#allocation2 + $0x1bb0] ss:$8 sps:$4 sm:$0xff]  }
 0x800   :  { %8332 = vmatprep.subr.bf16.mxu1 %v11495_v40  ;;  %v11675_v40 = vld [vmem:[#allocation2 + $0x1b94] ss:$8 sps:$4 sm:$0xff]  }
 0x803   :  { %8333 = vmatpush1.bf16.msra.mxu1 %v11493_v43  ;;  %v11679_v43 = vld [vmem:[#allocation2 + $0x1b80] ss:$8 sps:$4 sm:$0xff]  }
 0x804   :  { %8334 = vmatprep.subr.bf16.mxu1 %v11501_v44  ;;  %v11690_v44 = vld [vmem:[#allocation2 + $0x1d74] ss:$8 sps:$4 sm:$0xff]  }
 0x807   :  { %8335 = vmatpush1.bf16.msra.mxu1 %v11499_v45  ;;  %v11685_v45 = vld [vmem:[%s12112_s0 + $0x1a0] ss:$40 sps:$4 sm:$0xff]  }
 0x808   :  { %8336 = vmatprep.subr.bf16.mxu1 %v11507_v46  ;;  %v11688_v46 = vld [vmem:[#allocation2 + $0x1d70] ss:$8 sps:$4 sm:$0xff]  }
 0x80b   :  { %8337 = vmatpush1.bf16.msra.mxu1 %v11505_v47  ;;  %v11741_v47 = vld [vmem:[%s12112_s0 + $0x1b4] ss:$40 sps:$4 sm:$0xff]  }
 0x80c   :  { %8338 = vmatprep.subr.bf16.mxu1 %v11513_v48  ;;  %v11696_v48 = vld [vmem:[#allocation2 + $0x1d64] ss:$8 sps:$4 sm:$0xff]  }
 0x80f   :  { %8339 = vmatpush1.bf16.msra.mxu1 %v11511_v49  ;;  %v11694_v49 = vld [vmem:[#allocation2 + $0x1d60] ss:$8 sps:$4 sm:$0xff]  }
 0x810   :  { %8340 = vmatprep.subr.bf16.mxu1 %v11519_v50  ;;  %v11699_v50 = vld [vmem:[#allocation2 + $0x1d54] ss:$8 sps:$4 sm:$0xff]  }
 0x813   :  { %8341 = vmatpush1.bf16.msra.mxu1 %v11517_v51  ;;  %v11697_v51 = vld [vmem:[#allocation2 + $0x1d50] ss:$8 sps:$4 sm:$0xff]  }
 0x814   :  { %8342 = vmatprep.subr.bf16.mxu1 %v11525_v52  ;;  %v11702_v52 = vld [vmem:[#allocation2 + $0x1d44] ss:$8 sps:$4 sm:$0xff]  }
 0x817   :  { %8343 = vmatpush1.bf16.msra.mxu1 %v11523_v53  ;;  %v11700_v53 = vld [vmem:[#allocation2 + $0x1d40] ss:$8 sps:$4 sm:$0xff]  }
 0x818   :  { %8344 = vmatprep.subr.bf16.mxu1 %v11531_v54  ;;  %v11705_v54 = vld [vmem:[#allocation2 + $0x1d34] ss:$8 sps:$4 sm:$0xff]  }
 0x81b   :  { %8345 = vmatpush1.bf16.msra.mxu1 %v11529_v55  ;;  %v11703_v55 = vld [vmem:[#allocation2 + $0x1d30] ss:$8 sps:$4 sm:$0xff]  }
 0x81c   :  { %8346 = vmatprep.subr.bf16.mxu1 %v11537_v56  ;;  %v11708_v56 = vld [vmem:[#allocation2 + $0x1d24] ss:$8 sps:$4 sm:$0xff]  }
 0x81f   :  { %8347 = vmatpush2.bf16.msra.mxu1 %v11535_v59  ;;  %v11706_v59 = vld [vmem:[#allocation2 + $0x1d20] ss:$8 sps:$4 sm:$0xff]  }
 0x820   :  { %8348 = vmatprep.subr.bf16.mxu1 %v11543_v60  ;;  %v11711_v60 = vld [vmem:[#allocation2 + $0x1d14] ss:$8 sps:$4 sm:$0xff]  }
 0x823   :  { %8349 = vmatpush2.bf16.msra.mxu1 %v11541_v61  ;;  %v11709_v61 = vld [vmem:[#allocation2 + $0x1d10] ss:$8 sps:$4 sm:$0xff]  }
 0x824   :  { %8350 = vmatprep.subr.bf16.mxu1 %v11549_v62  ;;  %v11714_v62 = vld [vmem:[#allocation2 + $0x1d04] ss:$8 sps:$4 sm:$0xff]  }
 0x827   :  { %8351 = vmatpush2.bf16.msra.mxu1 %v11547_v63  ;;  %v11712_v63 = vld [vmem:[#allocation2 + $0x1d00] ss:$8 sps:$4 sm:$0xff]  }
 0x828   :  { %8352 = vmatprep.subr.bf16.mxu1 %v11555_v0  ;;  %v11717_v0 = vld [vmem:[#allocation2 + $0x1df4] ss:$8 sps:$4 sm:$0xff]  }
 0x82b   :  { %8353 = vmatpush2.bf16.msra.mxu1 %v11553_v1  ;;  %v11715_v1 = vld [vmem:[#allocation2 + $0x1df0] ss:$8 sps:$4 sm:$0xff]  }
 0x82c   :  { %8354 = vmatprep.subr.bf16.mxu1 %v11561_v2  ;;  %v11720_v2 = vld [vmem:[#allocation2 + $0x1de4] ss:$8 sps:$4 sm:$0xff]  }
 0x82f   :  { %8355 = vmatpush2.bf16.msra.mxu1 %v11559_v3  ;;  %v11718_v3 = vld [vmem:[#allocation2 + $0x1de0] ss:$8 sps:$4 sm:$0xff]  }
 0x830   :  { %8356 = vmatprep.subr.bf16.mxu1 %v11567_v4  ;;  %v11723_v4 = vld [vmem:[#allocation2 + $0x1dd4] ss:$8 sps:$4 sm:$0xff]  }
 0x833   :  { %8357 = vmatpush2.bf16.msra.mxu1 %v11565_v5  ;;  %v11721_v5 = vld [vmem:[#allocation2 + $0x1dd0] ss:$8 sps:$4 sm:$0xff]  }
 0x834   :  { %8358 = vmatprep.subr.bf16.mxu1 %v11573_v6  ;;  %v11726_v6 = vld [vmem:[#allocation2 + $0x1dc4] ss:$8 sps:$4 sm:$0xff]  }
 0x837   :  { %8359 = vmatpush2.bf16.msra.mxu1 %v11571_v7  ;;  %v11724_v7 = vld [vmem:[#allocation2 + $0x1dc0] ss:$8 sps:$4 sm:$0xff]  }
 0x838   :  { %8360 = vmatprep.subr.bf16.mxu1 %v11579_v8  ;;  %v11729_v8 = vld [vmem:[#allocation2 + $0x1db4] ss:$8 sps:$4 sm:$0xff]  }
 0x83b   :  { %8361 = vmatpush2.bf16.msra.mxu1 %v11577_v9  ;;  %v11727_v9 = vld [vmem:[#allocation2 + $0x1db0] ss:$8 sps:$4 sm:$0xff]  }
 0x83c   :  { %8416 = vmatprep.subr.bf16.mxu1 %v11588_v10  ;;  %v11732_v10 = vld [vmem:[#allocation2 + $0x1da4] ss:$8 sps:$4 sm:$0xff]  }
 0x83e   :  { %8363 = vmatmul.mubr.bf16.vlgmr.msra.gmra.mxu1 %v11583_v11  ;;  %v11730_v11 = vld [vmem:[#allocation2 + $0x1da0] ss:$8 sps:$4 sm:$0xff]  }
 0x83f   :  { %8417 = vmatpush1.bf16.msra.mxu1 %v11586_v12  ;;  %8448 = vmatprep.mubr.bf16.mxu1 %v11687_v13  ;;  %v11735_v12 = vld [vmem:[#allocation2 + $0x1d94] ss:$8 sps:$4 sm:$0xff]   ;;  %v11733_v13 = vld [vmem:[#allocation2 + $0x1d90] ss:$8 sps:$4 sm:$0xff]  }
 0x840   :  { %8418 = vmatprep.subr.bf16.mxu1 %v11597_v14  ;;  %v11738_v14 = vld [vmem:[#allocation2 + $0x1d84] ss:$8 sps:$4 sm:$0xff]  }
 0x843   :  { %8419 = vmatpush1.bf16.msra.mxu1 %v11595_v15  ;;  %v11736_v15 = vld [vmem:[#allocation2 + $0x1d80] ss:$8 sps:$4 sm:$0xff]  }
 0x844   :  { %8420 = vmatprep.subr.bf16.mxu1 %v11603_v16  ;;  %v11739_v16 = vld [vmem:[%s12112_s0 + $0x1b0] ss:$40 sps:$4 sm:$0xff]  }
 0x847   :  { %8421 = vmatpush1.bf16.msra.mxu1 %v11601_v17 }
 0x848   :  { %8422 = vmatprep.subr.bf16.mxu1 %v11609_v18 }
 0x84b   :  { %8423 = vmatpush1.bf16.msra.mxu1 %v11607_v19 }
 0x84c   :  { %8424 = vmatprep.subr.bf16.mxu1 %v11615_v20 }
 0x84f   :  { %8425 = vmatpush1.bf16.msra.mxu1 %v11613_v21  ;;  %v9719_v21 = vld [vmem:[#allocation7 + $0x4] ss:$0 sm:$0xff] }
 0x850   :  { %8426 = vmatprep.subr.bf16.mxu1 %v11621_v22 }
 0x853   :  { %8427 = vmatpush1.bf16.msra.mxu1 %v11619_v23 }
 0x854   :  { %8428 = vmatprep.subr.bf16.mxu1 %v11627_v24 }
 0x857   :  { %8429 = vmatpush1.bf16.msra.mxu1 %v11625_v25 }
 0x858   :  { %8430 = vmatprep.subr.bf16.mxu1 %v11633_v26  ;;  %v11742_v26 = vld [vmem:[#allocation6 + $0x2f8] sm:$0xff]  }
 0x859   :  { %10098 = vmatprep.subr.bf16.mxu0 %v11742_v26 }
 0x85b   :  { %8431 = vmatpush1.bf16.msra.mxu1 %v11631_v27  ;;  %v11743_v27 = vld [vmem:[#allocation6 + $0x2b8] sm:$0xff]  }
 0x85c   :  { %8432 = vmatprep.subr.bf16.mxu1 %v11639_v28  ;;  %v11744_v28 = vld [vmem:[#allocation6 + $0x2f0] sm:$0xff]   ;;  %10099 = vmatpush3.bf16.msra.mxu0 %v11743_v27 }
 0x85d   :  { %10100 = vmatprep.subr.bf16.mxu0 %v11744_v28 }
 0x85f   :  { %8433 = vmatpush2.bf16.msra.mxu1 %v11637_v29 }
 0x860   :  { %8434 = vmatprep.subr.bf16.mxu1 %v11645_v30  ;;  %v11745_v30 = vld [vmem:[#allocation6 + $0x2b0] sm:$0xff]  }
 0x861   :  { %10101 = vmatpush3.bf16.msra.mxu0 %v11745_v30 }
 0x863   :  { %8435 = vmatpush2.bf16.msra.mxu1 %v11643_v31  ;;  %v11746_v31 = vld [vmem:[#allocation6 + $0x2e8] sm:$0xff]  }
 0x864   :  { %8436 = vmatprep.subr.bf16.mxu1 %v11651_v32  ;;  %v11747_v32 = vld [vmem:[#allocation6 + $0x2a8] sm:$0xff]   ;;  %10102 = vmatprep.subr.bf16.mxu0 %v11746_v31 }
 0x865   :  { %10103 = vmatpush3.bf16.msra.mxu0 %v11747_v32  ;;  %v9920_v32 = vld [vmem:[#allocation7 + $0x5] ss:$0 sm:$0xff] }
 0x867   :  { %8437 = vmatpush2.bf16.msra.mxu1 %v11649_v33  ;;  %v11748_v33 = vld [vmem:[#allocation6 + $0x2e0] sm:$0xff]  }
 0x868   :  { %8438 = vmatprep.subr.bf16.mxu1 %v11657_v34  ;;  %v11749_v34 = vld [vmem:[#allocation6 + $0x2a0] sm:$0xff]   ;;  %10104 = vmatprep.subr.bf16.mxu0 %v11748_v33 }
 0x869   :  { %10105 = vmatpush3.bf16.msra.mxu0 %v11749_v34 }
 0x86b   :  { %8439 = vmatpush2.bf16.msra.mxu1 %v11655_v35  ;;  %v11750_v35 = vld [vmem:[#allocation6 + $0x2d8] sm:$0xff]  }
 0x86c   :  { %8440 = vmatprep.subr.bf16.mxu1 %v11663_v36  ;;  %v11751_v36 = vld [vmem:[#allocation6 + $0x298] sm:$0xff]   ;;  %10106 = vmatprep.subr.bf16.mxu0 %v11750_v35 }
 0x86d   :  { %10107 = vmatpush3.bf16.msra.mxu0 %v11751_v36 }
 0x86f   :  { %8441 = vmatpush2.bf16.msra.mxu1 %v11661_v37  ;;  %v11752_v37 = vld [vmem:[#allocation6 + $0x2d0] sm:$0xff]  }
 0x870   :  { %8442 = vmatprep.subr.bf16.mxu1 %v11669_v38  ;;  %v11753_v38 = vld [vmem:[#allocation6 + $0x290] sm:$0xff]   ;;  %10108 = vmatprep.subr.bf16.mxu0 %v11752_v37 }
 0x871   :  { %10109 = vmatpush3.bf16.msra.mxu0 %v11753_v38 }
 0x873   :  { %8443 = vmatpush2.bf16.msra.mxu1 %v11667_v39  ;;  %v11754_v39 = vld [vmem:[#allocation6 + $0x2c8] sm:$0xff]  }
 0x874   :  { %8444 = vmatprep.subr.bf16.mxu1 %v11675_v40  ;;  %v11755_v40 = vld [vmem:[#allocation6 + $0x288] sm:$0xff]   ;;  %10110 = vmatprep.subr.bf16.mxu0 %v11754_v39 }
 0x875   :  { %10111 = vmatpush3.bf16.msra.mxu0 %v11755_v40 }
 0x877   :  { %8445 = vmatpush2.bf16.msra.mxu1 %v11673_v41  ;;  %v11756_v41 = vld [vmem:[#allocation6 + $0x2c0] sm:$0xff]  }
 0x878   :  { %8446 = vmatprep.subr.bf16.mxu1 %v11681_v42  ;;  %v11757_v42 = vld [vmem:[#allocation6 + $0x280] sm:$0xff]   ;;  %10112 = vmatprep.subr.bf16.mxu0 %v11756_v41 }
 0x879   :  { %10113 = vmatpush3.bf16.msra.mxu0 %v11757_v42 }
 0x87b   :  { %8447 = vmatpush2.bf16.msra.mxu1 %v11679_v43 }
 0x87c   :  { %8502 = vmatprep.subr.bf16.mxu1 %v11690_v44 }
 0x87e   :  { %8449 = vmatmul.mubr.bf16.vlgmr.msra.gmra.mxu1 %v11685_v45  ;;  %v8407_v45 = vpop.f32.mrf.mxu0 }
 0x87f   :  { %8503 = vmatpush1.bf16.msra.mxu1 %v11688_v46  ;;  %8534 = vmatprep.mubr.bf16.mxu1 %v11741_v47 }
 0x880   :  { %8504 = vmatprep.subr.bf16.mxu1 %v11696_v48  ;;  %v8409_v47 = vpop.f32.mrf.mxu0 }
 0x883   :  { %8505 = vmatpush1.bf16.msra.mxu1 %v11694_v49  ;;  %v8411_v49 = vpop.f32.mrf.mxu0 }
 0x884   :  { %8506 = vmatprep.subr.bf16.mxu1 %v11699_v50  ;;  %v7468_v50 = vld [vmem:[#allocation4 + $0xa] sm:$0x3] }
 0x887   :  { %8507 = vmatpush1.bf16.msra.mxu1 %v11697_v51 }
 0x888   :  { %8508 = vmatprep.subr.bf16.mxu1 %v11702_v52  ;;  %v8413_v52 = vpop.f32.mrf.mxu0 }
 0x88b   :  { %8509 = vmatpush1.bf16.msra.mxu1 %v11700_v53  ;;  %v7477_v53 = vrot.slane %v7468_v50, %v11934_v57 }
 0x88c   :  { %8510 = vmatprep.subr.bf16.mxu1 %v11705_v54  ;;  %v7473_v54 = vrot.slane %v7468_v50, %v11936_v58 }
 0x88f   :  { %8511 = vmatpush1.bf16.msra.mxu1 %v11703_v55 }
 0x890   :  { %8512 = vmatprep.subr.bf16.mxu1 %v11708_v56  ;;  %v8493_v56 = vpop.f32.mrf.mxu0 }
 0x893   :  { %8513 = vmatpush1.bf16.msra.mxu1 %v11706_v59 }
 0x894   :  { %8514 = vmatprep.subr.bf16.mxu1 %v11711_v60 }
 0x897   :  { %8515 = vmatpush1.bf16.msra.mxu1 %v11709_v61 }
 0x898   :  { %8516 = vmatprep.subr.bf16.mxu1 %v11714_v62 }
 0x89b   :  { %8517 = vmatpush1.bf16.msra.mxu1 %v11712_v63  ;;  %v8495_v63 = vpop.f32.mrf.mxu0 }
 0x89c   :  { %8518 = vmatprep.subr.bf16.mxu1 %v11717_v0 }
 0x89f   :  { %8519 = vmatpush2.bf16.msra.mxu1 %v11715_v1 }
 0x8a0   :  { %8520 = vmatprep.subr.bf16.mxu1 %v11720_v2 }
 0x8a3   :  { %8521 = vmatpush2.bf16.msra.mxu1 %v11718_v3 }
 0x8a4   :  { %8522 = vmatprep.subr.bf16.mxu1 %v11723_v4 }
 0x8a7   :  { %8523 = vmatpush2.bf16.msra.mxu1 %v11721_v5  ;;  %v8497_v5 = vpop.f32.mrf.mxu0 }
 0x8a8   :  { %8524 = vmatprep.subr.bf16.mxu1 %v11726_v6 }
 0x8a9   :  { %v8499_v58 = vpop.f32.mrf.mxu0 }
 0x8ab   :  { %8525 = vmatpush2.bf16.msra.mxu1 %v11724_v7 }
 0x8ac   :  { %8526 = vmatprep.subr.bf16.mxu1 %v11729_v8 }
 0x8af   :  { %8527 = vmatpush2.bf16.msra.mxu1 %v11727_v9 }
 0x8b0   :  { %8528 = vmatprep.subr.bf16.mxu1 %v11732_v10 }
 0x8b3   :  { %8529 = vmatpush2.bf16.msra.mxu1 %v11730_v11 }
 0x8b4   :  { %8530 = vmatprep.subr.bf16.mxu1 %v11735_v12 }
 0x8b7   :  { %8531 = vmatpush2.bf16.msra.mxu1 %v11733_v13 }
 0x8b8   :  { %8532 = vmatprep.subr.bf16.mxu1 %v11738_v14 }
 0x8bb   :  { %8533 = vmatpush2.bf16.msra.mxu1 %v11736_v15 }
 0x8be   :  { %8535 = vmatmul.mubr.bf16.vlgmr.msra.gmra.mxu1 %v11739_v16  ;;  %v10092_v17 = vpop.f32.mrf.mxu1 }
 0x8c0   :  { %v10093_v18 = vpop.f32.mrf.mxu1 }
 0x8c1   :  { %v10094_v20 = vadd.f32 %v10093_v18, %v10092_v17 }
 0x8c2   :  { %v10095_v19 = vpop.f32.mrf.mxu1 }
 0x8c3   :  { %v7278_v24 = vadd.f32 %v10094_v20, %v9719_v21 }
 0x8c4   :  { %v10096_v22 = vpop.f32.mrf.mxu1 }
 0x8c5   :  { %v10097_v23 = vadd.f32 %v10096_v22, %v10095_v19 }
 0x8c7   :  { %v7281_v25 = vadd.f32 %v10097_v23, %v9719_v21 }
 0x8c9   :  { %v9976_v29 = vpack.c.bf16 %v7281_v25, %v7278_v24 }
 0x8cb   :  { %9986 = vst [vmem:[%s12117_s5 + $0x20] sm:$0xff] %v9976_v29  }
 0x8fe   :  { %v8364_v43 = vpop.f32.mrf.mxu1 }
 0x8ff   :  { %v8365_v61 = vadd.f32 %v8364_v43, %v7473_v54 }
 0x900   :  { %v8366_v44 = vpop.f32.mrf.mxu1 }
 0x901   :  { %v8367_v59 = vadd.f32 %v8366_v44, %v7477_v53  ;;  %v8408_v3 = vadd.f32 %v8407_v45, %v8365_v61 }
 0x902   :  { %v8368_v46 = vpop.f32.mrf.mxu1 }
 0x903   :  { %v8369_v60 = vadd.f32 %v8368_v46, %v7473_v54  ;;  %v8410_v1 = vadd.f32 %v8409_v47, %v8367_v59 }
 0x904   :  { %v8370_v48 = vpop.f32.mrf.mxu1 }
 0x905   :  { %v8371_v0 = vadd.f32 %v8370_v48, %v7477_v53  ;;  %v8412_v2 = vadd.f32 %v8411_v49, %v8369_v60 }
 0x907   :  { %v8414_v6 = vadd.f32 %v8413_v52, %v8371_v0 }
 0x93e   :  { %v8450_v51 = vpop.f32.mrf.mxu1 }
 0x93f   :  { %v8451_v9 = vadd.f32 %v8450_v51, %v8408_v3 }
 0x940   :  { %v8452_v55 = vpop.f32.mrf.mxu1 }
 0x941   :  { %v8453_v7 = vadd.f32 %v8452_v55, %v8410_v1  ;;  %v8494_v14 = vadd.f32 %v8493_v56, %v8451_v9 }
 0x942   :  { %v8454_v62 = vpop.f32.mrf.mxu1 }
 0x943   :  { %v8455_v8 = vadd.f32 %v8454_v62, %v8412_v2  ;;  %v8496_v12 = vadd.f32 %v8495_v63, %v8453_v7 }
 0x944   :  { %v8456_v4 = vpop.f32.mrf.mxu1 }
 0x945   :  { %v8457_v10 = vadd.f32 %v8456_v4, %v8414_v6  ;;  %v8498_v13 = vadd.f32 %v8497_v5, %v8455_v8 }
 0x947   :  { %v8500_v16 = vadd.f32 %v8499_v58, %v8457_v10 }
 0x97e   :  { %v8536_v57 = vpop.f32.mrf.mxu1 }
 0x97f   :  { %v8537_v19 = vadd.f32 %v8536_v57, %v8494_v14 }
 0x980   :  { %v8538_v11 = vpop.f32.mrf.mxu1 }
 0x981   :  { %v8539_v17 = vadd.f32 %v8538_v11, %v8496_v12  ;;  %v8545_v25 = vmax.f32 %v8537_v19, 0.0 }
 0x982   :  { %v8540_v15 = vpop.f32.mrf.mxu1 }
 0x983   :  { %v8541_v18 = vadd.f32 %v8540_v15, %v8498_v13  ;;  %v8546_v23 = vmax.f32 %v8539_v17, 0.0 }
 0x984   :  { %v8542_v20 = vpop.f32.mrf.mxu1 }
 0x985   :  { %v8543_v21 = vadd.f32 %v8542_v20, %v8500_v16  ;;  %v8547_v22 = vmax.f32 %v8541_v18, 0.0 }
 0x987   :  { %v8548_v24 = vmax.f32 %v8543_v21, 0.0  ;;  %v8549_v27 = vpack.c.bf16 %v8547_v22, %v8545_v25 }
 0x989   :  { %v8550_v26 = vpack.c.bf16 %v8548_v24, %v8546_v23 }
 0x98b   :  { %8720 = vmatprep.mubr.bf16.mxu0 %v8550_v26 }
 0x98c   :  { %8721 = vmatmul.mubr.bf16.vlgmr.msra.gmra.mxu0 %v8549_v27 }
 0xa4c   :  { %v10114_v28 = vpop.f32.mrf.mxu0 }
 0xa4e   :  { %v10115_v29 = vpop.f32.mrf.mxu0 }
 0xa4f   :  { %v10116_v31 = vadd.f32 %v10115_v29, %v10114_v28 }
 0xa50   :  { %v10117_v30 = vpop.f32.mrf.mxu0 }
 0xa51   :  { %v8723_v35 = vadd.f32 %v10116_v31, %v9920_v32 }
 0xa52   :  { %v10118_v33 = vpop.f32.mrf.mxu0 }
 0xa53   :  { %v10119_v34 = vadd.f32 %v10118_v33, %v10117_v30 }
 0xa55   :  { %v8726_v36 = vadd.f32 %v10119_v34, %v9920_v32 }
 0xa57   :  { %v9981_v37 = vpack.c.bf16 %v8726_v36, %v8723_v35 }
 0xa59   :  { %9987 = vst [vmem:[%s12117_s5 + $0x28] sm:$0xff] %v9981_v37  }
 0xa5a   :  { %8744 = vsyncpa [#allocation3], 1 }
 0xa5b   :  { %8745 = vsyncpa [#allocation5], 1 }
 0xa5c   :  { %8746 = vsyncpa [#allocation8], 1 }

</bundles_post_ra>
